<compile_context>
chip_gen: v5e
topology: v5e:2x2
jax: 0.10.0
libtpu: 0.0.40
codegen_flags: <defaults>
</compile_context>

<pallas_src>
import functools

import jax
import jax.numpy as jnp
from jax import lax
from jax.experimental import pallas as pl
from jax.experimental.pallas import tpu as pltpu


# --------------------------- host-side weight packing --------------------------

def _interleave_gate_cols(wf, wb, H):
    """(K, 4H) fwd & bwd -> (K, 8H) with per-gate column blocks [i_f|i_b|f_f|f_b|g_f|g_b|o_f|o_b]."""
    parts = []
    for g in range(4):
        parts.append(wf[:, g * H:(g + 1) * H])
        parts.append(wb[:, g * H:(g + 1) * H])
    return jnp.concatenate(parts, axis=1)


def _blockdiag_whh(wf_t, wb_t, H):
    """(H,4H) fwd + (H,4H) bwd -> (2H, 8H) block-diagonal recurrent weight so that
    [h_f | h_b] @ whh_blk produces both directions' recurrent gate terms in one matmul."""
    z = jnp.zeros((H, H), wf_t.dtype)
    parts = []
    for g in range(4):
        top = jnp.concatenate([wf_t[:, g * H:(g + 1) * H], z], axis=1)   # (H, 2H)
        bot = jnp.concatenate([z, wb_t[:, g * H:(g + 1) * H]], axis=1)   # (H, 2H)
        parts.append(jnp.concatenate([top, bot], axis=0))                # (2H, 2H)
    return jnp.concatenate(parts, axis=1)                                # (2H, 8H)


# ------------------------------- fused kernel ----------------------------------

def _make_fused_kernel(num_layers):
    """Builds the fused multi-layer bidirectional LSTM + FC kernel.

    Ref order: x, (w_cat, b_cat, whh_blk) * num_layers, fc_w_t, fc_b, out, *scratch.
    """

    def kernel(*refs):
        x_ref = refs[0]
        layer_refs = refs[1:1 + 3 * num_layers]
        fcw_ref, fcb_ref, o_ref = refs[1 + 3 * num_layers:4 + 3 * num_layers]
        scratch = refs[4 + 3 * num_layers:]

        T, Bb, _ = x_ref.shape
        H = layer_refs[2].shape[0] // 2          # whh_blk is (2H, 8H)

        # Hoisted full-vreg constants (shared by all layers and steps).
        lane = lax.broadcasted_iota(jnp.int32, (Bb, 8 * H), 1)
        is_tanh = (lane >= 4 * H) & (lane < 6 * H)               # the 'g' gate block
        scale = jnp.where(is_tanh, 1.0, 0.5).astype(jnp.float32)
        offset = jnp.where(is_tanh, 0.0, 0.5).astype(jnp.float32)
        is_fwd_col = (lane % (2 * H)) < H                        # fwd half of each gate block
        lane2 = lax.broadcasted_iota(jnp.int32, (Bb, 2 * H), 1)
        fwd_half = lane2 < H

        h_first = None   # last layer: h after the bwd direction's first step
        h_final = None   # last layer: h after the fwd direction's final step

        for l in range(num_layers):
            w_ref, b_ref, whh_ref = layer_refs[3 * l:3 * l + 3]
            if l == 0:
                xin = x_ref[...]                                 # (T, Bb, D_in)
            else:
                xin = scratch[(l - 1) % 2][...]                  # (T, Bb, 2H), VMEM-resident
            D_in = xin.shape[-1]

            # Hoisted fused (fwd||bwd) input projection for the whole sequence:
            # one (T*Bb, D_in) x (D_in, 8H) MXU matmul with the bias folded in.
            xw = (jnp.dot(xin.reshape(T * Bb, D_in), w_ref[...],
                          preferred_element_type=jnp.float32)
                  + b_ref[...]).reshape(T, Bb, 8 * H)

            whh = whh_ref[...]                                   # (2H, 8H) block-diagonal
            h = jnp.zeros((Bb, 2 * H), jnp.float32)              # [h_fwd | h_bwd]
            c = jnp.zeros((Bb, 2 * H), jnp.float32)              # [c_fwd | c_bwd]
            is_last = l == num_layers - 1
            out_buf = None if is_last else scratch[l % 2]

            # Fully-unrolled (static, short) time loop; both directions advance inside the
            # same fused ops, so the serial critical path is ONE MXU matmul per step.
            # TODO(synk): switch to lax.fori_loop(..., unroll=k) for long sequences.
            for s in range(T):
                # fwd columns read the projection at time s, bwd columns at time T-1-s.
                pre = jnp.where(is_fwd_col, xw[s], xw[T - 1 - s])
                gates = pre + jnp.dot(h, whh, preferred_element_type=jnp.float32)
                act = scale * jnp.tanh(scale * gates) + offset   # all 8 gates, one EUP tanh
                i_g = act[:, 0:2 * H]
                f_g = act[:, 2 * H:4 * H]
                g_g = act[:, 4 * H:6 * H]
                o_g = act[:, 6 * H:8 * H]
                c = f_g * c + i_g * g_g
                h = o_g * jnp.tanh(c)
                if is_last:
                    if s == 0:
                        h_first = h
                    if s == T - 1:
                        h_final = h
                else:
                    # Per-step VMEM scratch stores: no Python-list stacking (flat vreg
                    # pressure) and the inter-layer activation never touches HBM.
                    out_buf[s, :, 0:H] = h[:, 0:H]
                    out_buf[T - 1 - s, :, H:2 * H] = h[:, H:2 * H]

        # out[-1] = [h_fwd(T-1) | h_bwd at output time T-1 (== bwd's first step)].
        last = jnp.where(fwd_half, h_final, h_first)             # (Bb, 2H)
        o_ref[...] = (jnp.dot(last, fcw_ref[...], preferred_element_type=jnp.float32)
                      + fcb_ref[...])

    return kernel


# -------------------------------- wrappers --------------------------------------

def _rep_spec(arr):
    """Full-array (replicated) BlockSpec for weights/biases."""
    zero = (0,) * arr.ndim
    return pl.BlockSpec(arr.shape, lambda i, _z=zero: _z)


def run_bilstm_fused(x, fused, *, block_b=None):
    T, B, D = x.shape
    layers = fused["layers"]
    L = len(layers)
    H = layers[0]["whh_blk"].shape[0] // 2
    O = fused["fc_w_t"].shape[1]

    bb = B if block_b is None else block_b
    assert B % bb == 0 and (bb == B or bb % 8 == 0)
    n_scratch = min(2, L - 1)   # ping-pong inter-layer activation buffers (VMEM)

    flat_w = []
    in_specs = [pl.BlockSpec((T, bb, D), lambda i: (0, i, 0))]
    for lyr in layers:
        for name in ("w_cat", "b_cat", "whh_blk"):
            flat_w.append(lyr[name])
            in_specs.append(_rep_spec(lyr[name]))
    flat_w += [fused["fc_w_t"], fused["fc_b"]]
    in_specs += [_rep_spec(fused["fc_w_t"]), _rep_spec(fused["fc_b"])]

    return pl.pallas_call(
        _make_fused_kernel(L),
        out_shape=jax.ShapeDtypeStruct((B, O), jnp.float32),
        grid=(B // bb,),
        in_specs=in_specs,
        out_specs=pl.BlockSpec((bb, O), lambda i: (i, 0)),
        scratch_shapes=[pltpu.VMEM((T, bb, 2 * H), jnp.float32)] * n_scratch,
        compiler_params=pltpu.CompilerParams(dimension_semantics=("parallel",)),
    )(x, *flat_w)


@functools.partial(jax.jit, static_argnames=("block_b",))
def bilstm_forward(x, fused, block_b=None):
    """x: (T, B, input_size) f32 -> (B, output_size) f32.

    block_b=None -> whole batch per grid step (grid=(1,)); on v7x pass block_b=B//2 so the
    'parallel' batch axis maps one block per TensorCore.
    """
    return run_bilstm_fused(x, fused, block_b=block_b)


# ------------------------------ parameter init ----------------------------------

def init_params(key, input_size, hidden_size, num_layers, output_size):
    """PyTorch-style uniform(-1/sqrt(H), 1/sqrt(H)) init.

    Returns (fused, raw): `fused` holds the kernel's packed weights, `raw` the plain
    per-direction weights used by the pure-JAX reference.
    """
    H = hidden_size
    k = 1.0 / jnp.sqrt(jnp.float32(H))
    raw = {"lstm": []}
    fused_layers = []
    for layer in range(num_layers):
        d_in = input_size if layer == 0 else 2 * H
        dirs = []
        for _ in range(2):  # forward, backward
            key, k1, k2, k3, k4 = jax.random.split(key, 5)
            w_ih = jax.random.uniform(k1, (4 * H, d_in), jnp.float32, -k, k)
            w_hh = jax.random.uniform(k2, (4 * H, H), jnp.float32, -k, k)
            b_ih = jax.random.uniform(k3, (4 * H,), jnp.float32, -k, k)
            b_hh = jax.random.uniform(k4, (4 * H,), jnp.float32, -k, k)
            dirs.append(dict(wih_t=w_ih.T,                       # (d_in, 4H)
                             whh_t=w_hh.T,                       # (H, 4H)
                             b=(b_ih + b_hh).reshape(1, -1)))    # (1, 4H)
        raw["lstm"].append(dirs)
        pf, pb = dirs
        fused_layers.append(dict(
            w_cat=_interleave_gate_cols(pf["wih_t"], pb["wih_t"], H),   # (d_in, 8H)
            b_cat=_interleave_gate_cols(pf["b"], pb["b"], H),           # (1, 8H)
            whh_blk=_blockdiag_whh(pf["whh_t"], pb["whh_t"], H),        # (2H, 8H)
        ))
    key, kf1, kf2 = jax.random.split(key, 3)
    kf = 1.0 / jnp.sqrt(jnp.float32(2 * H))
    fc_w = jax.random.uniform(kf1, (output_size, 2 * H), jnp.float32, -kf, kf)
    fc_b = jax.random.uniform(kf2, (output_size,), jnp.float32, -kf, kf)
    raw["fc_w_t"] = fc_w.T
    raw["fc_b"] = fc_b.reshape(1, -1)
    fused = dict(layers=fused_layers, fc_w_t=fc_w.T, fc_b=fc_b.reshape(1, -1))
    return fused, raw


# ------------------------- pure-JAX reference (check) ---------------------------

def _ref_lstm_layer(x, wih_t, whh_t, b):
    T, B, _ = x.shape
    H = whh_t.shape[0]

    def step(carry, xt):
        h, c = carry
        gates = xt @ wih_t + h @ whh_t + b
        i_g = jax.nn.sigmoid(gates[:, 0 * H:1 * H])
        f_g = jax.nn.sigmoid(gates[:, 1 * H:2 * H])
        g_g = jnp.tanh(gates[:, 2 * H:3 * H])
        o_g = jax.nn.sigmoid(gates[:, 3 * H:4 * H])
        c_new = f_g * c + i_g * g_g
        h_new = o_g * jnp.tanh(c_new)
        return (h_new, c_new), h_new

    h0 = jnp.zeros((B, H), jnp.float32)
    c0 = jnp.zeros((B, H), jnp.float32)
    _, outs = lax.scan(step, (h0, c0), x)
    return outs


def bilstm_reference(x, raw, num_layers):
    layer_in = x
    for layer in range(num_layers):
        pf, pb = raw["lstm"][layer]
        of = _ref_lstm_layer(layer_in, pf["wih_t"], pf["whh_t"], pf["b"])
        ob = _ref_lstm_layer(layer_in[::-1], pb["wih_t"], pb["whh_t"], pb["b"])[::-1]
        layer_in = jnp.concatenate([of, ob], axis=-1)
    return layer_in[-1] @ raw["fc_w_t"] + raw["fc_b"]


# ----------------------------------- main ---------------------------------------

if __name__ == "__main__":
    SEQ_LEN = 8
    BATCH = 16
    INPUT_SIZE = 16
    HIDDEN_SIZE = 32
    NUM_LAYERS = 2
    OUTPUT_SIZE = 8

    root = jax.random.PRNGKey(0)
    k_x, k_p = jax.random.split(root)

    x = jax.random.normal(k_x, (SEQ_LEN, BATCH, INPUT_SIZE), jnp.float32)
    fused, raw = init_params(k_p, INPUT_SIZE, HIDDEN_SIZE, NUM_LAYERS, OUTPUT_SIZE)

    out = bilstm_forward(x, fused)          # block_b=None -> whole batch, grid=(1,)
    out = jax.block_until_ready(out)
    assert out.shape == (BATCH, OUTPUT_SIZE), out.shape

    ref = jax.block_until_ready(bilstm_reference(x, raw, NUM_LAYERS))
    assert jnp.allclose(out, ref, atol=2e-3, rtol=2e-3), (
        float(jnp.max(jnp.abs(out - ref)))
    )

    print("KERNEL_OK")
</pallas_src>

<mosaic_0001>
module attributes {stable_mosaic.version = 11 : i64} {
  func.func @kernel(%arg0: i32, %arg1: memref<8x16x16xf32, #tpu.memory_space<vmem>>, %arg2: memref<16x256xf32, #tpu.memory_space<vmem>>, %arg3: memref<1x256xf32, #tpu.memory_space<vmem>>, %arg4: memref<64x256xf32, #tpu.memory_space<vmem>>, %arg5: memref<64x256xf32, #tpu.memory_space<vmem>>, %arg6: memref<1x256xf32, #tpu.memory_space<vmem>>, %arg7: memref<64x256xf32, #tpu.memory_space<vmem>>, %arg8: memref<64x8xf32, #tpu.memory_space<vmem>>, %arg9: memref<1x8xf32, #tpu.memory_space<vmem>>, %arg10: memref<16x8xf32, #tpu.memory_space<vmem>>, %arg11: memref<8x16x64xf32, #tpu.memory_space<vmem>>) attributes {dimension_semantics = [#tpu.dimension_semantics<parallel>], iteration_bounds = array<i64: 1>, scalar_prefetch = 0 : i64, scratch_operands = 1 : i64, tpu.core_type = #tpu.core_type<tc>, window_params = [{transform_indices = @transform_0, window_bounds = array<i64: 8, 16, 16>}, {pipeline_mode = #tpu.pipeline_mode<synchronous>, transform_indices = @transform_1, window_bounds = array<i64: 16, 256>}, {pipeline_mode = #tpu.pipeline_mode<synchronous>, transform_indices = @transform_2, window_bounds = array<i64: 1, 256>}, {pipeline_mode = #tpu.pipeline_mode<synchronous>, transform_indices = @transform_3, window_bounds = array<i64: 64, 256>}, {pipeline_mode = #tpu.pipeline_mode<synchronous>, transform_indices = @transform_4, window_bounds = array<i64: 64, 256>}, {pipeline_mode = #tpu.pipeline_mode<synchronous>, transform_indices = @transform_5, window_bounds = array<i64: 1, 256>}, {pipeline_mode = #tpu.pipeline_mode<synchronous>, transform_indices = @transform_6, window_bounds = array<i64: 64, 256>}, {pipeline_mode = #tpu.pipeline_mode<synchronous>, transform_indices = @transform_7, window_bounds = array<i64: 64, 8>}, {pipeline_mode = #tpu.pipeline_mode<synchronous>, transform_indices = @transform_8, window_bounds = array<i64: 1, 8>}, {transform_indices = @transform_9, window_bounds = array<i64: 16, 8>}]} {
    %0 = tpu.iota {dimensions = array<i32: 1>} : vector<16x256xi32>
    %c128_i32 = arith.constant 128 : i32
    %1 = vector.broadcast %c128_i32 : i32 to vector<16x256xi32>
    %2 = arith.cmpi sge, %0, %1 : vector<16x256xi32>
    %c192_i32 = arith.constant 192 : i32
    %3 = vector.broadcast %c192_i32 : i32 to vector<16x256xi32>
    %4 = arith.cmpi slt, %0, %3 : vector<16x256xi32>
    %5 = arith.andi %2, %4 : vector<16x256xi1>
    %cst = arith.constant 1.000000e+00 : f32
    %cst_0 = arith.constant 5.000000e-01 : f32
    %6 = vector.broadcast %cst : f32 to vector<16x256xf32>
    %7 = vector.broadcast %cst_0 : f32 to vector<16x256xf32>
    %8 = arith.select %5, %6, %7 : vector<16x256xi1>, vector<16x256xf32>
    %cst_1 = arith.constant 0.000000e+00 : f32
    %cst_2 = arith.constant 5.000000e-01 : f32
    %9 = vector.broadcast %cst_1 : f32 to vector<16x256xf32>
    %10 = vector.broadcast %cst_2 : f32 to vector<16x256xf32>
    %11 = arith.select %5, %9, %10 : vector<16x256xi1>, vector<16x256xf32>
    %c64_i32 = arith.constant 64 : i32
    %c0_i32 = arith.constant 0 : i32
    %12 = arith.cmpi eq, %c64_i32, %c0_i32 : i32
    %c1_i32 = arith.constant 1 : i32
    %13 = arith.select %12, %c1_i32, %c64_i32 : i32
    %14 = vector.broadcast %13 : i32 to vector<16x256xi32>
    %15 = arith.remsi %0, %14 : vector<16x256xi32>
    %c0_i32_3 = arith.constant 0 : i32
    %16 = vector.broadcast %c0_i32_3 : i32 to vector<16x256xi32>
    %17 = arith.cmpi ne, %15, %16 : vector<16x256xi32>
    %c0_i32_4 = arith.constant 0 : i32
    %18 = vector.broadcast %c0_i32_4 : i32 to vector<16x256xi32>
    %19 = arith.cmpi slt, %15, %18 : vector<16x256xi32>
    %c0_i32_5 = arith.constant 0 : i32
    %20 = arith.cmpi slt, %13, %c0_i32_5 : i32
    %21 = vector.broadcast %20 : i1 to vector<16x256xi1>
    %22 = vector.broadcast %21 : vector<16x256xi1> to vector<16x256xi1>
    %23 = arith.xori %19, %22 : vector<16x256xi1>
    %24 = arith.andi %23, %17 : vector<16x256xi1>
    %25 = vector.broadcast %13 : i32 to vector<16x256xi32>
    %26 = arith.addi %15, %25 : vector<16x256xi32>
    %27 = arith.select %24, %26, %15 : vector<16x256xi1>, vector<16x256xi32>
    %c32_i32 = arith.constant 32 : i32
    %28 = vector.broadcast %c32_i32 : i32 to vector<16x256xi32>
    %29 = arith.cmpi slt, %27, %28 : vector<16x256xi32>
    %30 = tpu.iota {dimensions = array<i32: 1>} : vector<16x64xi32>
    %c32_i32_6 = arith.constant 32 : i32
    %31 = vector.broadcast %c32_i32_6 : i32 to vector<16x64xi32>
    %32 = arith.cmpi slt, %30, %31 : vector<16x64xi32>
    %c0 = arith.constant 0 : index
    %c0_7 = arith.constant 0 : index
    %c0_8 = arith.constant 0 : index
    %33 = vector.load %arg1[%c0, %c0_7, %c0_8] : memref<8x16x16xf32, #tpu.memory_space<vmem>>, vector<8x16x16xf32>
    %34 = vector.shape_cast %33 : vector<8x16x16xf32> to vector<128x16xf32>
    %c0_9 = arith.constant 0 : index
    %c0_10 = arith.constant 0 : index
    %35 = vector.load %arg2[%c0_9, %c0_10] : memref<16x256xf32, #tpu.memory_space<vmem>>, vector<16x256xf32>
    %cst_11 = arith.constant dense<0.000000e+00> : vector<128x256xf32>
    %36 = tpu.matmul %34, %35, %cst_11 {dimension_numbers = #tpu.dot_dimension_numbers<[1], [0], [0], [1], [0, 0, 1, 1], [], []>} : vector<128x16xf32>, vector<16x256xf32>, vector<128x256xf32> -> vector<128x256xf32>
    %c0_12 = arith.constant 0 : index
    %c0_13 = arith.constant 0 : index
    %37 = vector.load %arg3[%c0_12, %c0_13] : memref<1x256xf32, #tpu.memory_space<vmem>>, vector<1x256xf32>
    %38 = vector.broadcast %37 : vector<1x256xf32> to vector<128x256xf32>
    %39 = arith.addf %36, %38 : vector<128x256xf32>
    %40 = vector.shape_cast %39 : vector<128x256xf32> to vector<8x16x256xf32>
    %c0_14 = arith.constant 0 : index
    %c0_15 = arith.constant 0 : index
    %41 = vector.load %arg4[%c0_14, %c0_15] : memref<64x256xf32, #tpu.memory_space<vmem>>, vector<64x256xf32>
    %cst_16 = arith.constant 0.000000e+00 : f32
    %42 = vector.broadcast %cst_16 : f32 to vector<16x64xf32>
    %cst_17 = arith.constant 0.000000e+00 : f32
    %43 = vector.broadcast %cst_17 : f32 to vector<16x64xf32>
    %44 = vector.extract_strided_slice %40 {offsets = [0, 0, 0], sizes = [1, 16, 256], strides = [1, 1, 1]} : vector<8x16x256xf32> to vector<1x16x256xf32>
    %45 = vector.shape_cast %44 : vector<1x16x256xf32> to vector<16x256xf32>
    %46 = vector.extract_strided_slice %40 {offsets = [7, 0, 0], sizes = [1, 16, 256], strides = [1, 1, 1]} : vector<8x16x256xf32> to vector<1x16x256xf32>
    %47 = vector.shape_cast %46 : vector<1x16x256xf32> to vector<16x256xf32>
    %48 = arith.select %29, %45, %47 : vector<16x256xi1>, vector<16x256xf32>
    %cst_18 = arith.constant dense<0.000000e+00> : vector<16x256xf32>
    %49 = tpu.matmul %42, %41, %cst_18 {dimension_numbers = #tpu.dot_dimension_numbers<[1], [0], [0], [1], [0, 0, 1, 1], [], []>} : vector<16x64xf32>, vector<64x256xf32>, vector<16x256xf32> -> vector<16x256xf32>
    %50 = arith.addf %48, %49 : vector<16x256xf32>
    %51 = arith.mulf %8, %50 : vector<16x256xf32>
    %52 = math.tanh %51 : vector<16x256xf32>
    %53 = arith.mulf %8, %52 : vector<16x256xf32>
    %54 = arith.addf %53, %11 : vector<16x256xf32>
    %55 = vector.extract_strided_slice %54 {offsets = [0, 0], sizes = [16, 64], strides = [1, 1]} : vector<16x256xf32> to vector<16x64xf32>
    %56 = vector.extract_strided_slice %54 {offsets = [0, 64], sizes = [16, 64], strides = [1, 1]} : vector<16x256xf32> to vector<16x64xf32>
    %57 = vector.extract_strided_slice %54 {offsets = [0, 128], sizes = [16, 64], strides = [1, 1]} : vector<16x256xf32> to vector<16x64xf32>
    %58 = vector.extract_strided_slice %54 {offsets = [0, 192], sizes = [16, 64], strides = [1, 1]} : vector<16x256xf32> to vector<16x64xf32>
    %59 = arith.mulf %56, %43 : vector<16x64xf32>
    %60 = arith.mulf %55, %57 : vector<16x64xf32>
    %61 = arith.addf %59, %60 : vector<16x64xf32>
    %62 = math.tanh %61 : vector<16x64xf32>
    %63 = arith.mulf %58, %62 : vector<16x64xf32>
    %64 = vector.extract_strided_slice %63 {offsets = [0, 0], sizes = [16, 32], strides = [1, 1]} : vector<16x64xf32> to vector<16x32xf32>
    %c0_19 = arith.constant 0 : index
    %c0_20 = arith.constant 0 : index
    %c0_21 = arith.constant 0 : index
    %65 = vector.load %arg11[%c0_19, %c0_20, %c0_21] : memref<8x16x64xf32, #tpu.memory_space<vmem>>, vector<1x16x32xf32>
    %66 = vector.shape_cast %65 : vector<1x16x32xf32> to vector<16x32xf32>
    %67 = vector.shape_cast %64 : vector<16x32xf32> to vector<1x16x32xf32>
    tpu.vector_store %arg11[%c0_19, %c0_20, %c0_21], %67 {strides = array<i32>} : memref<8x16x64xf32, #tpu.memory_space<vmem>>, vector<1x16x32xf32>,
    %68 = vector.extract_strided_slice %63 {offsets = [0, 32], sizes = [16, 32], strides = [1, 1]} : vector<16x64xf32> to vector<16x32xf32>
    %c7 = arith.constant 7 : index
    %c0_22 = arith.constant 0 : index
    %c32 = arith.constant 32 : index
    %69 = vector.load %arg11[%c7, %c0_22, %c32] : memref<8x16x64xf32, #tpu.memory_space<vmem>>, vector<1x16x32xf32>
    %70 = vector.shape_cast %69 : vector<1x16x32xf32> to vector<16x32xf32>
    %71 = vector.shape_cast %68 : vector<16x32xf32> to vector<1x16x32xf32>
    tpu.vector_store %arg11[%c7, %c0_22, %c32], %71 {strides = array<i32>} : memref<8x16x64xf32, #tpu.memory_space<vmem>>, vector<1x16x32xf32>,
    %72 = vector.extract_strided_slice %40 {offsets = [1, 0, 0], sizes = [1, 16, 256], strides = [1, 1, 1]} : vector<8x16x256xf32> to vector<1x16x256xf32>
    %73 = vector.shape_cast %72 : vector<1x16x256xf32> to vector<16x256xf32>
    %74 = vector.extract_strided_slice %40 {offsets = [6, 0, 0], sizes = [1, 16, 256], strides = [1, 1, 1]} : vector<8x16x256xf32> to vector<1x16x256xf32>
    %75 = vector.shape_cast %74 : vector<1x16x256xf32> to vector<16x256xf32>
    %76 = arith.select %29, %73, %75 : vector<16x256xi1>, vector<16x256xf32>
    %cst_23 = arith.constant dense<0.000000e+00> : vector<16x256xf32>
    %77 = tpu.matmul %63, %41, %cst_23 {dimension_numbers = #tpu.dot_dimension_numbers<[1], [0], [0], [1], [0, 0, 1, 1], [], []>} : vector<16x64xf32>, vector<64x256xf32>, vector<16x256xf32> -> vector<16x256xf32>
    %78 = arith.addf %76, %77 : vector<16x256xf32>
    %79 = arith.mulf %8, %78 : vector<16x256xf32>
    %80 = math.tanh %79 : vector<16x256xf32>
    %81 = arith.mulf %8, %80 : vector<16x256xf32>
    %82 = arith.addf %81, %11 : vector<16x256xf32>
    %83 = vector.extract_strided_slice %82 {offsets = [0, 0], sizes = [16, 64], strides = [1, 1]} : vector<16x256xf32> to vector<16x64xf32>
    %84 = vector.extract_strided_slice %82 {offsets = [0, 64], sizes = [16, 64], strides = [1, 1]} : vector<16x256xf32> to vector<16x64xf32>
    %85 = vector.extract_strided_slice %82 {offsets = [0, 128], sizes = [16, 64], strides = [1, 1]} : vector<16x256xf32> to vector<16x64xf32>
    %86 = vector.extract_strided_slice %82 {offsets = [0, 192], sizes = [16, 64], strides = [1, 1]} : vector<16x256xf32> to vector<16x64xf32>
    %87 = arith.mulf %84, %61 : vector<16x64xf32>
    %88 = arith.mulf %83, %85 : vector<16x64xf32>
    %89 = arith.addf %87, %88 : vector<16x64xf32>
    %90 = math.tanh %89 : vector<16x64xf32>
    %91 = arith.mulf %86, %90 : vector<16x64xf32>
    %92 = vector.extract_strided_slice %91 {offsets = [0, 0], sizes = [16, 32], strides = [1, 1]} : vector<16x64xf32> to vector<16x32xf32>
    %c1 = arith.constant 1 : index
    %c0_24 = arith.constant 0 : index
    %c0_25 = arith.constant 0 : index
    %93 = vector.load %arg11[%c1, %c0_24, %c0_25] : memref<8x16x64xf32, #tpu.memory_space<vmem>>, vector<1x16x32xf32>
    %94 = vector.shape_cast %93 : vector<1x16x32xf32> to vector<16x32xf32>
    %95 = vector.shape_cast %92 : vector<16x32xf32> to vector<1x16x32xf32>
    tpu.vector_store %arg11[%c1, %c0_24, %c0_25], %95 {strides = array<i32>} : memref<8x16x64xf32, #tpu.memory_space<vmem>>, vector<1x16x32xf32>,
    %96 = vector.extract_strided_slice %91 {offsets = [0, 32], sizes = [16, 32], strides = [1, 1]} : vector<16x64xf32> to vector<16x32xf32>
    %c6 = arith.constant 6 : index
    %c0_26 = arith.constant 0 : index
    %c32_27 = arith.constant 32 : index
    %97 = vector.load %arg11[%c6, %c0_26, %c32_27] : memref<8x16x64xf32, #tpu.memory_space<vmem>>, vector<1x16x32xf32>
    %98 = vector.shape_cast %97 : vector<1x16x32xf32> to vector<16x32xf32>
    %99 = vector.shape_cast %96 : vector<16x32xf32> to vector<1x16x32xf32>
    tpu.vector_store %arg11[%c6, %c0_26, %c32_27], %99 {strides = array<i32>} : memref<8x16x64xf32, #tpu.memory_space<vmem>>, vector<1x16x32xf32>,
    %100 = vector.extract_strided_slice %40 {offsets = [2, 0, 0], sizes = [1, 16, 256], strides = [1, 1, 1]} : vector<8x16x256xf32> to vector<1x16x256xf32>
    %101 = vector.shape_cast %100 : vector<1x16x256xf32> to vector<16x256xf32>
    %102 = vector.extract_strided_slice %40 {offsets = [5, 0, 0], sizes = [1, 16, 256], strides = [1, 1, 1]} : vector<8x16x256xf32> to vector<1x16x256xf32>
    %103 = vector.shape_cast %102 : vector<1x16x256xf32> to vector<16x256xf32>
    %104 = arith.select %29, %101, %103 : vector<16x256xi1>, vector<16x256xf32>
    %cst_28 = arith.constant dense<0.000000e+00> : vector<16x256xf32>
    %105 = tpu.matmul %91, %41, %cst_28 {dimension_numbers = #tpu.dot_dimension_numbers<[1], [0], [0], [1], [0, 0, 1, 1], [], []>} : vector<16x64xf32>, vector<64x256xf32>, vector<16x256xf32> -> vector<16x256xf32>
    %106 = arith.addf %104, %105 : vector<16x256xf32>
    %107 = arith.mulf %8, %106 : vector<16x256xf32>
    %108 = math.tanh %107 : vector<16x256xf32>
    %109 = arith.mulf %8, %108 : vector<16x256xf32>
    %110 = arith.addf %109, %11 : vector<16x256xf32>
    %111 = vector.extract_strided_slice %110 {offsets = [0, 0], sizes = [16, 64], strides = [1, 1]} : vector<16x256xf32> to vector<16x64xf32>
    %112 = vector.extract_strided_slice %110 {offsets = [0, 64], sizes = [16, 64], strides = [1, 1]} : vector<16x256xf32> to vector<16x64xf32>
    %113 = vector.extract_strided_slice %110 {offsets = [0, 128], sizes = [16, 64], strides = [1, 1]} : vector<16x256xf32> to vector<16x64xf32>
    %114 = vector.extract_strided_slice %110 {offsets = [0, 192], sizes = [16, 64], strides = [1, 1]} : vector<16x256xf32> to vector<16x64xf32>
    %115 = arith.mulf %112, %89 : vector<16x64xf32>
    %116 = arith.mulf %111, %113 : vector<16x64xf32>
    %117 = arith.addf %115, %116 : vector<16x64xf32>
    %118 = math.tanh %117 : vector<16x64xf32>
    %119 = arith.mulf %114, %118 : vector<16x64xf32>
    %120 = vector.extract_strided_slice %119 {offsets = [0, 0], sizes = [16, 32], strides = [1, 1]} : vector<16x64xf32> to vector<16x32xf32>
    %c2 = arith.constant 2 : index
    %c0_29 = arith.constant 0 : index
    %c0_30 = arith.constant 0 : index
    %121 = vector.load %arg11[%c2, %c0_29, %c0_30] : memref<8x16x64xf32, #tpu.memory_space<vmem>>, vector<1x16x32xf32>
    %122 = vector.shape_cast %121 : vector<1x16x32xf32> to vector<16x32xf32>
    %123 = vector.shape_cast %120 : vector<16x32xf32> to vector<1x16x32xf32>
    tpu.vector_store %arg11[%c2, %c0_29, %c0_30], %123 {strides = array<i32>} : memref<8x16x64xf32, #tpu.memory_space<vmem>>, vector<1x16x32xf32>,
    %124 = vector.extract_strided_slice %119 {offsets = [0, 32], sizes = [16, 32], strides = [1, 1]} : vector<16x64xf32> to vector<16x32xf32>
    %c5 = arith.constant 5 : index
    %c0_31 = arith.constant 0 : index
    %c32_32 = arith.constant 32 : index
    %125 = vector.load %arg11[%c5, %c0_31, %c32_32] : memref<8x16x64xf32, #tpu.memory_space<vmem>>, vector<1x16x32xf32>
    %126 = vector.shape_cast %125 : vector<1x16x32xf32> to vector<16x32xf32>
    %127 = vector.shape_cast %124 : vector<16x32xf32> to vector<1x16x32xf32>
    tpu.vector_store %arg11[%c5, %c0_31, %c32_32], %127 {strides = array<i32>} : memref<8x16x64xf32, #tpu.memory_space<vmem>>, vector<1x16x32xf32>,
    %128 = vector.extract_strided_slice %40 {offsets = [3, 0, 0], sizes = [1, 16, 256], strides = [1, 1, 1]} : vector<8x16x256xf32> to vector<1x16x256xf32>
    %129 = vector.shape_cast %128 : vector<1x16x256xf32> to vector<16x256xf32>
    %130 = vector.extract_strided_slice %40 {offsets = [4, 0, 0], sizes = [1, 16, 256], strides = [1, 1, 1]} : vector<8x16x256xf32> to vector<1x16x256xf32>
    %131 = vector.shape_cast %130 : vector<1x16x256xf32> to vector<16x256xf32>
    %132 = arith.select %29, %129, %131 : vector<16x256xi1>, vector<16x256xf32>
    %cst_33 = arith.constant dense<0.000000e+00> : vector<16x256xf32>
    %133 = tpu.matmul %119, %41, %cst_33 {dimension_numbers = #tpu.dot_dimension_numbers<[1], [0], [0], [1], [0, 0, 1, 1], [], []>} : vector<16x64xf32>, vector<64x256xf32>, vector<16x256xf32> -> vector<16x256xf32>
    %134 = arith.addf %132, %133 : vector<16x256xf32>
    %135 = arith.mulf %8, %134 : vector<16x256xf32>
    %136 = math.tanh %135 : vector<16x256xf32>
    %137 = arith.mulf %8, %136 : vector<16x256xf32>
    %138 = arith.addf %137, %11 : vector<16x256xf32>
    %139 = vector.extract_strided_slice %138 {offsets = [0, 0], sizes = [16, 64], strides = [1, 1]} : vector<16x256xf32> to vector<16x64xf32>
    %140 = vector.extract_strided_slice %138 {offsets = [0, 64], sizes = [16, 64], strides = [1, 1]} : vector<16x256xf32> to vector<16x64xf32>
    %141 = vector.extract_strided_slice %138 {offsets = [0, 128], sizes = [16, 64], strides = [1, 1]} : vector<16x256xf32> to vector<16x64xf32>
    %142 = vector.extract_strided_slice %138 {offsets = [0, 192], sizes = [16, 64], strides = [1, 1]} : vector<16x256xf32> to vector<16x64xf32>
    %143 = arith.mulf %140, %117 : vector<16x64xf32>
    %144 = arith.mulf %139, %141 : vector<16x64xf32>
    %145 = arith.addf %143, %144 : vector<16x64xf32>
    %146 = math.tanh %145 : vector<16x64xf32>
    %147 = arith.mulf %142, %146 : vector<16x64xf32>
    %148 = vector.extract_strided_slice %147 {offsets = [0, 0], sizes = [16, 32], strides = [1, 1]} : vector<16x64xf32> to vector<16x32xf32>
    %c3 = arith.constant 3 : index
    %c0_34 = arith.constant 0 : index
    %c0_35 = arith.constant 0 : index
    %149 = vector.load %arg11[%c3, %c0_34, %c0_35] : memref<8x16x64xf32, #tpu.memory_space<vmem>>, vector<1x16x32xf32>
    %150 = vector.shape_cast %149 : vector<1x16x32xf32> to vector<16x32xf32>
    %151 = vector.shape_cast %148 : vector<16x32xf32> to vector<1x16x32xf32>
    tpu.vector_store %arg11[%c3, %c0_34, %c0_35], %151 {strides = array<i32>} : memref<8x16x64xf32, #tpu.memory_space<vmem>>, vector<1x16x32xf32>,
    %152 = vector.extract_strided_slice %147 {offsets = [0, 32], sizes = [16, 32], strides = [1, 1]} : vector<16x64xf32> to vector<16x32xf32>
    %c4 = arith.constant 4 : index
    %c0_36 = arith.constant 0 : index
    %c32_37 = arith.constant 32 : index
    %153 = vector.load %arg11[%c4, %c0_36, %c32_37] : memref<8x16x64xf32, #tpu.memory_space<vmem>>, vector<1x16x32xf32>
    %154 = vector.shape_cast %153 : vector<1x16x32xf32> to vector<16x32xf32>
    %155 = vector.shape_cast %152 : vector<16x32xf32> to vector<1x16x32xf32>
    tpu.vector_store %arg11[%c4, %c0_36, %c32_37], %155 {strides = array<i32>} : memref<8x16x64xf32, #tpu.memory_space<vmem>>, vector<1x16x32xf32>,
    %156 = vector.extract_strided_slice %40 {offsets = [4, 0, 0], sizes = [1, 16, 256], strides = [1, 1, 1]} : vector<8x16x256xf32> to vector<1x16x256xf32>
    %157 = vector.shape_cast %156 : vector<1x16x256xf32> to vector<16x256xf32>
    %158 = vector.extract_strided_slice %40 {offsets = [3, 0, 0], sizes = [1, 16, 256], strides = [1, 1, 1]} : vector<8x16x256xf32> to vector<1x16x256xf32>
    %159 = vector.shape_cast %158 : vector<1x16x256xf32> to vector<16x256xf32>
    %160 = arith.select %29, %157, %159 : vector<16x256xi1>, vector<16x256xf32>
    %cst_38 = arith.constant dense<0.000000e+00> : vector<16x256xf32>
    %161 = tpu.matmul %147, %41, %cst_38 {dimension_numbers = #tpu.dot_dimension_numbers<[1], [0], [0], [1], [0, 0, 1, 1], [], []>} : vector<16x64xf32>, vector<64x256xf32>, vector<16x256xf32> -> vector<16x256xf32>
    %162 = arith.addf %160, %161 : vector<16x256xf32>
    %163 = arith.mulf %8, %162 : vector<16x256xf32>
    %164 = math.tanh %163 : vector<16x256xf32>
    %165 = arith.mulf %8, %164 : vector<16x256xf32>
    %166 = arith.addf %165, %11 : vector<16x256xf32>
    %167 = vector.extract_strided_slice %166 {offsets = [0, 0], sizes = [16, 64], strides = [1, 1]} : vector<16x256xf32> to vector<16x64xf32>
    %168 = vector.extract_strided_slice %166 {offsets = [0, 64], sizes = [16, 64], strides = [1, 1]} : vector<16x256xf32> to vector<16x64xf32>
    %169 = vector.extract_strided_slice %166 {offsets = [0, 128], sizes = [16, 64], strides = [1, 1]} : vector<16x256xf32> to vector<16x64xf32>
    %170 = vector.extract_strided_slice %166 {offsets = [0, 192], sizes = [16, 64], strides = [1, 1]} : vector<16x256xf32> to vector<16x64xf32>
    %171 = arith.mulf %168, %145 : vector<16x64xf32>
    %172 = arith.mulf %167, %169 : vector<16x64xf32>
    %173 = arith.addf %171, %172 : vector<16x64xf32>
    %174 = math.tanh %173 : vector<16x64xf32>
    %175 = arith.mulf %170, %174 : vector<16x64xf32>
    %176 = vector.extract_strided_slice %175 {offsets = [0, 0], sizes = [16, 32], strides = [1, 1]} : vector<16x64xf32> to vector<16x32xf32>
    %c4_39 = arith.constant 4 : index
    %c0_40 = arith.constant 0 : index
    %c0_41 = arith.constant 0 : index
    %177 = vector.load %arg11[%c4_39, %c0_40, %c0_41] : memref<8x16x64xf32, #tpu.memory_space<vmem>>, vector<1x16x32xf32>
    %178 = vector.shape_cast %177 : vector<1x16x32xf32> to vector<16x32xf32>
    %179 = vector.shape_cast %176 : vector<16x32xf32> to vector<1x16x32xf32>
    tpu.vector_store %arg11[%c4_39, %c0_40, %c0_41], %179 {strides = array<i32>} : memref<8x16x64xf32, #tpu.memory_space<vmem>>, vector<1x16x32xf32>,
    %180 = vector.extract_strided_slice %175 {offsets = [0, 32], sizes = [16, 32], strides = [1, 1]} : vector<16x64xf32> to vector<16x32xf32>
    %c3_42 = arith.constant 3 : index
    %c0_43 = arith.constant 0 : index
    %c32_44 = arith.constant 32 : index
    %181 = vector.load %arg11[%c3_42, %c0_43, %c32_44] : memref<8x16x64xf32, #tpu.memory_space<vmem>>, vector<1x16x32xf32>
    %182 = vector.shape_cast %181 : vector<1x16x32xf32> to vector<16x32xf32>
    %183 = vector.shape_cast %180 : vector<16x32xf32> to vector<1x16x32xf32>
    tpu.vector_store %arg11[%c3_42, %c0_43, %c32_44], %183 {strides = array<i32>} : memref<8x16x64xf32, #tpu.memory_space<vmem>>, vector<1x16x32xf32>,
    %184 = vector.extract_strided_slice %40 {offsets = [5, 0, 0], sizes = [1, 16, 256], strides = [1, 1, 1]} : vector<8x16x256xf32> to vector<1x16x256xf32>
    %185 = vector.shape_cast %184 : vector<1x16x256xf32> to vector<16x256xf32>
    %186 = vector.extract_strided_slice %40 {offsets = [2, 0, 0], sizes = [1, 16, 256], strides = [1, 1, 1]} : vector<8x16x256xf32> to vector<1x16x256xf32>
    %187 = vector.shape_cast %186 : vector<1x16x256xf32> to vector<16x256xf32>
    %188 = arith.select %29, %185, %187 : vector<16x256xi1>, vector<16x256xf32>
    %cst_45 = arith.constant dense<0.000000e+00> : vector<16x256xf32>
    %189 = tpu.matmul %175, %41, %cst_45 {dimension_numbers = #tpu.dot_dimension_numbers<[1], [0], [0], [1], [0, 0, 1, 1], [], []>} : vector<16x64xf32>, vector<64x256xf32>, vector<16x256xf32> -> vector<16x256xf32>
    %190 = arith.addf %188, %189 : vector<16x256xf32>
    %191 = arith.mulf %8, %190 : vector<16x256xf32>
    %192 = math.tanh %191 : vector<16x256xf32>
    %193 = arith.mulf %8, %192 : vector<16x256xf32>
    %194 = arith.addf %193, %11 : vector<16x256xf32>
    %195 = vector.extract_strided_slice %194 {offsets = [0, 0], sizes = [16, 64], strides = [1, 1]} : vector<16x256xf32> to vector<16x64xf32>
    %196 = vector.extract_strided_slice %194 {offsets = [0, 64], sizes = [16, 64], strides = [1, 1]} : vector<16x256xf32> to vector<16x64xf32>
    %197 = vector.extract_strided_slice %194 {offsets = [0, 128], sizes = [16, 64], strides = [1, 1]} : vector<16x256xf32> to vector<16x64xf32>
    %198 = vector.extract_strided_slice %194 {offsets = [0, 192], sizes = [16, 64], strides = [1, 1]} : vector<16x256xf32> to vector<16x64xf32>
    %199 = arith.mulf %196, %173 : vector<16x64xf32>
    %200 = arith.mulf %195, %197 : vector<16x64xf32>
    %201 = arith.addf %199, %200 : vector<16x64xf32>
    %202 = math.tanh %201 : vector<16x64xf32>
    %203 = arith.mulf %198, %202 : vector<16x64xf32>
    %204 = vector.extract_strided_slice %203 {offsets = [0, 0], sizes = [16, 32], strides = [1, 1]} : vector<16x64xf32> to vector<16x32xf32>
    %c5_46 = arith.constant 5 : index
    %c0_47 = arith.constant 0 : index
    %c0_48 = arith.constant 0 : index
    %205 = vector.load %arg11[%c5_46, %c0_47, %c0_48] : memref<8x16x64xf32, #tpu.memory_space<vmem>>, vector<1x16x32xf32>
    %206 = vector.shape_cast %205 : vector<1x16x32xf32> to vector<16x32xf32>
    %207 = vector.shape_cast %204 : vector<16x32xf32> to vector<1x16x32xf32>
    tpu.vector_store %arg11[%c5_46, %c0_47, %c0_48], %207 {strides = array<i32>} : memref<8x16x64xf32, #tpu.memory_space<vmem>>, vector<1x16x32xf32>,
    %208 = vector.extract_strided_slice %203 {offsets = [0, 32], sizes = [16, 32], strides = [1, 1]} : vector<16x64xf32> to vector<16x32xf32>
    %c2_49 = arith.constant 2 : index
    %c0_50 = arith.constant 0 : index
    %c32_51 = arith.constant 32 : index
    %209 = vector.load %arg11[%c2_49, %c0_50, %c32_51] : memref<8x16x64xf32, #tpu.memory_space<vmem>>, vector<1x16x32xf32>
    %210 = vector.shape_cast %209 : vector<1x16x32xf32> to vector<16x32xf32>
    %211 = vector.shape_cast %208 : vector<16x32xf32> to vector<1x16x32xf32>
    tpu.vector_store %arg11[%c2_49, %c0_50, %c32_51], %211 {strides = array<i32>} : memref<8x16x64xf32, #tpu.memory_space<vmem>>, vector<1x16x32xf32>,
    %212 = vector.extract_strided_slice %40 {offsets = [6, 0, 0], sizes = [1, 16, 256], strides = [1, 1, 1]} : vector<8x16x256xf32> to vector<1x16x256xf32>
    %213 = vector.shape_cast %212 : vector<1x16x256xf32> to vector<16x256xf32>
    %214 = vector.extract_strided_slice %40 {offsets = [1, 0, 0], sizes = [1, 16, 256], strides = [1, 1, 1]} : vector<8x16x256xf32> to vector<1x16x256xf32>
    %215 = vector.shape_cast %214 : vector<1x16x256xf32> to vector<16x256xf32>
    %216 = arith.select %29, %213, %215 : vector<16x256xi1>, vector<16x256xf32>
    %cst_52 = arith.constant dense<0.000000e+00> : vector<16x256xf32>
    %217 = tpu.matmul %203, %41, %cst_52 {dimension_numbers = #tpu.dot_dimension_numbers<[1], [0], [0], [1], [0, 0, 1, 1], [], []>} : vector<16x64xf32>, vector<64x256xf32>, vector<16x256xf32> -> vector<16x256xf32>
    %218 = arith.addf %216, %217 : vector<16x256xf32>
    %219 = arith.mulf %8, %218 : vector<16x256xf32>
    %220 = math.tanh %219 : vector<16x256xf32>
    %221 = arith.mulf %8, %220 : vector<16x256xf32>
    %222 = arith.addf %221, %11 : vector<16x256xf32>
    %223 = vector.extract_strided_slice %222 {offsets = [0, 0], sizes = [16, 64], strides = [1, 1]} : vector<16x256xf32> to vector<16x64xf32>
    %224 = vector.extract_strided_slice %222 {offsets = [0, 64], sizes = [16, 64], strides = [1, 1]} : vector<16x256xf32> to vector<16x64xf32>
    %225 = vector.extract_strided_slice %222 {offsets = [0, 128], sizes = [16, 64], strides = [1, 1]} : vector<16x256xf32> to vector<16x64xf32>
    %226 = vector.extract_strided_slice %222 {offsets = [0, 192], sizes = [16, 64], strides = [1, 1]} : vector<16x256xf32> to vector<16x64xf32>
    %227 = arith.mulf %224, %201 : vector<16x64xf32>
    %228 = arith.mulf %223, %225 : vector<16x64xf32>
    %229 = arith.addf %227, %228 : vector<16x64xf32>
    %230 = math.tanh %229 : vector<16x64xf32>
    %231 = arith.mulf %226, %230 : vector<16x64xf32>
    %232 = vector.extract_strided_slice %231 {offsets = [0, 0], sizes = [16, 32], strides = [1, 1]} : vector<16x64xf32> to vector<16x32xf32>
    %c6_53 = arith.constant 6 : index
    %c0_54 = arith.constant 0 : index
    %c0_55 = arith.constant 0 : index
    %233 = vector.load %arg11[%c6_53, %c0_54, %c0_55] : memref<8x16x64xf32, #tpu.memory_space<vmem>>, vector<1x16x32xf32>
    %234 = vector.shape_cast %233 : vector<1x16x32xf32> to vector<16x32xf32>
    %235 = vector.shape_cast %232 : vector<16x32xf32> to vector<1x16x32xf32>
    tpu.vector_store %arg11[%c6_53, %c0_54, %c0_55], %235 {strides = array<i32>} : memref<8x16x64xf32, #tpu.memory_space<vmem>>, vector<1x16x32xf32>,
    %236 = vector.extract_strided_slice %231 {offsets = [0, 32], sizes = [16, 32], strides = [1, 1]} : vector<16x64xf32> to vector<16x32xf32>
    %c1_56 = arith.constant 1 : index
    %c0_57 = arith.constant 0 : index
    %c32_58 = arith.constant 32 : index
    %237 = vector.load %arg11[%c1_56, %c0_57, %c32_58] : memref<8x16x64xf32, #tpu.memory_space<vmem>>, vector<1x16x32xf32>
    %238 = vector.shape_cast %237 : vector<1x16x32xf32> to vector<16x32xf32>
    %239 = vector.shape_cast %236 : vector<16x32xf32> to vector<1x16x32xf32>
    tpu.vector_store %arg11[%c1_56, %c0_57, %c32_58], %239 {strides = array<i32>} : memref<8x16x64xf32, #tpu.memory_space<vmem>>, vector<1x16x32xf32>,
    %240 = vector.extract_strided_slice %40 {offsets = [7, 0, 0], sizes = [1, 16, 256], strides = [1, 1, 1]} : vector<8x16x256xf32> to vector<1x16x256xf32>
    %241 = vector.shape_cast %240 : vector<1x16x256xf32> to vector<16x256xf32>
    %242 = vector.extract_strided_slice %40 {offsets = [0, 0, 0], sizes = [1, 16, 256], strides = [1, 1, 1]} : vector<8x16x256xf32> to vector<1x16x256xf32>
    %243 = vector.shape_cast %242 : vector<1x16x256xf32> to vector<16x256xf32>
    %244 = arith.select %29, %241, %243 : vector<16x256xi1>, vector<16x256xf32>
    %cst_59 = arith.constant dense<0.000000e+00> : vector<16x256xf32>
    %245 = tpu.matmul %231, %41, %cst_59 {dimension_numbers = #tpu.dot_dimension_numbers<[1], [0], [0], [1], [0, 0, 1, 1], [], []>} : vector<16x64xf32>, vector<64x256xf32>, vector<16x256xf32> -> vector<16x256xf32>
    %246 = arith.addf %244, %245 : vector<16x256xf32>
    %247 = arith.mulf %8, %246 : vector<16x256xf32>
    %248 = math.tanh %247 : vector<16x256xf32>
    %249 = arith.mulf %8, %248 : vector<16x256xf32>
    %250 = arith.addf %249, %11 : vector<16x256xf32>
    %251 = vector.extract_strided_slice %250 {offsets = [0, 0], sizes = [16, 64], strides = [1, 1]} : vector<16x256xf32> to vector<16x64xf32>
    %252 = vector.extract_strided_slice %250 {offsets = [0, 64], sizes = [16, 64], strides = [1, 1]} : vector<16x256xf32> to vector<16x64xf32>
    %253 = vector.extract_strided_slice %250 {offsets = [0, 128], sizes = [16, 64], strides = [1, 1]} : vector<16x256xf32> to vector<16x64xf32>
    %254 = vector.extract_strided_slice %250 {offsets = [0, 192], sizes = [16, 64], strides = [1, 1]} : vector<16x256xf32> to vector<16x64xf32>
    %255 = arith.mulf %252, %229 : vector<16x64xf32>
    %256 = arith.mulf %251, %253 : vector<16x64xf32>
    %257 = arith.addf %255, %256 : vector<16x64xf32>
    %258 = math.tanh %257 : vector<16x64xf32>
    %259 = arith.mulf %254, %258 : vector<16x64xf32>
    %260 = vector.extract_strided_slice %259 {offsets = [0, 0], sizes = [16, 32], strides = [1, 1]} : vector<16x64xf32> to vector<16x32xf32>
    %c7_60 = arith.constant 7 : index
    %c0_61 = arith.constant 0 : index
    %c0_62 = arith.constant 0 : index
    %261 = vector.load %arg11[%c7_60, %c0_61, %c0_62] : memref<8x16x64xf32, #tpu.memory_space<vmem>>, vector<1x16x32xf32>
    %262 = vector.shape_cast %261 : vector<1x16x32xf32> to vector<16x32xf32>
    %263 = vector.shape_cast %260 : vector<16x32xf32> to vector<1x16x32xf32>
    tpu.vector_store %arg11[%c7_60, %c0_61, %c0_62], %263 {strides = array<i32>} : memref<8x16x64xf32, #tpu.memory_space<vmem>>, vector<1x16x32xf32>,
    %264 = vector.extract_strided_slice %259 {offsets = [0, 32], sizes = [16, 32], strides = [1, 1]} : vector<16x64xf32> to vector<16x32xf32>
    %c0_63 = arith.constant 0 : index
    %c0_64 = arith.constant 0 : index
    %c32_65 = arith.constant 32 : index
    %265 = vector.load %arg11[%c0_63, %c0_64, %c32_65] : memref<8x16x64xf32, #tpu.memory_space<vmem>>, vector<1x16x32xf32>
    %266 = vector.shape_cast %265 : vector<1x16x32xf32> to vector<16x32xf32>
    %267 = vector.shape_cast %264 : vector<16x32xf32> to vector<1x16x32xf32>
    tpu.vector_store %arg11[%c0_63, %c0_64, %c32_65], %267 {strides = array<i32>} : memref<8x16x64xf32, #tpu.memory_space<vmem>>, vector<1x16x32xf32>,
    %c0_66 = arith.constant 0 : index
    %c0_67 = arith.constant 0 : index
    %c0_68 = arith.constant 0 : index
    %268 = vector.load %arg11[%c0_66, %c0_67, %c0_68] : memref<8x16x64xf32, #tpu.memory_space<vmem>>, vector<8x16x64xf32>
    %269 = vector.shape_cast %268 : vector<8x16x64xf32> to vector<128x64xf32>
    %c0_69 = arith.constant 0 : index
    %c0_70 = arith.constant 0 : index
    %270 = vector.load %arg5[%c0_69, %c0_70] : memref<64x256xf32, #tpu.memory_space<vmem>>, vector<64x256xf32>
    %cst_71 = arith.constant dense<0.000000e+00> : vector<128x256xf32>
    %271 = tpu.matmul %269, %270, %cst_71 {dimension_numbers = #tpu.dot_dimension_numbers<[1], [0], [0], [1], [0, 0, 1, 1], [], []>} : vector<128x64xf32>, vector<64x256xf32>, vector<128x256xf32> -> vector<128x256xf32>
    %c0_72 = arith.constant 0 : index
    %c0_73 = arith.constant 0 : index
    %272 = vector.load %arg6[%c0_72, %c0_73] : memref<1x256xf32, #tpu.memory_space<vmem>>, vector<1x256xf32>
    %273 = vector.broadcast %272 : vector<1x256xf32> to vector<128x256xf32>
    %274 = arith.addf %271, %273 : vector<128x256xf32>
    %275 = vector.shape_cast %274 : vector<128x256xf32> to vector<8x16x256xf32>
    %c0_74 = arith.constant 0 : index
    %c0_75 = arith.constant 0 : index
    %276 = vector.load %arg7[%c0_74, %c0_75] : memref<64x256xf32, #tpu.memory_space<vmem>>, vector<64x256xf32>
    %cst_76 = arith.constant 0.000000e+00 : f32
    %277 = vector.broadcast %cst_76 : f32 to vector<16x64xf32>
    %cst_77 = arith.constant 0.000000e+00 : f32
    %278 = vector.broadcast %cst_77 : f32 to vector<16x64xf32>
    %279 = vector.extract_strided_slice %275 {offsets = [0, 0, 0], sizes = [1, 16, 256], strides = [1, 1, 1]} : vector<8x16x256xf32> to vector<1x16x256xf32>
    %280 = vector.shape_cast %279 : vector<1x16x256xf32> to vector<16x256xf32>
    %281 = vector.extract_strided_slice %275 {offsets = [7, 0, 0], sizes = [1, 16, 256], strides = [1, 1, 1]} : vector<8x16x256xf32> to vector<1x16x256xf32>
    %282 = vector.shape_cast %281 : vector<1x16x256xf32> to vector<16x256xf32>
    %283 = arith.select %29, %280, %282 : vector<16x256xi1>, vector<16x256xf32>
    %cst_78 = arith.constant dense<0.000000e+00> : vector<16x256xf32>
    %284 = tpu.matmul %277, %276, %cst_78 {dimension_numbers = #tpu.dot_dimension_numbers<[1], [0], [0], [1], [0, 0, 1, 1], [], []>} : vector<16x64xf32>, vector<64x256xf32>, vector<16x256xf32> -> vector<16x256xf32>
    %285 = arith.addf %283, %284 : vector<16x256xf32>
    %286 = arith.mulf %8, %285 : vector<16x256xf32>
    %287 = math.tanh %286 : vector<16x256xf32>
    %288 = arith.mulf %8, %287 : vector<16x256xf32>
    %289 = arith.addf %288, %11 : vector<16x256xf32>
    %290 = vector.extract_strided_slice %289 {offsets = [0, 0], sizes = [16, 64], strides = [1, 1]} : vector<16x256xf32> to vector<16x64xf32>
    %291 = vector.extract_strided_slice %289 {offsets = [0, 64], sizes = [16, 64], strides = [1, 1]} : vector<16x256xf32> to vector<16x64xf32>
    %292 = vector.extract_strided_slice %289 {offsets = [0, 128], sizes = [16, 64], strides = [1, 1]} : vector<16x256xf32> to vector<16x64xf32>
    %293 = vector.extract_strided_slice %289 {offsets = [0, 192], sizes = [16, 64], strides = [1, 1]} : vector<16x256xf32> to vector<16x64xf32>
    %294 = arith.mulf %291, %278 : vector<16x64xf32>
    %295 = arith.mulf %290, %292 : vector<16x64xf32>
    %296 = arith.addf %294, %295 : vector<16x64xf32>
    %297 = math.tanh %296 : vector<16x64xf32>
    %298 = arith.mulf %293, %297 : vector<16x64xf32>
    %299 = vector.extract_strided_slice %275 {offsets = [1, 0, 0], sizes = [1, 16, 256], strides = [1, 1, 1]} : vector<8x16x256xf32> to vector<1x16x256xf32>
    %300 = vector.shape_cast %299 : vector<1x16x256xf32> to vector<16x256xf32>
    %301 = vector.extract_strided_slice %275 {offsets = [6, 0, 0], sizes = [1, 16, 256], strides = [1, 1, 1]} : vector<8x16x256xf32> to vector<1x16x256xf32>
    %302 = vector.shape_cast %301 : vector<1x16x256xf32> to vector<16x256xf32>
    %303 = arith.select %29, %300, %302 : vector<16x256xi1>, vector<16x256xf32>
    %cst_79 = arith.constant dense<0.000000e+00> : vector<16x256xf32>
    %304 = tpu.matmul %298, %276, %cst_79 {dimension_numbers = #tpu.dot_dimension_numbers<[1], [0], [0], [1], [0, 0, 1, 1], [], []>} : vector<16x64xf32>, vector<64x256xf32>, vector<16x256xf32> -> vector<16x256xf32>
    %305 = arith.addf %303, %304 : vector<16x256xf32>
    %306 = arith.mulf %8, %305 : vector<16x256xf32>
    %307 = math.tanh %306 : vector<16x256xf32>
    %308 = arith.mulf %8, %307 : vector<16x256xf32>
    %309 = arith.addf %308, %11 : vector<16x256xf32>
    %310 = vector.extract_strided_slice %309 {offsets = [0, 0], sizes = [16, 64], strides = [1, 1]} : vector<16x256xf32> to vector<16x64xf32>
    %311 = vector.extract_strided_slice %309 {offsets = [0, 64], sizes = [16, 64], strides = [1, 1]} : vector<16x256xf32> to vector<16x64xf32>
    %312 = vector.extract_strided_slice %309 {offsets = [0, 128], sizes = [16, 64], strides = [1, 1]} : vector<16x256xf32> to vector<16x64xf32>
    %313 = vector.extract_strided_slice %309 {offsets = [0, 192], sizes = [16, 64], strides = [1, 1]} : vector<16x256xf32> to vector<16x64xf32>
    %314 = arith.mulf %311, %296 : vector<16x64xf32>
    %315 = arith.mulf %310, %312 : vector<16x64xf32>
    %316 = arith.addf %314, %315 : vector<16x64xf32>
    %317 = math.tanh %316 : vector<16x64xf32>
    %318 = arith.mulf %313, %317 : vector<16x64xf32>
    %319 = vector.extract_strided_slice %275 {offsets = [2, 0, 0], sizes = [1, 16, 256], strides = [1, 1, 1]} : vector<8x16x256xf32> to vector<1x16x256xf32>
    %320 = vector.shape_cast %319 : vector<1x16x256xf32> to vector<16x256xf32>
    %321 = vector.extract_strided_slice %275 {offsets = [5, 0, 0], sizes = [1, 16, 256], strides = [1, 1, 1]} : vector<8x16x256xf32> to vector<1x16x256xf32>
    %322 = vector.shape_cast %321 : vector<1x16x256xf32> to vector<16x256xf32>
    %323 = arith.select %29, %320, %322 : vector<16x256xi1>, vector<16x256xf32>
    %cst_80 = arith.constant dense<0.000000e+00> : vector<16x256xf32>
    %324 = tpu.matmul %318, %276, %cst_80 {dimension_numbers = #tpu.dot_dimension_numbers<[1], [0], [0], [1], [0, 0, 1, 1], [], []>} : vector<16x64xf32>, vector<64x256xf32>, vector<16x256xf32> -> vector<16x256xf32>
    %325 = arith.addf %323, %324 : vector<16x256xf32>
    %326 = arith.mulf %8, %325 : vector<16x256xf32>
    %327 = math.tanh %326 : vector<16x256xf32>
    %328 = arith.mulf %8, %327 : vector<16x256xf32>
    %329 = arith.addf %328, %11 : vector<16x256xf32>
    %330 = vector.extract_strided_slice %329 {offsets = [0, 0], sizes = [16, 64], strides = [1, 1]} : vector<16x256xf32> to vector<16x64xf32>
    %331 = vector.extract_strided_slice %329 {offsets = [0, 64], sizes = [16, 64], strides = [1, 1]} : vector<16x256xf32> to vector<16x64xf32>
    %332 = vector.extract_strided_slice %329 {offsets = [0, 128], sizes = [16, 64], strides = [1, 1]} : vector<16x256xf32> to vector<16x64xf32>
    %333 = vector.extract_strided_slice %329 {offsets = [0, 192], sizes = [16, 64], strides = [1, 1]} : vector<16x256xf32> to vector<16x64xf32>
    %334 = arith.mulf %331, %316 : vector<16x64xf32>
    %335 = arith.mulf %330, %332 : vector<16x64xf32>
    %336 = arith.addf %334, %335 : vector<16x64xf32>
    %337 = math.tanh %336 : vector<16x64xf32>
    %338 = arith.mulf %333, %337 : vector<16x64xf32>
    %339 = vector.extract_strided_slice %275 {offsets = [3, 0, 0], sizes = [1, 16, 256], strides = [1, 1, 1]} : vector<8x16x256xf32> to vector<1x16x256xf32>
    %340 = vector.shape_cast %339 : vector<1x16x256xf32> to vector<16x256xf32>
    %341 = vector.extract_strided_slice %275 {offsets = [4, 0, 0], sizes = [1, 16, 256], strides = [1, 1, 1]} : vector<8x16x256xf32> to vector<1x16x256xf32>
    %342 = vector.shape_cast %341 : vector<1x16x256xf32> to vector<16x256xf32>
    %343 = arith.select %29, %340, %342 : vector<16x256xi1>, vector<16x256xf32>
    %cst_81 = arith.constant dense<0.000000e+00> : vector<16x256xf32>
    %344 = tpu.matmul %338, %276, %cst_81 {dimension_numbers = #tpu.dot_dimension_numbers<[1], [0], [0], [1], [0, 0, 1, 1], [], []>} : vector<16x64xf32>, vector<64x256xf32>, vector<16x256xf32> -> vector<16x256xf32>
    %345 = arith.addf %343, %344 : vector<16x256xf32>
    %346 = arith.mulf %8, %345 : vector<16x256xf32>
    %347 = math.tanh %346 : vector<16x256xf32>
    %348 = arith.mulf %8, %347 : vector<16x256xf32>
    %349 = arith.addf %348, %11 : vector<16x256xf32>
    %350 = vector.extract_strided_slice %349 {offsets = [0, 0], sizes = [16, 64], strides = [1, 1]} : vector<16x256xf32> to vector<16x64xf32>
    %351 = vector.extract_strided_slice %349 {offsets = [0, 64], sizes = [16, 64], strides = [1, 1]} : vector<16x256xf32> to vector<16x64xf32>
    %352 = vector.extract_strided_slice %349 {offsets = [0, 128], sizes = [16, 64], strides = [1, 1]} : vector<16x256xf32> to vector<16x64xf32>
    %353 = vector.extract_strided_slice %349 {offsets = [0, 192], sizes = [16, 64], strides = [1, 1]} : vector<16x256xf32> to vector<16x64xf32>
    %354 = arith.mulf %351, %336 : vector<16x64xf32>
    %355 = arith.mulf %350, %352 : vector<16x64xf32>
    %356 = arith.addf %354, %355 : vector<16x64xf32>
    %357 = math.tanh %356 : vector<16x64xf32>
    %358 = arith.mulf %353, %357 : vector<16x64xf32>
    %359 = vector.extract_strided_slice %275 {offsets = [4, 0, 0], sizes = [1, 16, 256], strides = [1, 1, 1]} : vector<8x16x256xf32> to vector<1x16x256xf32>
    %360 = vector.shape_cast %359 : vector<1x16x256xf32> to vector<16x256xf32>
    %361 = vector.extract_strided_slice %275 {offsets = [3, 0, 0], sizes = [1, 16, 256], strides = [1, 1, 1]} : vector<8x16x256xf32> to vector<1x16x256xf32>
    %362 = vector.shape_cast %361 : vector<1x16x256xf32> to vector<16x256xf32>
    %363 = arith.select %29, %360, %362 : vector<16x256xi1>, vector<16x256xf32>
    %cst_82 = arith.constant dense<0.000000e+00> : vector<16x256xf32>
    %364 = tpu.matmul %358, %276, %cst_82 {dimension_numbers = #tpu.dot_dimension_numbers<[1], [0], [0], [1], [0, 0, 1, 1], [], []>} : vector<16x64xf32>, vector<64x256xf32>, vector<16x256xf32> -> vector<16x256xf32>
    %365 = arith.addf %363, %364 : vector<16x256xf32>
    %366 = arith.mulf %8, %365 : vector<16x256xf32>
    %367 = math.tanh %366 : vector<16x256xf32>
    %368 = arith.mulf %8, %367 : vector<16x256xf32>
    %369 = arith.addf %368, %11 : vector<16x256xf32>
    %370 = vector.extract_strided_slice %369 {offsets = [0, 0], sizes = [16, 64], strides = [1, 1]} : vector<16x256xf32> to vector<16x64xf32>
    %371 = vector.extract_strided_slice %369 {offsets = [0, 64], sizes = [16, 64], strides = [1, 1]} : vector<16x256xf32> to vector<16x64xf32>
    %372 = vector.extract_strided_slice %369 {offsets = [0, 128], sizes = [16, 64], strides = [1, 1]} : vector<16x256xf32> to vector<16x64xf32>
    %373 = vector.extract_strided_slice %369 {offsets = [0, 192], sizes = [16, 64], strides = [1, 1]} : vector<16x256xf32> to vector<16x64xf32>
    %374 = arith.mulf %371, %356 : vector<16x64xf32>
    %375 = arith.mulf %370, %372 : vector<16x64xf32>
    %376 = arith.addf %374, %375 : vector<16x64xf32>
    %377 = math.tanh %376 : vector<16x64xf32>
    %378 = arith.mulf %373, %377 : vector<16x64xf32>
    %379 = vector.extract_strided_slice %275 {offsets = [5, 0, 0], sizes = [1, 16, 256], strides = [1, 1, 1]} : vector<8x16x256xf32> to vector<1x16x256xf32>
    %380 = vector.shape_cast %379 : vector<1x16x256xf32> to vector<16x256xf32>
    %381 = vector.extract_strided_slice %275 {offsets = [2, 0, 0], sizes = [1, 16, 256], strides = [1, 1, 1]} : vector<8x16x256xf32> to vector<1x16x256xf32>
    %382 = vector.shape_cast %381 : vector<1x16x256xf32> to vector<16x256xf32>
    %383 = arith.select %29, %380, %382 : vector<16x256xi1>, vector<16x256xf32>
    %cst_83 = arith.constant dense<0.000000e+00> : vector<16x256xf32>
    %384 = tpu.matmul %378, %276, %cst_83 {dimension_numbers = #tpu.dot_dimension_numbers<[1], [0], [0], [1], [0, 0, 1, 1], [], []>} : vector<16x64xf32>, vector<64x256xf32>, vector<16x256xf32> -> vector<16x256xf32>
    %385 = arith.addf %383, %384 : vector<16x256xf32>
    %386 = arith.mulf %8, %385 : vector<16x256xf32>
    %387 = math.tanh %386 : vector<16x256xf32>
    %388 = arith.mulf %8, %387 : vector<16x256xf32>
    %389 = arith.addf %388, %11 : vector<16x256xf32>
    %390 = vector.extract_strided_slice %389 {offsets = [0, 0], sizes = [16, 64], strides = [1, 1]} : vector<16x256xf32> to vector<16x64xf32>
    %391 = vector.extract_strided_slice %389 {offsets = [0, 64], sizes = [16, 64], strides = [1, 1]} : vector<16x256xf32> to vector<16x64xf32>
    %392 = vector.extract_strided_slice %389 {offsets = [0, 128], sizes = [16, 64], strides = [1, 1]} : vector<16x256xf32> to vector<16x64xf32>
    %393 = vector.extract_strided_slice %389 {offsets = [0, 192], sizes = [16, 64], strides = [1, 1]} : vector<16x256xf32> to vector<16x64xf32>
    %394 = arith.mulf %391, %376 : vector<16x64xf32>
    %395 = arith.mulf %390, %392 : vector<16x64xf32>
    %396 = arith.addf %394, %395 : vector<16x64xf32>
    %397 = math.tanh %396 : vector<16x64xf32>
    %398 = arith.mulf %393, %397 : vector<16x64xf32>
    %399 = vector.extract_strided_slice %275 {offsets = [6, 0, 0], sizes = [1, 16, 256], strides = [1, 1, 1]} : vector<8x16x256xf32> to vector<1x16x256xf32>
    %400 = vector.shape_cast %399 : vector<1x16x256xf32> to vector<16x256xf32>
    %401 = vector.extract_strided_slice %275 {offsets = [1, 0, 0], sizes = [1, 16, 256], strides = [1, 1, 1]} : vector<8x16x256xf32> to vector<1x16x256xf32>
    %402 = vector.shape_cast %401 : vector<1x16x256xf32> to vector<16x256xf32>
    %403 = arith.select %29, %400, %402 : vector<16x256xi1>, vector<16x256xf32>
    %cst_84 = arith.constant dense<0.000000e+00> : vector<16x256xf32>
    %404 = tpu.matmul %398, %276, %cst_84 {dimension_numbers = #tpu.dot_dimension_numbers<[1], [0], [0], [1], [0, 0, 1, 1], [], []>} : vector<16x64xf32>, vector<64x256xf32>, vector<16x256xf32> -> vector<16x256xf32>
    %405 = arith.addf %403, %404 : vector<16x256xf32>
    %406 = arith.mulf %8, %405 : vector<16x256xf32>
    %407 = math.tanh %406 : vector<16x256xf32>
    %408 = arith.mulf %8, %407 : vector<16x256xf32>
    %409 = arith.addf %408, %11 : vector<16x256xf32>
    %410 = vector.extract_strided_slice %409 {offsets = [0, 0], sizes = [16, 64], strides = [1, 1]} : vector<16x256xf32> to vector<16x64xf32>
    %411 = vector.extract_strided_slice %409 {offsets = [0, 64], sizes = [16, 64], strides = [1, 1]} : vector<16x256xf32> to vector<16x64xf32>
    %412 = vector.extract_strided_slice %409 {offsets = [0, 128], sizes = [16, 64], strides = [1, 1]} : vector<16x256xf32> to vector<16x64xf32>
    %413 = vector.extract_strided_slice %409 {offsets = [0, 192], sizes = [16, 64], strides = [1, 1]} : vector<16x256xf32> to vector<16x64xf32>
    %414 = arith.mulf %411, %396 : vector<16x64xf32>
    %415 = arith.mulf %410, %412 : vector<16x64xf32>
    %416 = arith.addf %414, %415 : vector<16x64xf32>
    %417 = math.tanh %416 : vector<16x64xf32>
    %418 = arith.mulf %413, %417 : vector<16x64xf32>
    %419 = vector.extract_strided_slice %275 {offsets = [7, 0, 0], sizes = [1, 16, 256], strides = [1, 1, 1]} : vector<8x16x256xf32> to vector<1x16x256xf32>
    %420 = vector.shape_cast %419 : vector<1x16x256xf32> to vector<16x256xf32>
    %421 = vector.extract_strided_slice %275 {offsets = [0, 0, 0], sizes = [1, 16, 256], strides = [1, 1, 1]} : vector<8x16x256xf32> to vector<1x16x256xf32>
    %422 = vector.shape_cast %421 : vector<1x16x256xf32> to vector<16x256xf32>
    %423 = arith.select %29, %420, %422 : vector<16x256xi1>, vector<16x256xf32>
    %cst_85 = arith.constant dense<0.000000e+00> : vector<16x256xf32>
    %424 = tpu.matmul %418, %276, %cst_85 {dimension_numbers = #tpu.dot_dimension_numbers<[1], [0], [0], [1], [0, 0, 1, 1], [], []>} : vector<16x64xf32>, vector<64x256xf32>, vector<16x256xf32> -> vector<16x256xf32>
    %425 = arith.addf %423, %424 : vector<16x256xf32>
    %426 = arith.mulf %8, %425 : vector<16x256xf32>
    %427 = math.tanh %426 : vector<16x256xf32>
    %428 = arith.mulf %8, %427 : vector<16x256xf32>
    %429 = arith.addf %428, %11 : vector<16x256xf32>
    %430 = vector.extract_strided_slice %429 {offsets = [0, 0], sizes = [16, 64], strides = [1, 1]} : vector<16x256xf32> to vector<16x64xf32>
    %431 = vector.extract_strided_slice %429 {offsets = [0, 64], sizes = [16, 64], strides = [1, 1]} : vector<16x256xf32> to vector<16x64xf32>
    %432 = vector.extract_strided_slice %429 {offsets = [0, 128], sizes = [16, 64], strides = [1, 1]} : vector<16x256xf32> to vector<16x64xf32>
    %433 = vector.extract_strided_slice %429 {offsets = [0, 192], sizes = [16, 64], strides = [1, 1]} : vector<16x256xf32> to vector<16x64xf32>
    %434 = arith.mulf %431, %416 : vector<16x64xf32>
    %435 = arith.mulf %430, %432 : vector<16x64xf32>
    %436 = arith.addf %434, %435 : vector<16x64xf32>
    %437 = math.tanh %436 : vector<16x64xf32>
    %438 = arith.mulf %433, %437 : vector<16x64xf32>
    %439 = arith.select %32, %438, %298 : vector<16x64xi1>, vector<16x64xf32>
    %c0_86 = arith.constant 0 : index
    %c0_87 = arith.constant 0 : index
    %440 = vector.load %arg8[%c0_86, %c0_87] : memref<64x8xf32, #tpu.memory_space<vmem>>, vector<64x8xf32>
    %cst_88 = arith.constant dense<0.000000e+00> : vector<16x8xf32>
    %441 = tpu.matmul %439, %440, %cst_88 {dimension_numbers = #tpu.dot_dimension_numbers<[1], [0], [0], [1], [0, 0, 1, 1], [], []>} : vector<16x64xf32>, vector<64x8xf32>, vector<16x8xf32> -> vector<16x8xf32>
    %c0_89 = arith.constant 0 : index
    %c0_90 = arith.constant 0 : index
    %442 = vector.load %arg9[%c0_89, %c0_90] : memref<1x8xf32, #tpu.memory_space<vmem>>, vector<1x8xf32>
    %443 = vector.broadcast %442 : vector<1x8xf32> to vector<16x8xf32>
    %444 = arith.addf %441, %443 : vector<16x8xf32>
    %c0_91 = arith.constant 0 : index
    %c0_92 = arith.constant 0 : index
    %445 = vector.load %arg10[%c0_91, %c0_92] : memref<16x8xf32, #tpu.memory_space<vmem>>, vector<16x8xf32>
    tpu.vector_store %arg10[%c0_91, %c0_92], %444 {strides = array<i32>} : memref<16x8xf32, #tpu.memory_space<vmem>>, vector<16x8xf32>,
    return
  }
  func.func @transform_0(%arg0: i32) -> (i32, i32, i32) {
    %c0_i32 = arith.constant 0 : i32
    %c0_i32_0 = arith.constant 0 : i32
    %c0_i32_1 = arith.constant 0 : i32
    return %c0_i32, %arg0, %c0_i32_0 : i32, i32, i32
  }
  func.func @transform_1(%arg0: i32) -> (i32, i32) {
    %c0_i32 = arith.constant 0 : i32
    %c0_i32_0 = arith.constant 0 : i32
    %c0_i32_1 = arith.constant 0 : i32
    return %c0_i32, %c0_i32_0 : i32, i32
  }
  func.func @transform_2(%arg0: i32) -> (i32, i32) {
    %c0_i32 = arith.constant 0 : i32
    %c0_i32_0 = arith.constant 0 : i32
    %c0_i32_1 = arith.constant 0 : i32
    return %c0_i32, %c0_i32_0 : i32, i32
  }
  func.func @transform_3(%arg0: i32) -> (i32, i32) {
    %c0_i32 = arith.constant 0 : i32
    %c0_i32_0 = arith.constant 0 : i32
    %c0_i32_1 = arith.constant 0 : i32
    return %c0_i32, %c0_i32_0 : i32, i32
  }
  func.func @transform_4(%arg0: i32) -> (i32, i32) {
    %c0_i32 = arith.constant 0 : i32
    %c0_i32_0 = arith.constant 0 : i32
    %c0_i32_1 = arith.constant 0 : i32
    return %c0_i32, %c0_i32_0 : i32, i32
  }
  func.func @transform_5(%arg0: i32) -> (i32, i32) {
    %c0_i32 = arith.constant 0 : i32
    %c0_i32_0 = arith.constant 0 : i32
    %c0_i32_1 = arith.constant 0 : i32
    return %c0_i32, %c0_i32_0 : i32, i32
  }
  func.func @transform_6(%arg0: i32) -> (i32, i32) {
    %c0_i32 = arith.constant 0 : i32
    %c0_i32_0 = arith.constant 0 : i32
    %c0_i32_1 = arith.constant 0 : i32
    return %c0_i32, %c0_i32_0 : i32, i32
  }
  func.func @transform_7(%arg0: i32) -> (i32, i32) {
    %c0_i32 = arith.constant 0 : i32
    %c0_i32_0 = arith.constant 0 : i32
    %c0_i32_1 = arith.constant 0 : i32
    return %c0_i32, %c0_i32_0 : i32, i32
  }
  func.func @transform_8(%arg0: i32) -> (i32, i32) {
    %c0_i32 = arith.constant 0 : i32
    %c0_i32_0 = arith.constant 0 : i32
    %c0_i32_1 = arith.constant 0 : i32
    return %c0_i32, %c0_i32_0 : i32, i32
  }
  func.func @transform_9(%arg0: i32) -> (i32, i32) {
    %c0_i32 = arith.constant 0 : i32
    %c0_i32_0 = arith.constant 0 : i32
    return %arg0, %c0_i32 : i32, i32
  }
}

</mosaic_0001>

<bundles_post_ra>
// kernel: bilstm_forward.1
= control target key start
LH: loop header
LB: loop body
LE: loop exit
PB: predicated region body
PF: predicated region fallthrough
CT: control target
= control target key end

     0   :  { %14 = vsyncpa [#allocation4], 0  ;;  %s4305_s0 = inlined_call_operand.hbm [shape: f32[8,16,16], index: 0, kind: input, shape index: {}]   ;;  %s4306_s1 = inlined_call_operand.vmem [shape: f32[16,256], index: 1, kind: input, shape index: {}]   ;;  %s4307_s2 = inlined_call_operand.vmem [shape: f32[1,256], index: 2, kind: input, shape index: {}]   ;;  %s4308_s3 = inlined_call_operand.hbm [shape: f32[64,256], index: 3, kind: input, shape index: {}]   ;;  %s4309_s4 = inlined_call_operand.hbm [shape: f32[64,256], index: 4, kind: input, shape index: {}]   ;;  %s4310_s5 = inlined_call_operand.vmem [shape: f32[1,256], index: 5, kind: input, shape index: {}]   ;;  %s4311_s6 = inlined_call_operand.hbm [shape: f32[64,256], index: 6, kind: input, shape index: {}]   ;;  %s4312_s7 = inlined_call_operand.vmem [shape: f32[64,8], index: 7, kind: input, shape index: {}]   ;;  %s4313_s8 = inlined_call_operand.vmem [shape: f32[1,8], index: 8, kind: input, shape index: {}]   ;;  %s4314_s9 = inlined_call_operand.vmem [shape: f32[16,8], index: 9, kind: output, shape index: {}]  }
   0x1   :  { %15 = vsyncpa [#allocation6], 0  ;;  %s38_s11 = sshll.u32 %s4308_s3, 4  ;;  %s39_s11 = int_to_ptr.hbm [resolvable:$true] %s38_s11 }
   0x2   :  { %16 = vsyncpa [#allocation9], 0  ;;  %s2721_s12 = smov [#allocation5]   ;;  %s21_s16 = sshll.u32 %s4305_s0, 4  ;;  %s22_s16 = int_to_ptr.hbm [resolvable:$true] %s21_s16 }
   0x3   :  { %s40_s13 = sshll.u32 %s2721_s12, 4  ;;  %s2722_s17 = smov 256   ;;  %s41_s13 = int_to_ptr.vmem [resolvable:$true] %s40_s13 }
   0x4   :  { %s2723_s18 = smov 16   ;;  %s2724_s19 = smov [#allocation3]  }
   0x5   :  { %46 = dma.hbm_to_vmem [thread:$0]  %s39_s11, 2048, %s41_s13, [#allocation6], %s2722_s17, %s2722_s17, %s2723_s18  }
   0x6   :  { %s23_s20 = sshll.u32 %s2724_s19, 4  ;;  %s2725_s21 = smov 128   ;;  %s24_s20 = int_to_ptr.vmem [resolvable:$true] %s23_s20 }
   0x7   :  { %s2726_s22 = smov 8   ;;  %s51_s24 = sshll.u32 %s4309_s4, 4  ;;  %s52_s24 = int_to_ptr.hbm [resolvable:$true] %s51_s24 }
   0x8   :  { %29 = dma.hbm_to_vmem [thread:$0]  %s22_s16, 2048, %s24_s20, [#allocation4], %s2725_s21, %s2725_s21, %s2726_s22  }
   0x9   :  { %s2727_s25 = smov [#allocation7]   ;;  %s66_s28 = sshll.u32 %s4311_s6, 4  ;;  %s67_s28 = int_to_ptr.hbm [resolvable:$true] %s66_s28 }
   0xa   :  { %s53_s26 = sshll.u32 %s2727_s25, 4  ;;  %s2728_s29 = smov [#allocation8]   ;;  %s54_s26 = int_to_ptr.vmem [resolvable:$true] %s53_s26 }
   0xb   :  { %59 = dma.hbm_to_vmem [thread:$0]  %s52_s24, 2048, %s54_s26, [#allocation6], %s2722_s17, %s2722_s17, %s2723_s18  }
   0xc   :  { %s68_s30 = sshll.u32 %s2728_s29, 4  ;;  %s69_s30 = int_to_ptr.vmem [resolvable:$true] %s68_s30 }
   0xd   :  { %74 = dma.hbm_to_vmem [thread:$0]  %s67_s28, 2048, %s69_s30, [#allocation9], %s2722_s17, %s2722_s17, %s2723_s18  }
   0xe   :  { %2715 = dma.done.wait [#allocation4], 2048  }
   0xf   :  { %2716 = vsyncadd [#allocation4], 4294965248 }
  0x10   :  { %2717 = dma.done.wait [#allocation6], 4096  }
  0x11   :  { %2718 = vsyncadd [#allocation6], 4294963200 }
  0x12   :  { %2719 = dma.done.wait [#allocation9], 2048  }
  0x13   :  { %2720 = vsyncadd [#allocation9], 4294965248  ;;  %v153_v0 = vld [vmem:[%s4306_s1 + $0x10] sm:$0xff]  ;;  %v154_v1 = vld [vmem:[%s4306_s1 + $0x18] sm:$0xff]  ;;  %vm161_vm0 = vcmask 130048   ;;  %v4315_v31 = vmov 0.0   ;;  %v95_v51 = vlaneseq }
  0x14   :  { %v151_v2 = vld [vmem:[%s4306_s1] sm:$0xff]  ;;  %224 = vmatpush.msra.mxu0 %v153_v0  ;;  %289 = vmatpush.msra.mxu1 %v154_v1  ;;  %v152_v3 = vld [vmem:[%s4306_s1 + $0x8] sm:$0xff]  ;;  %v137_v6 = vld [vmem:[#allocation3 + $0x10] sm:$0xff]  ;;  %vm456_vm4 = vcmask 261120   ;;  %vm360_vm5 = vcmask 523264   ;;  %vm460_vm6 = vcmask 523520  }
  0x15   :  { %v135_v4 = vld [vmem:[#allocation3] sm:$0xff]  ;;  %v136_v5 = vld [vmem:[#allocation3 + $0x8] sm:$0xff]  ;;  %v138_v7 = vld [vmem:[#allocation3 + $0x18] sm:$0xff]  ;;  %v2930_v52 = vand.u32 127, %v95_v51  ;;  %vm2256_vm8 = vcmask 64512  }
  0x16   :  { %225 = vmatpush.msra.mxu0 %v151_v2  ;;  %290 = vmatpush.msra.mxu1 %v152_v3  ;;  %v139_v8 = vld [vmem:[#allocation3 + $0x20] sm:$0xff]  ;;  %v140_v9 = vld [vmem:[#allocation3 + $0x28] sm:$0xff]  ;;  %v141_v10 = vld [vmem:[#allocation3 + $0x30] sm:$0xff] }
  0x17   :  { %2266 = vmatmul.msk.f32.vlgmr.msra.gmra.mxu0 %vm161_vm0, %v135_v4  ;;  %2282 = vmatmul.msk.f32.vlgmr.msra.gmra.mxu1 %vm161_vm0, %v135_v4  ;;  %v142_v11 = vld [vmem:[#allocation3 + $0x38] sm:$0xff]  ;;  %v2822_v12 = vld [vmem:[#allocation5 + $0x70] sm:$0xff]  ;;  %v143_v14 = vld [vmem:[#allocation3 + $0x40] sm:$0xff]  ;;  %4339 = vst [vmem:[#allocation13_spill] sm:$0xff] %v2930_v52  ;;  %v2933_v55 = vadd.s32 128, %v2930_v52  ;;  %v112_v57 = vand.u32 63, %v2930_v52 }
  0x18   :  { %v2824_v13 = vld [vmem:[#allocation5 + $0x78] sm:$0xff]  ;;  %372 = vmatpush.msra.mxu2 %v2822_v12  ;;  %v2828_v15 = vld [vmem:[#allocation5 + $0x60] sm:$0xff]  ;;  %v2830_v16 = vld [vmem:[#allocation5 + $0x68] sm:$0xff] }
  0x19   :  { %395 = vmatpush.msra.mxu3 %v2824_v13  ;;  %v2834_v17 = vld [vmem:[#allocation5 + $0x50] sm:$0xff]  ;;  %v2836_v18 = vld [vmem:[#allocation5 + $0x58] sm:$0xff]  ;;  %v2840_v19 = vld [vmem:[#allocation5 + $0x40] sm:$0xff]  ;;  %v119_v58 = vand.u32 63, %v2933_v55  ;;  %vm2944_vm1 = vcmp.lt.s32.totalorder %v112_v57, 32  ;;  %vm101_vm3 = vcmp.lt.s32.totalorder %v2933_v55, 192 }
  0x1a   :  { %373 = vmatpush.msra.mxu2 %v2828_v15  ;;  %v2842_v20 = vld [vmem:[#allocation5 + $0x48] sm:$0xff]  ;;  %v2846_v21 = vld [vmem:[#allocation5 + $0x30] sm:$0xff]  ;;  %v2848_v22 = vld [vmem:[#allocation5 + $0x38] sm:$0xff] }
  0x1b   :  { %396 = vmatpush.msra.mxu3 %v2830_v16  ;;  %v144_v23 = vld [vmem:[#allocation3 + $0x48] sm:$0xff]  ;;  %v2854_v24 = vld [vmem:[#allocation5 + $0x20] sm:$0xff]  ;;  %v2860_v26 = vld [vmem:[#allocation5 + $0x10] sm:$0xff]  ;;  %vm2948_vm2 = vcmp.lt.s32.totalorder %v119_v58, 32 }
  0x1c   :  { %374 = vmatpush.msra.mxu2 %v2834_v17  ;;  %v2856_v25 = vld [vmem:[#allocation5 + $0x28] sm:$0xff]  ;;  %v2862_v27 = vld [vmem:[#allocation5 + $0x18] sm:$0xff]  ;;  %v2866_v28 = vld [vmem:[#allocation5] sm:$0xff] }
  0x1d   :  { %397 = vmatpush.msra.mxu3 %v2836_v18  ;;  %v2868_v29 = vld [vmem:[#allocation5 + $0x8] sm:$0xff]  ;;  %v145_v30 = vld [vmem:[#allocation3 + $0x50] sm:$0xff]  ;;  %v146_v32 = vld [vmem:[#allocation3 + $0x58] sm:$0xff] }
  0x1e   :  { %375 = vmatpush.msra.mxu2 %v2840_v19  ;;  %v147_v33 = vld [vmem:[#allocation3 + $0x60] sm:$0xff]  ;;  %v148_v34 = vld [vmem:[#allocation3 + $0x68] sm:$0xff]  ;;  %v149_v35 = vld [vmem:[#allocation3 + $0x70] sm:$0xff] }
  0x1f   :  { %2267 = vmatmul.msk.f32.gmra.mxu0 %vm161_vm0, %v136_v5  ;;  %2283 = vmatmul.msk.f32.gmra.mxu1 %vm161_vm0, %v136_v5  ;;  %v150_v36 = vld [vmem:[#allocation3 + $0x78] sm:$0xff]  ;;  %v155_v56 = vld [vmem:[%s4307_s2] sm:$0x3]  ;;  %s2731_s2 = smov 64  }
  0x20   :  { %398 = vmatpush.msra.mxu3 %v2842_v20  ;;  %376 = vmatpush.msra.mxu2 %v2846_v21  ;;  %v2940_v59 = vperm.slane %v155_v56, 0  ;;  %v2942_v60 = vperm.slane %v155_v56, 1 }
  0x22   :  { %399 = vmatpush.msra.mxu3 %v2848_v22  ;;  %377 = vmatpush.msra.mxu2 %v2854_v24 }
  0x24   :  { %400 = vmatpush.msra.mxu3 %v2856_v25  ;;  %378 = vmatpush.msra.mxu2 %v2860_v26 }
  0x26   :  { %401 = vmatpush.msra.mxu3 %v2862_v27  ;;  %379 = vmatpush.msra.mxu2 %v2866_v28 }
  0x27   :  { %2268 = vmatmul.msk.f32.gmra.mxu0 %vm161_vm0, %v137_v6  ;;  %2284 = vmatmul.msk.f32.gmra.mxu1 %vm161_vm0, %v137_v6 }
  0x28   :  { %402 = vmatpush.msra.mxu3 %v2868_v29  ;;  %380 = vmatmul.f32.vlgmr.msra.gmra.mxu2 %v4315_v31 }
  0x29   :  { %403 = vmatmul.f32.vlgmr.msra.gmra.mxu3 %v4315_v31  ;;  %479 = vmatpush.msrb.mxu2 %v2822_v12 }
  0x2a   :  { %502 = vmatpush.msrb.mxu3 %v2824_v13 }
  0x2b   :  { %480 = vmatpush.msrb.mxu2 %v2828_v15 }
  0x2c   :  { %503 = vmatpush.msrb.mxu3 %v2830_v16 }
  0x2d   :  { %481 = vmatpush.msrb.mxu2 %v2834_v17 }
  0x2e   :  { %504 = vmatpush.msrb.mxu3 %v2836_v18 }
  0x2f   :  { %2269 = vmatmul.msk.f32.gmra.mxu0 %vm161_vm0, %v138_v7  ;;  %2285 = vmatmul.msk.f32.gmra.mxu1 %vm161_vm0, %v138_v7 }
  0x30   :  { %482 = vmatpush.msrb.mxu2 %v2840_v19  ;;  %505 = vmatpush.msrb.mxu3 %v2842_v20 }
  0x31   :  { %383 = vmatmul.f32.gmra.mxu2 %v4315_v31  ;;  %406 = vmatmul.f32.gmra.mxu3 %v4315_v31 }
  0x32   :  { %483 = vmatpush.msrb.mxu2 %v2846_v21  ;;  %506 = vmatpush.msrb.mxu3 %v2848_v22 }
  0x34   :  { %484 = vmatpush.msrb.mxu2 %v2854_v24  ;;  %507 = vmatpush.msrb.mxu3 %v2856_v25 }
  0x36   :  { %485 = vmatpush.msrb.mxu2 %v2860_v26  ;;  %508 = vmatpush.msrb.mxu3 %v2862_v27 }
  0x37   :  { %2270 = vmatmul.msk.f32.gmra.mxu0 %vm161_vm0, %v139_v8  ;;  %2286 = vmatmul.msk.f32.gmra.mxu1 %vm161_vm0, %v139_v8 }
  0x38   :  { %486 = vmatpush.msrb.mxu2 %v2866_v28  ;;  %509 = vmatpush.msrb.mxu3 %v2868_v29 }
  0x3a   :  { %585 = vmatpush.msra.mxu2 %v2822_v12  ;;  %608 = vmatpush.msra.mxu3 %v2824_v13 }
  0x3c   :  { %586 = vmatpush.msra.mxu2 %v2828_v15  ;;  %609 = vmatpush.msra.mxu3 %v2830_v16 }
  0x3e   :  { %587 = vmatpush.msra.mxu2 %v2834_v17  ;;  %610 = vmatpush.msra.mxu3 %v2836_v18 }
  0x3f   :  { %2271 = vmatmul.msk.f32.gmra.mxu0 %vm161_vm0, %v140_v9  ;;  %2287 = vmatmul.msk.f32.gmra.mxu1 %vm161_vm0, %v140_v9 }
  0x40   :  { %588 = vmatpush.msra.mxu2 %v2840_v19  ;;  %611 = vmatpush.msra.mxu3 %v2842_v20 }
  0x42   :  { %589 = vmatpush.msra.mxu2 %v2846_v21  ;;  %612 = vmatpush.msra.mxu3 %v2848_v22 }
  0x44   :  { %590 = vmatpush.msra.mxu2 %v2854_v24  ;;  %613 = vmatpush.msra.mxu3 %v2856_v25 }
  0x46   :  { %591 = vmatpush.msra.mxu2 %v2860_v26  ;;  %614 = vmatpush.msra.mxu3 %v2862_v27 }
  0x47   :  { %2272 = vmatmul.msk.f32.gmra.mxu0 %vm161_vm0, %v141_v10  ;;  %2288 = vmatmul.msk.f32.gmra.mxu1 %vm161_vm0, %v141_v10 }
  0x48   :  { %592 = vmatpush.msra.mxu2 %v2866_v28  ;;  %615 = vmatpush.msra.mxu3 %v2868_v29 }
  0x4f   :  { %2273 = vmatmul.msk.f32.gmra.mxu0 %vm161_vm0, %v142_v11  ;;  %2289 = vmatmul.msk.f32.gmra.mxu1 %vm161_vm0, %v142_v11 }
  0x57   :  { %2274 = vmatmul.msk.f32.gmra.mxu0 %vm161_vm0, %v143_v14  ;;  %2290 = vmatmul.msk.f32.gmra.mxu1 %vm161_vm0, %v143_v14 }
  0x5f   :  { %2275 = vmatmul.msk.f32.gmra.mxu0 %vm161_vm0, %v144_v23  ;;  %2291 = vmatmul.msk.f32.gmra.mxu1 %vm161_vm0, %v144_v23 }
  0x67   :  { %2276 = vmatmul.msk.f32.gmra.mxu0 %vm161_vm0, %v145_v30  ;;  %2292 = vmatmul.msk.f32.gmra.mxu1 %vm161_vm0, %v145_v30 }
  0x6f   :  { %2277 = vmatmul.msk.f32.gmra.mxu0 %vm161_vm0, %v146_v32  ;;  %2293 = vmatmul.msk.f32.gmra.mxu1 %vm161_vm0, %v146_v32 }
  0x77   :  { %2278 = vmatmul.msk.f32.gmra.mxu0 %vm161_vm0, %v147_v33  ;;  %2294 = vmatmul.msk.f32.gmra.mxu1 %vm161_vm0, %v147_v33 }
  0x7f   :  { %2279 = vmatmul.msk.f32.gmra.mxu0 %vm161_vm0, %v148_v34  ;;  %2295 = vmatmul.msk.f32.gmra.mxu1 %vm161_vm0, %v148_v34 }
  0x87   :  { %2280 = vmatmul.msk.f32.gmra.mxu0 %vm161_vm0, %v149_v35  ;;  %2296 = vmatmul.msk.f32.gmra.mxu1 %vm161_vm0, %v149_v35 }
  0x8f   :  { %2281 = vmatmul.msk.f32.gmra.mxu0 %vm161_vm0, %v150_v36  ;;  %2297 = vmatmul.msk.f32.gmra.mxu1 %vm161_vm0, %v150_v36 }
  0x94   :  { %v2922_v37 = vpop.f32.mrf.mxu0  ;;  %v2924_v38 = vpop.f32.mrf.mxu1 }
  0x95   :  { %v3079_v58 = vadd.f32 %v2924_v38, %v2942_v60 }
  0x97   :  { %4347 = vst [vmem:[#allocation17_spill] sm:$0xff] %v3079_v58 }
  0x9c   :  { %v2926_v39 = vpop.f32.mrf.mxu0  ;;  %v2928_v40 = vpop.f32.mrf.mxu1 }
  0x9d   :  { %v3110_v52 = vadd.f32 %v2926_v39, %v2940_v59 }
  0x9f   :  { %4349 = vst [vmem:[#allocation19_spill] sm:$0xff] %v3110_v52 }
  0xa4   :  { %v233_v41 = vpop.f32.mrf.mxu0  ;;  %v298_v42 = vpop.f32.mrf.mxu1 }
  0xac   :  { %v236_v43 = vpop.f32.mrf.mxu0  ;;  %v301_v44 = vpop.f32.mrf.mxu1 }
  0xb4   :  { %v239_v45 = vpop.f32.mrf.mxu0  ;;  %v304_v46 = vpop.f32.mrf.mxu1 }
  0xb5   :  { %v2993_v34 = vadd.f32 %v239_v45, %v2940_v59  ;;  %v2996_v35 = vadd.f32 %v304_v46, %v2942_v60 }
  0xbc   :  { %v242_v47 = vpop.f32.mrf.mxu0  ;;  %v307_v48 = vpop.f32.mrf.mxu1 }
  0xbd   :  { %v3013_v46 = vadd.f32 %v242_v47, %v2940_v59 }
  0xc4   :  { %v245_v49 = vpop.f32.mrf.mxu0  ;;  %v310_v50 = vpop.f32.mrf.mxu1 }
  0xc5   :  { %v2953_v1 = vadd.f32 %v245_v49, %v2940_v59  ;;  %v2956_v2 = vadd.f32 %v310_v50, %v2942_v60 }
  0xcc   :  { %v248_v53 = vpop.f32.mrf.mxu0  ;;  %v313_v54 = vpop.f32.mrf.mxu1 }
  0xcd   :  { %v2973_v9 = vadd.f32 %v248_v53, %v2940_v59  ;;  %v2976_v10 = vadd.f32 %v313_v54, %v2942_v60  ;;  %v3016_v54 = vadd.f32 %v307_v48, %v2942_v60  ;;  %v3033_v48 = vadd.f32 %v233_v41, %v2940_v59  ;;  %v381_v41 = vpop.f32.mrf.mxu2 }
  0xcf   :  { %4344 = vst [vmem:[#allocation14_spill] sm:$0xff] %v2976_v10 }
  0xd4   :  { %v251_v61 = vpop.f32.mrf.mxu0  ;;  %v316_v62 = vpop.f32.mrf.mxu1 }
  0xd5   :  { %v2959_v3 = vadd.f32 %v251_v61, %v2940_v59  ;;  %v2962_v4 = vadd.f32 %v316_v62, %v2942_v60 }
  0xdc   :  { %v254_v7 = vpop.f32.mrf.mxu0  ;;  %v319_v8 = vpop.f32.mrf.mxu1 }
  0xdd   :  { %v2979_v11 = vadd.f32 %v254_v7, %v2940_v59  ;;  %v2982_v14 = vadd.f32 %v319_v8, %v2942_v60  ;;  %v3036_v7 = vadd.f32 %v298_v42, %v2942_v60  ;;  %v3053_v42 = vadd.f32 %v236_v43, %v2940_v59 }
  0xde   :  { %v2730_v43 = vmov 0.5  }
  0xdf   :  { %4345 = vst [vmem:[#allocation15_spill] sm:$0xff] %v2982_v14  ;;  %v3089_v50 = vsel %vm101_vm3, 1.0, %v2730_v43 }
  0xe4   :  { %v257_v32 = vpop.f32.mrf.mxu0  ;;  %v322_v33 = vpop.f32.mrf.mxu1 }
  0xe5   :  { %v2999_v36 = vadd.f32 %v257_v32, %v2940_v59  ;;  %v3002_v49 = vadd.f32 %v322_v33, %v2942_v60 }
  0xec   :  { %v260_v51 = vpop.f32.mrf.mxu0  ;;  %v325_v53 = vpop.f32.mrf.mxu1 }
  0xed   :  { %v3019_v56 = vadd.f32 %v260_v51, %v2940_v59  ;;  %v3022_v57 = vadd.f32 %v325_v53, %v2942_v60 }
  0xf4   :  { %v263_v61 = vpop.f32.mrf.mxu0  ;;  %v328_v62 = vpop.f32.mrf.mxu1 }
  0xf5   :  { %v3039_v8 = vadd.f32 %v263_v61, %v2940_v59  ;;  %v3042_v32 = vadd.f32 %v328_v62, %v2942_v60  ;;  %v3056_v61 = vadd.f32 %v301_v44, %v2942_v60  ;;  %v404_v44 = vpop.f32.mrf.mxu3 }
  0xfc   :  { %v266_v51 = vpop.f32.mrf.mxu0  ;;  %v331_v53 = vpop.f32.mrf.mxu1 }
  0xfd   :  { %v3059_v62 = vadd.f32 %v266_v51, %v2940_v59  ;;  %v3062_v31 = vadd.f32 %v331_v53, %v2942_v60  ;;  %v3075_v53 = vadd.f32 %v2922_v37, %v2940_v59 }
  0xff   :  { %4346 = vst [vmem:[#allocation16_spill] sm:$0xff] %v3075_v53 }
 0x104   :  { %v269_v47 = vpop.f32.mrf.mxu0  ;;  %v334_v51 = vpop.f32.mrf.mxu1 }
 0x105   :  { %v3082_v33 = vadd.f32 %v269_v47, %v2940_v59  ;;  %v3085_v45 = vadd.f32 %v334_v51, %v2942_v60  ;;  %v3114_v47 = vadd.f32 %v2928_v40, %v2942_v60 }
 0x107   :  { %4348 = vst [vmem:[#allocation18_spill] sm:$0xff] %v3085_v45  ;;  %v356_v37 = vsel %vm2944_vm1, %v3075_v53, %v3082_v33  ;;  %v357_v38 = vsel %vm2948_vm2, %v3079_v58, %v3085_v45 }
 0x108   :  { %v410_v30 = vadd.f32 %v381_v41, %v356_v37  ;;  %v411_v23 = vadd.f32 %v404_v44, %v357_v38  ;;  %4350 = vst [vmem:[#allocation20_spill] sm:$0xff] %v3114_v47  ;;  %v3141_v38 = vsel %vm101_vm3, 0.0, %v2730_v43 }
 0x10a   :  { %v414_v6 = vmul.f32 0.5, %v410_v30  ;;  %v415_v5 = vmul.f32 %v411_v23, %v3089_v50  ;;  %v384_v30 = vpop.f32.mrf.mxu2  ;;  %v407_v23 = vpop.f32.mrf.mxu3 }
 0x10c   :  { %2408 = vtanh.f32 %v414_v6  ;;  %v272_v10 = vpop.f32.mrf.mxu0  ;;  %v337_v14 = vpop.f32.mrf.mxu1 }
 0x10d   :  { %2410 = vtanh.f32 %v415_v5  ;;  %v3117_v53 = vadd.f32 %v272_v10, %v2940_v59  ;;  %v3120_v41 = vadd.f32 %v337_v14, %v2942_v60 }
 0x10f   :  { %4351 = vst [vmem:[#allocation21_spill] sm:$0xff] %v3117_v53  ;;  %v358_v39 = vsel %vm2944_vm1, %v3110_v52, %v3117_v53  ;;  %v359_v40 = vsel %vm2948_vm2, %v3114_v47, %v3120_v41 }
 0x110   :  { %4352 = vst [vmem:[#allocation22_spill] sm:$0xff] %v3120_v41  ;;  %v412_v5 = vadd.f32 %v384_v30, %v358_v39  ;;  %v413_v6 = vadd.f32 %v407_v23, %v359_v40 }
 0x112   :  { %v2409_v10 = vpop.eup %2408  ;;  %v416_v14 = vmul.f32 0.5, %v412_v5  ;;  %v417_v44 = vmul.f32 %v413_v6, %v3089_v50 }
 0x113   :  { %v2411_v37 = vpop.eup %2410  ;;  %v422_v51 = vmul.f32 0.5, %v2409_v10 }
 0x114   :  { %2412 = vtanh.f32 %v416_v14  ;;  %v423_v59 = vmul.f32 %v2411_v37, %v3089_v50 }
 0x115   :  { %2414 = vtanh.f32 %v417_v44  ;;  %v426_v52 = vadd.f32 0.5, %v422_v51 }
 0x116   :  { %v427_v53 = vadd.f32 %v423_v59, %v3141_v38 }
 0x117   :  { %v430_v6 = vmul.f32 0.0, %v426_v52 }
 0x118   :  { %v432_v60 = vmul.f32 %v427_v53, %v426_v52 }
 0x11a   :  { %v2413_v30 = vpop.eup %2412  ;;  %436 = vrot.lane.b32.xlu0 %v432_v60, %s2731_s2 }
 0x11b   :  { %v2415_v23 = vpop.eup %2414  ;;  %v424_v39 = vmul.f32 0.5, %v2413_v30 }
 0x11c   :  { %v425_v40 = vmul.f32 %v2415_v23, %v3089_v50 }
 0x11d   :  { %v428_v55 = vadd.f32 0.5, %v424_v39  ;;  %v463_v39 = vsel %vm2944_vm1, %v3033_v48, %v3039_v8 }
 0x11e   :  { %v429_v43 = vadd.f32 %v425_v40, %v3141_v38 }
 0x11f   :  { %v431_v59 = vmul.f32 0.0, %v428_v55 }
 0x120   :  { %v433_v5 = vmul.f32 %v429_v43, %v428_v55  ;;  %v464_v55 = vsel %vm2948_vm2, %v3036_v7, %v3042_v32 }
 0x122   :  { %438 = vrot.lane.b32.xlu0 %v433_v5, %s2731_s2 }
 0x18c   :  { %v437_v10 = vpop.permute.xlu0 %436 }
 0x18d   :  { %v3149_v51 = vadd.f32 %v437_v10, %v430_v6 }
 0x18f   :  { %2416 = vtanh.f32 %v3149_v51 }
 0x194   :  { %v439_v14 = vpop.permute.xlu0 %438 }
 0x195   :  { %v2417_v44 = vpop.eup %2416  ;;  %v3152_v60 = vadd.f32 %v439_v14, %v431_v59  ;;  %v465_v14 = vsel %vm2944_vm1, %v3053_v42, %v3059_v62 }
 0x196   :  { %v446_v37 = vmul.f32 %v2417_v44, %v427_v53 }
 0x197   :  { %2418 = vtanh.f32 %v3152_v60 }
 0x198   :  { %450 = vrot.lane.b32.xlu1 %v446_v37, %s2731_s2  ;;  %v466_v37 = vsel %vm2948_vm2, %v3056_v61, %v3062_v31 }
 0x19d   :  { %v2419_v30 = vpop.eup %2418 }
 0x19e   :  { %v447_v23 = vmul.f32 %v2419_v30, %v429_v43 }
 0x1a0   :  { %452 = vrot.lane.b32.xlu1 %v447_v23, %s2731_s2 }
 0x20a   :  { %v451_v52 = vpop.permute.xlu1 %450 }
 0x20b   :  { %457 = vst.msk [vmem:[#allocation2] sm:$0xff] %vm456_vm4, %v451_v52  ;;  %2298 = vmatmul.msk.f32.vlgmr.msrb.gmra.mxu2 %vm360_vm5, %v451_v52  ;;  %2300 = vmatmul.msk.f32.vlgmr.msrb.gmra.mxu3 %vm360_vm5, %v451_v52 }
 0x20c   :  { %461 = vst.msk [vmem:[#allocation2 + $0x70] sm:$0xff] %vm460_vm6, %v451_v52  ;;  %691 = vmatpush.msrb.mxu2 %v2822_v12  ;;  %714 = vmatpush.msrb.mxu3 %v2824_v13 }
 0x20e   :  { %692 = vmatpush.msrb.mxu2 %v2828_v15  ;;  %715 = vmatpush.msrb.mxu3 %v2830_v16 }
 0x210   :  { %693 = vmatpush.msrb.mxu2 %v2834_v17  ;;  %716 = vmatpush.msrb.mxu3 %v2836_v18 }
 0x212   :  { %v453_v53 = vpop.permute.xlu1 %452  ;;  %694 = vmatpush.msrb.mxu2 %v2840_v19  ;;  %717 = vmatpush.msrb.mxu3 %v2842_v20 }
 0x213   :  { %458 = vst.msk [vmem:[#allocation2 + $0x8] sm:$0xff] %vm456_vm4, %v453_v53  ;;  %2299 = vmatmul.msk.f32.gmra.mxu2 %vm360_vm5, %v453_v53  ;;  %2301 = vmatmul.msk.f32.gmra.mxu3 %vm360_vm5, %v453_v53 }
 0x214   :  { %462 = vst.msk [vmem:[#allocation2 + $0x78] sm:$0xff] %vm460_vm6, %v453_v53  ;;  %695 = vmatpush.msrb.mxu2 %v2846_v21  ;;  %718 = vmatpush.msrb.mxu3 %v2848_v22 }
 0x216   :  { %696 = vmatpush.msrb.mxu2 %v2854_v24  ;;  %719 = vmatpush.msrb.mxu3 %v2856_v25 }
 0x218   :  { %697 = vmatpush.msrb.mxu2 %v2860_v26  ;;  %720 = vmatpush.msrb.mxu3 %v2862_v27 }
 0x21a   :  { %698 = vmatpush.msrb.mxu2 %v2866_v28  ;;  %721 = vmatpush.msrb.mxu3 %v2868_v29 }
 0x28e   :  { %v488_v40 = vpop.f32.mrf.mxu2  ;;  %v511_v43 = vpop.f32.mrf.mxu3 }
 0x28f   :  { %v517_v5 = vadd.f32 %v488_v40, %v463_v39  ;;  %v518_v6 = vadd.f32 %v511_v43, %v464_v55 }
 0x291   :  { %v521_v10 = vmul.f32 0.5, %v517_v5  ;;  %v522_v59 = vmul.f32 %v518_v6, %v3089_v50 }
 0x293   :  { %2420 = vtanh.f32 %v521_v10 }
 0x294   :  { %2422 = vtanh.f32 %v522_v59 }
 0x296   :  { %v491_v44 = vpop.f32.mrf.mxu2  ;;  %v514_v30 = vpop.f32.mrf.mxu3 }
 0x297   :  { %v519_v23 = vadd.f32 %v491_v44, %v465_v14  ;;  %v520_v52 = vadd.f32 %v514_v30, %v466_v37 }
 0x299   :  { %v2421_v53 = vpop.eup %2420  ;;  %v523_v39 = vmul.f32 0.5, %v519_v23  ;;  %v524_v40 = vmul.f32 %v520_v52, %v3089_v50 }
 0x29a   :  { %v2423_v55 = vpop.eup %2422  ;;  %v529_v43 = vmul.f32 0.5, %v2421_v53 }
 0x29b   :  { %2424 = vtanh.f32 %v523_v39  ;;  %v530_v5 = vmul.f32 %v2423_v55, %v3089_v50 }
 0x29c   :  { %2426 = vtanh.f32 %v524_v40  ;;  %v533_v6 = vadd.f32 0.5, %v529_v43 }
 0x29d   :  { %v534_v10 = vadd.f32 %v530_v5, %v3141_v38 }
 0x29e   :  { %v537_v52 = vmul.f32 %v533_v6, %v3149_v51 }
 0x29f   :  { %v539_v59 = vmul.f32 %v534_v10, %v533_v6  ;;  %v569_v6 = vsel %vm2944_vm1, %v2993_v34, %v2999_v36 }
 0x2a1   :  { %v2425_v47 = vpop.eup %2424  ;;  %543 = vrot.lane.b32.xlu2 %v539_v59, %s2731_s2 }
 0x2a2   :  { %v2427_v41 = vpop.eup %2426  ;;  %v531_v14 = vmul.f32 0.5, %v2425_v47 }
 0x2a3   :  { %v532_v44 = vmul.f32 %v2427_v41, %v3089_v50 }
 0x2a4   :  { %v535_v37 = vadd.f32 0.5, %v531_v14  ;;  %v570_v14 = vsel %vm2948_vm2, %v2996_v35, %v3002_v49 }
 0x2a5   :  { %v536_v30 = vadd.f32 %v532_v44, %v3141_v38 }
 0x2a6   :  { %v538_v40 = vmul.f32 %v535_v37, %v3152_v60 }
 0x2a7   :  { %v540_v23 = vmul.f32 %v536_v30, %v535_v37 }
 0x2a9   :  { %545 = vrot.lane.b32.xlu2 %v540_v23, %s2731_s2 }
 0x2fb   :  { %v544_v53 = vpop.permute.xlu2 %543 }
 0x2fc   :  { %v3206_v39 = vadd.f32 %v544_v53, %v537_v52  ;;  %v571_v53 = vsel %vm2944_vm1, %v3013_v46, %v3019_v56 }
 0x2fe   :  { %2428 = vtanh.f32 %v3206_v39 }
 0x303   :  { %v546_v55 = vpop.permute.xlu2 %545 }
 0x304   :  { %v2429_v43 = vpop.eup %2428  ;;  %v3210_v47 = vadd.f32 %v546_v55, %v538_v40  ;;  %v572_v55 = vsel %vm2948_vm2, %v3016_v54, %v3022_v57 }
 0x305   :  { %v553_v41 = vmul.f32 %v2429_v43, %v534_v10 }
 0x306   :  { %2430 = vtanh.f32 %v3210_v47 }
 0x307   :  { %557 = vrot.lane.b32.xlu0 %v553_v41, %s2731_s2 }
 0x30c   :  { %v2431_v5 = vpop.eup %2430 }
 0x30d   :  { %v554_v59 = vmul.f32 %v2431_v5, %v536_v30 }
 0x30f   :  { %559 = vrot.lane.b32.xlu1 %v554_v59, %s2731_s2 }
 0x379   :  { %v558_v51 = vpop.permute.xlu0 %557 }
 0x37a   :  { %564 = vst.msk [vmem:[#allocation2 + $0x10] sm:$0xff] %vm456_vm4, %v558_v51  ;;  %2302 = vmatmul.msk.f32.vlgmr.msra.gmra.mxu2 %vm360_vm5, %v558_v51  ;;  %2304 = vmatmul.msk.f32.vlgmr.msra.gmra.mxu3 %vm360_vm5, %v558_v51 }
 0x37b   :  { %567 = vst.msk [vmem:[#allocation2 + $0x60] sm:$0xff] %vm460_vm6, %v558_v51  ;;  %797 = vmatpush.msra.mxu2 %v2822_v12  ;;  %820 = vmatpush.msra.mxu3 %v2824_v13 }
 0x37d   :  { %798 = vmatpush.msra.mxu2 %v2828_v15  ;;  %821 = vmatpush.msra.mxu3 %v2830_v16 }
 0x37f   :  { %799 = vmatpush.msra.mxu2 %v2834_v17  ;;  %822 = vmatpush.msra.mxu3 %v2836_v18 }
 0x381   :  { %v560_v60 = vpop.permute.xlu1 %559  ;;  %800 = vmatpush.msra.mxu2 %v2840_v19  ;;  %823 = vmatpush.msra.mxu3 %v2842_v20 }
 0x382   :  { %565 = vst.msk [vmem:[#allocation2 + $0x18] sm:$0xff] %vm456_vm4, %v560_v60  ;;  %2303 = vmatmul.msk.f32.gmra.mxu2 %vm360_vm5, %v560_v60  ;;  %2305 = vmatmul.msk.f32.gmra.mxu3 %vm360_vm5, %v560_v60 }
 0x383   :  { %568 = vst.msk [vmem:[#allocation2 + $0x68] sm:$0xff] %vm460_vm6, %v560_v60  ;;  %801 = vmatpush.msra.mxu2 %v2846_v21  ;;  %824 = vmatpush.msra.mxu3 %v2848_v22 }
 0x385   :  { %802 = vmatpush.msra.mxu2 %v2854_v24  ;;  %825 = vmatpush.msra.mxu3 %v2856_v25 }
 0x387   :  { %803 = vmatpush.msra.mxu2 %v2860_v26  ;;  %826 = vmatpush.msra.mxu3 %v2862_v27 }
 0x389   :  { %804 = vmatpush.msra.mxu2 %v2866_v28  ;;  %827 = vmatpush.msra.mxu3 %v2868_v29 }
 0x3fd   :  { %v594_v10 = vpop.f32.mrf.mxu2  ;;  %v617_v44 = vpop.f32.mrf.mxu3 }
 0x3fe   :  { %v623_v37 = vadd.f32 %v594_v10, %v569_v6  ;;  %v624_v30 = vadd.f32 %v617_v44, %v570_v14 }
 0x400   :  { %v627_v23 = vmul.f32 0.5, %v623_v37  ;;  %v628_v52 = vmul.f32 %v624_v30, %v3089_v50 }
 0x402   :  { %2432 = vtanh.f32 %v627_v23 }
 0x403   :  { %2434 = vtanh.f32 %v628_v52 }
 0x405   :  { %v597_v40 = vpop.f32.mrf.mxu2  ;;  %v620_v43 = vpop.f32.mrf.mxu3 }
 0x406   :  { %v625_v41 = vadd.f32 %v597_v40, %v571_v53  ;;  %v626_v5 = vadd.f32 %v620_v43, %v572_v55 }
 0x408   :  { %v2433_v59 = vpop.eup %2432  ;;  %v629_v51 = vmul.f32 0.5, %v625_v41  ;;  %v630_v60 = vmul.f32 %v626_v5, %v3089_v50 }
 0x409   :  { %v2435_v6 = vpop.eup %2434  ;;  %v635_v10 = vmul.f32 0.5, %v2433_v59 }
 0x40a   :  { %2436 = vtanh.f32 %v629_v51  ;;  %v636_v14 = vmul.f32 %v2435_v6, %v3089_v50 }
 0x40b   :  { %v639_v44 = vadd.f32 0.5, %v635_v10  ;;  %2438 = vtanh.f32 %v630_v60 }
 0x40c   :  { %v640_v37 = vadd.f32 %v636_v14, %v3141_v38 }
 0x40d   :  { %v643_v5 = vmul.f32 %v639_v44, %v3206_v39 }
 0x40e   :  { %v645_v30 = vmul.f32 %v640_v37, %v639_v44  ;;  %v675_v44 = vsel %vm2944_vm1, %v2953_v1, %v2959_v3 }
 0x410   :  { %v2437_v23 = vpop.eup %2436  ;;  %649 = vrot.lane.b32.xlu2 %v645_v30, %s2731_s2 }
 0x411   :  { %v2439_v52 = vpop.eup %2438  ;;  %v637_v53 = vmul.f32 0.5, %v2437_v23 }
 0x412   :  { %v638_v40 = vmul.f32 %v2439_v52, %v3089_v50 }
 0x413   :  { %v641_v55 = vadd.f32 0.5, %v637_v53  ;;  %v676_v53 = vsel %vm2948_vm2, %v2956_v2, %v2962_v4 }
 0x414   :  { %v642_v43 = vadd.f32 %v638_v40, %v3141_v38 }
 0x415   :  { %v644_v10 = vmul.f32 %v641_v55, %v3210_v47 }
 0x416   :  { %v646_v41 = vmul.f32 %v642_v43, %v641_v55 }
 0x418   :  { %651 = vrot.lane.b32.xlu0 %v646_v41, %s2731_s2 }
 0x46a   :  { %v650_v59 = vpop.permute.xlu2 %649 }
 0x46b   :  { %v3264_v51 = vadd.f32 %v650_v59, %v643_v5  ;;  %v677_v59 = vsel %vm2944_vm1, %v2973_v9, %v2979_v11 }
 0x46d   :  { %2440 = vtanh.f32 %v3264_v51 }
 0x473   :  { %v2441_v60 = vpop.eup %2440 }
 0x474   :  { %v659_v6 = vmul.f32 %v2441_v60, %v640_v37 }
 0x476   :  { %663 = vrot.lane.b32.xlu1 %v659_v6, %s2731_s2  ;;  %v4353_v6 = vld [vmem:[#allocation15_spill] sm:$0xff] }
 0x48a   :  { %v652_v14 = vpop.permute.xlu0 %651 }
 0x48b   :  { %v3269_v30 = vadd.f32 %v652_v14, %v644_v10  ;;  %v4354_v10 = vld [vmem:[#allocation14_spill] sm:$0xff] }
 0x48c   :  { %v678_v14 = vsel %vm2948_vm2, %v4354_v10, %v4353_v6 }
 0x48d   :  { %2442 = vtanh.f32 %v3269_v30 }
 0x493   :  { %v2443_v23 = vpop.eup %2442 }
 0x494   :  { %v660_v52 = vmul.f32 %v2443_v23, %v642_v43 }
 0x496   :  { %665 = vrot.lane.b32.xlu2 %v660_v52, %s2731_s2 }
 0x4e8   :  { %v664_v39 = vpop.permute.xlu1 %663 }
 0x4e9   :  { %670 = vst.msk [vmem:[#allocation2 + $0x20] sm:$0xff] %vm456_vm4, %v664_v39  ;;  %2306 = vmatmul.msk.f32.vlgmr.msrb.gmra.mxu2 %vm360_vm5, %v664_v39  ;;  %2308 = vmatmul.msk.f32.vlgmr.msrb.gmra.mxu3 %vm360_vm5, %v664_v39 }
 0x4ea   :  { %673 = vst.msk [vmem:[#allocation2 + $0x50] sm:$0xff] %vm460_vm6, %v664_v39  ;;  %901 = vmatpush.msrb.mxu2 %v2822_v12  ;;  %924 = vmatpush.msrb.mxu3 %v2824_v13 }
 0x4ec   :  { %902 = vmatpush.msrb.mxu2 %v2828_v15  ;;  %925 = vmatpush.msrb.mxu3 %v2830_v16 }
 0x4ee   :  { %903 = vmatpush.msrb.mxu2 %v2834_v17  ;;  %926 = vmatpush.msrb.mxu3 %v2836_v18 }
 0x4f0   :  { %v666_v47 = vpop.permute.xlu2 %665  ;;  %904 = vmatpush.msrb.mxu2 %v2840_v19  ;;  %927 = vmatpush.msrb.mxu3 %v2842_v20 }
 0x4f1   :  { %671 = vst.msk [vmem:[#allocation2 + $0x28] sm:$0xff] %vm456_vm4, %v666_v47  ;;  %2307 = vmatmul.msk.f32.gmra.mxu2 %vm360_vm5, %v666_v47  ;;  %2309 = vmatmul.msk.f32.gmra.mxu3 %vm360_vm5, %v666_v47 }
 0x4f2   :  { %674 = vst.msk [vmem:[#allocation2 + $0x58] sm:$0xff] %vm460_vm6, %v666_v47  ;;  %905 = vmatpush.msrb.mxu2 %v2846_v21  ;;  %928 = vmatpush.msrb.mxu3 %v2848_v22 }
 0x4f4   :  { %906 = vmatpush.msrb.mxu2 %v2854_v24  ;;  %929 = vmatpush.msrb.mxu3 %v2856_v25 }
 0x4f6   :  { %907 = vmatpush.msrb.mxu2 %v2860_v26  ;;  %930 = vmatpush.msrb.mxu3 %v2862_v27 }
 0x4f8   :  { %908 = vmatpush.msrb.mxu2 %v2866_v28  ;;  %931 = vmatpush.msrb.mxu3 %v2868_v29 }
 0x56c   :  { %v700_v37 = vpop.f32.mrf.mxu2  ;;  %v723_v40 = vpop.f32.mrf.mxu3 }
 0x56d   :  { %v729_v55 = vadd.f32 %v700_v37, %v675_v44  ;;  %v730_v43 = vadd.f32 %v723_v40, %v676_v53 }
 0x56f   :  { %v733_v41 = vmul.f32 0.5, %v729_v55  ;;  %v734_v5 = vmul.f32 %v730_v43, %v3089_v50 }
 0x571   :  { %2444 = vtanh.f32 %v733_v41 }
 0x572   :  { %2446 = vtanh.f32 %v734_v5 }
 0x574   :  { %v703_v60 = vpop.f32.mrf.mxu2  ;;  %v726_v23 = vpop.f32.mrf.mxu3 }
 0x575   :  { %v731_v52 = vadd.f32 %v703_v60, %v677_v59  ;;  %v732_v39 = vadd.f32 %v726_v23, %v678_v14 }
 0x577   :  { %v2445_v47 = vpop.eup %2444  ;;  %v735_v44 = vmul.f32 0.5, %v731_v52  ;;  %v736_v37 = vmul.f32 %v732_v39, %v3089_v50 }
 0x578   :  { %v2447_v53 = vpop.eup %2446  ;;  %v741_v40 = vmul.f32 0.5, %v2445_v47 }
 0x579   :  { %2448 = vtanh.f32 %v735_v44  ;;  %v742_v55 = vmul.f32 %v2447_v53, %v3089_v50 }
 0x57a   :  { %v745_v43 = vadd.f32 0.5, %v741_v40  ;;  %2450 = vtanh.f32 %v736_v37 }
 0x57b   :  { %v746_v41 = vadd.f32 %v742_v55, %v3141_v38 }
 0x57c   :  { %v749_v39 = vmul.f32 %v745_v43, %v3264_v51 }
 0x57d   :  { %v751_v5 = vmul.f32 %v746_v41, %v745_v43 }
 0x57f   :  { %v2449_v58 = vpop.eup %2448  ;;  %755 = vrot.lane.b32.xlu0 %v751_v5, %s2731_s2 }
 0x580   :  { %v2451_v45 = vpop.eup %2450  ;;  %v743_v59 = vmul.f32 0.5, %v2449_v58 }
 0x581   :  { %v744_v60 = vmul.f32 %v2451_v45, %v3089_v50 }
 0x582   :  { %v747_v14 = vadd.f32 0.5, %v743_v59 }
 0x583   :  { %v748_v23 = vadd.f32 %v744_v60, %v3141_v38 }
 0x584   :  { %v750_v37 = vmul.f32 %v747_v14, %v3269_v30  ;;  %v4358_v30 = vsel %vm2948_vm2, %v4353_v6, %v4354_v10 }
 0x585   :  { %v752_v52 = vmul.f32 %v748_v23, %v747_v14 }
 0x587   :  { %757 = vrot.lane.b32.xlu1 %v752_v52, %s2731_s2 }
 0x5f1   :  { %v756_v47 = vpop.permute.xlu0 %755 }
 0x5f2   :  { %v3322_v44 = vadd.f32 %v756_v47, %v749_v39 }
 0x5f4   :  { %2452 = vtanh.f32 %v3322_v44 }
 0x5f9   :  { %v758_v53 = vpop.permute.xlu1 %757 }
 0x5fa   :  { %v2453_v40 = vpop.eup %2452  ;;  %v3326_v58 = vadd.f32 %v758_v53, %v750_v37 }
 0x5fb   :  { %v765_v45 = vmul.f32 %v2453_v40, %v746_v41 }
 0x5fc   :  { %2454 = vtanh.f32 %v3326_v58 }
 0x5fd   :  { %769 = vrot.lane.b32.xlu2 %v765_v45, %s2731_s2 }
 0x602   :  { %v2455_v55 = vpop.eup %2454 }
 0x603   :  { %v766_v5 = vmul.f32 %v2455_v55, %v748_v23 }
 0x605   :  { %771 = vrot.lane.b32.xlu0 %v766_v5, %s2731_s2 }
 0x657   :  { %v770_v51 = vpop.permute.xlu2 %769 }
 0x658   :  { %776 = vst.msk [vmem:[#allocation2 + $0x30] sm:$0xff] %vm456_vm4, %v770_v51  ;;  %2310 = vmatmul.msk.f32.vlgmr.msra.gmra.mxu2 %vm360_vm5, %v770_v51  ;;  %2312 = vmatmul.msk.f32.vlgmr.msra.gmra.mxu3 %vm360_vm5, %v770_v51 }
 0x659   :  { %779 = vst.msk [vmem:[#allocation2 + $0x40] sm:$0xff] %vm460_vm6, %v770_v51  ;;  %1005 = vmatpush.msra.mxu2 %v2822_v12  ;;  %1028 = vmatpush.msra.mxu3 %v2824_v13 }
 0x65b   :  { %1006 = vmatpush.msra.mxu2 %v2828_v15  ;;  %1029 = vmatpush.msra.mxu3 %v2830_v16  ;;  %v4355_v16 = vsel %vm2944_vm1, %v2959_v3, %v2953_v1 }
 0x65d   :  { %1007 = vmatpush.msra.mxu2 %v2834_v17  ;;  %1030 = vmatpush.msra.mxu3 %v2836_v18  ;;  %v4356_v18 = vsel %vm2948_vm2, %v2962_v4, %v2956_v2  ;;  %v4357_v2 = vsel %vm2944_vm1, %v2979_v11, %v2973_v9 }
 0x65f   :  { %1008 = vmatpush.msra.mxu2 %v2840_v19  ;;  %1031 = vmatpush.msra.mxu3 %v2842_v20 }
 0x661   :  { %1009 = vmatpush.msra.mxu2 %v2846_v21  ;;  %1032 = vmatpush.msra.mxu3 %v2848_v22 }
 0x663   :  { %1010 = vmatpush.msra.mxu2 %v2854_v24  ;;  %1033 = vmatpush.msra.mxu3 %v2856_v25 }
 0x665   :  { %1011 = vmatpush.msra.mxu2 %v2860_v26  ;;  %1034 = vmatpush.msra.mxu3 %v2862_v27 }
 0x667   :  { %1012 = vmatpush.msra.mxu2 %v2866_v28  ;;  %1035 = vmatpush.msra.mxu3 %v2868_v29 }
 0x677   :  { %v772_v12 = vpop.permute.xlu0 %771 }
 0x678   :  { %777 = vst.msk [vmem:[#allocation2 + $0x38] sm:$0xff] %vm456_vm4, %v772_v12  ;;  %2311 = vmatmul.msk.f32.gmra.mxu2 %vm360_vm5, %v772_v12  ;;  %2313 = vmatmul.msk.f32.gmra.mxu3 %vm360_vm5, %v772_v12 }
 0x679   :  { %780 = vst.msk [vmem:[#allocation2 + $0x48] sm:$0xff] %vm460_vm6, %v772_v12  ;;  %v2601_v12 = vld [vmem:[#allocation5 + $0x78] sm:$0xff] }
 0x6db   :  { %v806_v13 = vpop.f32.mrf.mxu2  ;;  %v829_v15 = vpop.f32.mrf.mxu3 }
 0x6dc   :  { %v835_v17 = vadd.f32 %v806_v13, %v4355_v16  ;;  %v836_v19 = vadd.f32 %v829_v15, %v4356_v18  ;;  %v2602_v13 = vld [vmem:[#allocation5 + $0x60] sm:$0xff]  ;;  %v2603_v15 = vld [vmem:[#allocation5 + $0x68] sm:$0xff]  ;;  %v2604_v16 = vld [vmem:[#allocation5 + $0x50] sm:$0xff] }
 0x6de   :  { %v839_v20 = vmul.f32 0.5, %v835_v17  ;;  %v840_v21 = vmul.f32 %v836_v19, %v3089_v50  ;;  %v2605_v17 = vld [vmem:[#allocation5 + $0x58] sm:$0xff]  ;;  %v2606_v19 = vld [vmem:[#allocation5 + $0x40] sm:$0xff] }
 0x6e0   :  { %2456 = vtanh.f32 %v839_v20  ;;  %v2607_v20 = vld [vmem:[#allocation5 + $0x48] sm:$0xff] }
 0x6e1   :  { %2458 = vtanh.f32 %v840_v21  ;;  %v2608_v21 = vld [vmem:[#allocation5 + $0x30] sm:$0xff] }
 0x6e6   :  { %v2457_v22 = vpop.eup %2456 }
 0x6e7   :  { %v2459_v24 = vpop.eup %2458  ;;  %v847_v25 = vmul.f32 0.5, %v2457_v22  ;;  %v2609_v22 = vld [vmem:[#allocation5 + $0x38] sm:$0xff] }
 0x6e8   :  { %v848_v26 = vmul.f32 %v2459_v24, %v3089_v50  ;;  %v2610_v24 = vld [vmem:[#allocation5 + $0x20] sm:$0xff] }
 0x6e9   :  { %v851_v27 = vadd.f32 0.5, %v847_v25  ;;  %v2611_v25 = vld [vmem:[#allocation5 + $0x28] sm:$0xff] }
 0x6ea   :  { %v852_v28 = vadd.f32 %v848_v26, %v3141_v38  ;;  %v2612_v26 = vld [vmem:[#allocation5 + $0x10] sm:$0xff] }
 0x6eb   :  { %v855_v47 = vmul.f32 %v851_v27, %v3322_v44 }
 0x6ec   :  { %v857_v29 = vmul.f32 %v852_v28, %v851_v27  ;;  %v2613_v27 = vld [vmem:[#allocation5 + $0x18] sm:$0xff] }
 0x6ee   :  { %861 = vrot.lane.b32.xlu1 %v857_v29, %s2731_s2  ;;  %v2615_v29 = vld [vmem:[#allocation5 + $0x8] sm:$0xff] }
 0x6fb   :  { %v809_v1 = vpop.f32.mrf.mxu2  ;;  %v832_v3 = vpop.f32.mrf.mxu3 }
 0x6fc   :  { %v837_v4 = vadd.f32 %v809_v1, %v4357_v2  ;;  %v838_v43 = vadd.f32 %v832_v3, %v4358_v30  ;;  %v4359_v2 = vsel %vm2944_vm1, %v2999_v36, %v2993_v34  ;;  %v4360_v30 = vsel %vm2948_vm2, %v3002_v49, %v2996_v35 }
 0x6fd   :  { %v4362_v36 = vsel %vm2948_vm2, %v3022_v57, %v3016_v54 }
 0x6fe   :  { %v841_v41 = vmul.f32 0.5, %v837_v4  ;;  %v842_v59 = vmul.f32 %v838_v43, %v3089_v50 }
 0x700   :  { %2460 = vtanh.f32 %v841_v41 }
 0x701   :  { %2462 = vtanh.f32 %v842_v59 }
 0x706   :  { %v2461_v60 = vpop.eup %2460 }
 0x707   :  { %v2463_v14 = vpop.eup %2462  ;;  %v849_v23 = vmul.f32 0.5, %v2461_v60 }
 0x708   :  { %v850_v52 = vmul.f32 %v2463_v14, %v3089_v50 }
 0x709   :  { %v853_v39 = vadd.f32 0.5, %v849_v23  ;;  %v4361_v23 = vsel %vm2944_vm1, %v3019_v56, %v3013_v46 }
 0x70a   :  { %v854_v9 = vadd.f32 %v850_v52, %v3141_v38 }
 0x70b   :  { %v856_v37 = vmul.f32 %v853_v39, %v3326_v58  ;;  %v2600_v58 = vld [vmem:[#allocation5 + $0x70] sm:$0xff] }
 0x70c   :  { %v858_v11 = vmul.f32 %v854_v9, %v853_v39 }
 0x70e   :  { %863 = vrot.lane.b32.xlu2 %v858_v11, %s2731_s2 }
 0x760   :  { %v862_v6 = vpop.permute.xlu1 %861 }
 0x761   :  { %v3384_v10 = vadd.f32 %v862_v6, %v855_v47 }
 0x763   :  { %2464 = vtanh.f32 %v3384_v10 }
 0x768   :  { %v864_v53 = vpop.permute.xlu2 %863 }
 0x769   :  { %v2465_v40 = vpop.eup %2464  ;;  %v3388_v45 = vadd.f32 %v864_v53, %v856_v37 }
 0x76a   :  { %v871_v55 = vmul.f32 %v2465_v40, %v852_v28  ;;  %v2614_v28 = vld [vmem:[#allocation5] sm:$0xff] }
 0x76b   :  { %2466 = vtanh.f32 %v3388_v45 }
 0x76c   :  { %875 = vrot.lane.b32.xlu0 %v871_v55, %s2731_s2 }
 0x771   :  { %v2467_v5 = vpop.eup %2466 }
 0x772   :  { %v872_v51 = vmul.f32 %v2467_v5, %v854_v9 }
 0x774   :  { %877 = vrot.lane.b32.xlu1 %v872_v51, %s2731_s2 }
 0x7de   :  { %v876_v44 = vpop.permute.xlu0 %875 }
 0x7df   :  { %881 = vst.msk [vmem:[#allocation2 + $0x40] sm:$0xff] %vm456_vm4, %v876_v44  ;;  %2314 = vmatmul.msk.f32.vlgmr.msrb.gmra.mxu2 %vm360_vm5, %v876_v44  ;;  %2316 = vmatmul.msk.f32.vlgmr.msrb.gmra.mxu3 %vm360_vm5, %v876_v44 }
 0x7e0   :  { %883 = vst.msk [vmem:[#allocation2 + $0x30] sm:$0xff] %vm460_vm6, %v876_v44  ;;  %1109 = vmatpush.msrb.mxu2 %v2600_v58  ;;  %1132 = vmatpush.msrb.mxu3 %v2601_v12 }
 0x7e2   :  { %1110 = vmatpush.msrb.mxu2 %v2602_v13  ;;  %1133 = vmatpush.msrb.mxu3 %v2603_v15 }
 0x7e4   :  { %1111 = vmatpush.msrb.mxu2 %v2604_v16  ;;  %1134 = vmatpush.msrb.mxu3 %v2605_v17 }
 0x7e6   :  { %v878_v18 = vpop.permute.xlu1 %877  ;;  %1112 = vmatpush.msrb.mxu2 %v2606_v19  ;;  %1135 = vmatpush.msrb.mxu3 %v2607_v20 }
 0x7e7   :  { %882 = vst.msk [vmem:[#allocation2 + $0x48] sm:$0xff] %vm456_vm4, %v878_v18  ;;  %2315 = vmatmul.msk.f32.gmra.mxu2 %vm360_vm5, %v878_v18  ;;  %2317 = vmatmul.msk.f32.gmra.mxu3 %vm360_vm5, %v878_v18 }
 0x7e8   :  { %884 = vst.msk [vmem:[#allocation2 + $0x38] sm:$0xff] %vm460_vm6, %v878_v18  ;;  %1113 = vmatpush.msrb.mxu2 %v2608_v21  ;;  %1136 = vmatpush.msrb.mxu3 %v2609_v22  ;;  %v4363_v22 = vsel %vm2944_vm1, %v3039_v8, %v3033_v48  ;;  %v4366_v8 = vsel %vm2948_vm2, %v3062_v31, %v3056_v61 }
 0x7ea   :  { %1114 = vmatpush.msrb.mxu2 %v2610_v24  ;;  %1137 = vmatpush.msrb.mxu3 %v2611_v25  ;;  %v4364_v25 = vsel %vm2948_vm2, %v3042_v32, %v3036_v7 }
 0x7ec   :  { %1115 = vmatpush.msrb.mxu2 %v2612_v26  ;;  %1138 = vmatpush.msrb.mxu3 %v2613_v27 }
 0x7ee   :  { %1116 = vmatpush.msrb.mxu2 %v2614_v28  ;;  %1139 = vmatpush.msrb.mxu3 %v2615_v29 }
 0x862   :  { %v910_v1 = vpop.f32.mrf.mxu2  ;;  %v933_v3 = vpop.f32.mrf.mxu3 }
 0x863   :  { %v939_v4 = vadd.f32 %v910_v1, %v4359_v2  ;;  %v940_v43 = vadd.f32 %v933_v3, %v4360_v30  ;;  %v4365_v3 = vsel %vm2944_vm1, %v3059_v62, %v3053_v42 }
 0x865   :  { %v943_v41 = vmul.f32 0.5, %v939_v4  ;;  %v944_v59 = vmul.f32 %v940_v43, %v3089_v50 }
 0x867   :  { %2468 = vtanh.f32 %v943_v41 }
 0x868   :  { %2470 = vtanh.f32 %v944_v59 }
 0x86a   :  { %v913_v60 = vpop.f32.mrf.mxu2  ;;  %v936_v14 = vpop.f32.mrf.mxu3 }
 0x86b   :  { %v941_v34 = vadd.f32 %v913_v60, %v4361_v23  ;;  %v942_v35 = vadd.f32 %v936_v14, %v4362_v36 }
 0x86d   :  { %v2469_v49 = vpop.eup %2468  ;;  %v945_v52 = vmul.f32 0.5, %v941_v34  ;;  %v946_v39 = vmul.f32 %v942_v35, %v3089_v50 }
 0x86e   :  { %v2471_v9 = vpop.eup %2470  ;;  %v951_v11 = vmul.f32 0.5, %v2469_v49 }
 0x86f   :  { %2472 = vtanh.f32 %v945_v52  ;;  %v952_v47 = vmul.f32 %v2471_v9, %v3089_v50 }
 0x870   :  { %v955_v6 = vadd.f32 0.5, %v951_v11  ;;  %2474 = vtanh.f32 %v946_v39 }
 0x871   :  { %v956_v46 = vadd.f32 %v952_v47, %v3141_v38 }
 0x872   :  { %v959_v51 = vmul.f32 %v955_v6, %v3384_v10 }
 0x873   :  { %v961_v56 = vmul.f32 %v956_v46, %v955_v6 }
 0x875   :  { %v2473_v37 = vpop.eup %2472  ;;  %965 = vrot.lane.b32.xlu2 %v961_v56, %s2731_s2 }
 0x876   :  { %v2475_v53 = vpop.eup %2474  ;;  %v953_v54 = vmul.f32 0.5, %v2473_v37 }
 0x877   :  { %v954_v57 = vmul.f32 %v2475_v53, %v3089_v50 }
 0x878   :  { %v957_v40 = vadd.f32 0.5, %v953_v54 }
 0x879   :  { %v958_v55 = vadd.f32 %v954_v57, %v3141_v38 }
 0x87a   :  { %v960_v15 = vmul.f32 %v957_v40, %v3388_v45 }
 0x87b   :  { %v962_v5 = vmul.f32 %v958_v55, %v957_v40  ;;  %v4367_v40 = vld [vmem:[#allocation16_spill] sm:$0xff] }
 0x87d   :  { %967 = vrot.lane.b32.xlu0 %v962_v5, %s2731_s2 }
 0x8cf   :  { %v966_v44 = vpop.permute.xlu2 %965 }
 0x8d0   :  { %v971_v58 = vadd.f32 %v966_v44, %v959_v51  ;;  %v4369_v51 = vld [vmem:[#allocation18_spill] sm:$0xff]  ;;  %v4370_v44 = vld [vmem:[#allocation17_spill] sm:$0xff] }
 0x8d2   :  { %2476 = vtanh.f32 %v971_v58 }
 0x8d8   :  { %v2477_v12 = vpop.eup %2476 }
 0x8d9   :  { %v975_v13 = vmul.f32 %v2477_v12, %v956_v46 }
 0x8db   :  { %979 = vrot.lane.b32.xlu1 %v975_v13, %s2731_s2 }
 0x8ef   :  { %v968_v16 = vpop.permute.xlu0 %967 }
 0x8f0   :  { %v972_v17 = vadd.f32 %v968_v16, %v960_v15 }
 0x8f2   :  { %2478 = vtanh.f32 %v972_v17 }
 0x8f8   :  { %v2479_v18 = vpop.eup %2478 }
 0x8f9   :  { %v976_v19 = vmul.f32 %v2479_v18, %v958_v55  ;;  %v4368_v55 = vsel %vm2944_vm1, %v3082_v33, %v4367_v40 }
 0x8fb   :  { %981 = vrot.lane.b32.xlu2 %v976_v19, %s2731_s2 }
 0x94d   :  { %v980_v20 = vpop.permute.xlu1 %979 }
 0x94e   :  { %985 = vst.msk [vmem:[#allocation2 + $0x50] sm:$0xff] %vm456_vm4, %v980_v20  ;;  %2318 = vmatmul.msk.f32.vlgmr.msra.gmra.mxu2 %vm360_vm5, %v980_v20  ;;  %2320 = vmatmul.msk.f32.vlgmr.msra.gmra.mxu3 %vm360_vm5, %v980_v20 }
 0x94f   :  { %987 = vst.msk [vmem:[#allocation2 + $0x20] sm:$0xff] %vm460_vm6, %v980_v20 }
 0x955   :  { %v982_v10 = vpop.permute.xlu2 %981 }
 0x956   :  { %986 = vst.msk [vmem:[#allocation2 + $0x58] sm:$0xff] %vm456_vm4, %v982_v10  ;;  %2319 = vmatmul.msk.f32.gmra.mxu2 %vm360_vm5, %v982_v10  ;;  %2321 = vmatmul.msk.f32.gmra.mxu3 %vm360_vm5, %v982_v10 }
 0x957   :  { %988 = vst.msk [vmem:[#allocation2 + $0x28] sm:$0xff] %vm460_vm6, %v982_v10 }
 0x9d1   :  { %v1014_v45 = vpop.f32.mrf.mxu2  ;;  %v1037_v21 = vpop.f32.mrf.mxu3 }
 0x9d2   :  { %v1043_v24 = vadd.f32 %v1014_v45, %v4363_v22  ;;  %v1044_v26 = vadd.f32 %v1037_v21, %v4364_v25  ;;  %v4372_v22 = vld [vmem:[#allocation21_spill] sm:$0xff] }
 0x9d4   :  { %v1047_v27 = vmul.f32 0.5, %v1043_v24  ;;  %v1048_v28 = vmul.f32 %v1044_v26, %v3089_v50  ;;  %v4373_v24 = vld [vmem:[#allocation19_spill] sm:$0xff] }
 0x9d5   :  { %v4374_v25 = vsel %vm2944_vm1, %v4372_v22, %v4373_v24  ;;  %v3555_v22 = vld [vmem:[#allocation8 + $0x40] sm:$0xff]  ;;  %v3559_v24 = vld [vmem:[#allocation8 + $0x48] sm:$0xff] }
 0x9d6   :  { %2480 = vtanh.f32 %v1047_v27  ;;  %v4375_v27 = vld [vmem:[#allocation22_spill] sm:$0xff] }
 0x9d7   :  { %2482 = vtanh.f32 %v1048_v28  ;;  %v4376_v28 = vld [vmem:[#allocation20_spill] sm:$0xff] }
 0x9d9   :  { %v1017_v29 = vpop.f32.mrf.mxu2  ;;  %v1040_v1 = vpop.f32.mrf.mxu3 }
 0x9da   :  { %v1045_v48 = vadd.f32 %v1017_v29, %v4365_v3  ;;  %v1046_v7 = vadd.f32 %v1040_v1, %v4366_v8  ;;  %v4377_v29 = vsel %vm2948_vm2, %v4375_v27, %v4376_v28  ;;  %v3567_v27 = vld [vmem:[#allocation8 + $0x20] sm:$0xff]  ;;  %v3569_v28 = vld [vmem:[#allocation8 + $0x28] sm:$0xff] }
 0x9dc   :  { %v2481_v32 = vpop.eup %2480  ;;  %v1049_v2 = vmul.f32 0.5, %v1045_v48  ;;  %v1050_v4 = vmul.f32 %v1046_v7, %v3089_v50 }
 0x9dd   :  { %v2483_v30 = vpop.eup %2482  ;;  %v1055_v43 = vmul.f32 0.5, %v2481_v32 }
 0x9de   :  { %2484 = vtanh.f32 %v1049_v2  ;;  %v1056_v41 = vmul.f32 %v2483_v30, %v3089_v50 }
 0x9df   :  { %v1059_v59 = vadd.f32 0.5, %v1055_v43  ;;  %2486 = vtanh.f32 %v1050_v4 }
 0x9e0   :  { %v1060_v42 = vadd.f32 %v1056_v41, %v3141_v38  ;;  %v1227_v41 = vld [vmem:[#allocation7 + $0x70] sm:$0xff] }
 0x9e1   :  { %v1063_v35 = vmul.f32 %v1059_v59, %v971_v58  ;;  %v4371_v58 = vsel %vm2948_vm2, %v4369_v51, %v4370_v44  ;;  %1291 = vmatpush.msrb.mxu0 %v1227_v41 }
 0x9e2   :  { %v1065_v62 = vmul.f32 %v1060_v42, %v1059_v59  ;;  %v1228_v59 = vld [vmem:[#allocation7 + $0x78] sm:$0xff] }
 0x9e3   :  { %1356 = vmatpush.msrb.mxu1 %v1228_v59 }
 0x9e4   :  { %v2485_v60 = vpop.eup %2484  ;;  %1069 = vrot.lane.b32.xlu0 %v1065_v62, %s2731_s2  ;;  %v1226_v62 = vld [vmem:[#allocation7 + $0x68] sm:$0xff] }
 0x9e5   :  { %v2487_v14 = vpop.eup %2486  ;;  %v1057_v31 = vmul.f32 0.5, %v2485_v60  ;;  %v1223_v60 = vld [vmem:[#allocation7 + $0x50] sm:$0xff]  ;;  %1357 = vmatpush.msrb.mxu1 %v1226_v62 }
 0x9e6   :  { %v1058_v61 = vmul.f32 %v2487_v14, %v3089_v50  ;;  %v1224_v14 = vld [vmem:[#allocation7 + $0x58] sm:$0xff] }
 0x9e7   :  { %v1061_v23 = vadd.f32 0.5, %v1057_v31  ;;  %v1221_v31 = vld [vmem:[#allocation7 + $0x40] sm:$0xff]  ;;  %1358 = vmatpush.msrb.mxu1 %v1224_v14 }
 0x9e8   :  { %v1062_v34 = vadd.f32 %v1058_v61, %v3141_v38  ;;  %v1222_v61 = vld [vmem:[#allocation7 + $0x48] sm:$0xff] }
 0x9e9   :  { %v1064_v39 = vmul.f32 %v1061_v23, %v972_v17  ;;  %1359 = vmatpush.msrb.mxu1 %v1222_v61 }
 0x9ea   :  { %v1066_v36 = vmul.f32 %v1062_v34, %v1061_v23  ;;  %v1219_v23 = vld [vmem:[#allocation7 + $0x30] sm:$0xff] }
 0x9ec   :  { %1071 = vrot.lane.b32.xlu1 %v1066_v36, %s2731_s2  ;;  %v1217_v36 = vld [vmem:[#allocation7 + $0x20] sm:$0xff] }
 0xa56   :  { %v1070_v49 = vpop.permute.xlu0 %1069 }
 0xa57   :  { %v3469_v52 = vadd.f32 %v1070_v49, %v1063_v35  ;;  %v1218_v35 = vld [vmem:[#allocation7 + $0x28] sm:$0xff]  ;;  %v1215_v49 = vld [vmem:[#allocation7 + $0x10] sm:$0xff] }
 0xa59   :  { %2488 = vtanh.f32 %v3469_v52 }
 0xa5e   :  { %v1072_v9 = vpop.permute.xlu1 %1071 }
 0xa5f   :  { %v2489_v11 = vpop.eup %2488  ;;  %v3472_v47 = vadd.f32 %v1072_v9, %v1064_v39  ;;  %v1216_v39 = vld [vmem:[#allocation7 + $0x18] sm:$0xff]  ;;  %v1213_v9 = vld [vmem:[#allocation7] sm:$0xff] }
 0xa60   :  { %v1079_v6 = vmul.f32 %v2489_v11, %v1060_v42  ;;  %v1225_v42 = vld [vmem:[#allocation7 + $0x60] sm:$0xff]  ;;  %v1214_v11 = vld [vmem:[#allocation7 + $0x8] sm:$0xff] }
 0xa61   :  { %2490 = vtanh.f32 %v3472_v47  ;;  %1292 = vmatpush.msrb.mxu0 %v1225_v42 }
 0xa62   :  { %1083 = vrot.lane.b32.xlu2 %v1079_v6, %s2731_s2 }
 0xa63   :  { %1293 = vmatpush.msrb.mxu0 %v1223_v60 }
 0xa65   :  { %1294 = vmatpush.msrb.mxu0 %v1221_v31 }
 0xa67   :  { %v2491_v46 = vpop.eup %2490  ;;  %1295 = vmatpush.msrb.mxu0 %v1219_v23 }
 0xa68   :  { %v1080_v56 = vmul.f32 %v2491_v46, %v1062_v34  ;;  %v1220_v34 = vld [vmem:[#allocation7 + $0x38] sm:$0xff] }
 0xa69   :  { %1360 = vmatpush.msrb.mxu1 %v1220_v34  ;;  %1296 = vmatpush.msrb.mxu0 %v1217_v36 }
 0xa6a   :  { %1085 = vrot.lane.b32.xlu0 %v1080_v56, %s2731_s2 }
 0xa6b   :  { %1361 = vmatpush.msrb.mxu1 %v1218_v35  ;;  %1297 = vmatpush.msrb.mxu0 %v1215_v49 }
 0xa6d   :  { %1362 = vmatpush.msrb.mxu1 %v1216_v39  ;;  %1298 = vmatpush.msrb.mxu0 %v1213_v9 }
 0xa6f   :  { %1363 = vmatpush.msrb.mxu1 %v1214_v11 }
 0xabc   :  { %v1084_v37 = vpop.permute.xlu2 %1083 }
 0xabd   :  { %1089 = vst.msk [vmem:[#allocation2 + $0x60] sm:$0xff] %vm456_vm4, %v1084_v37  ;;  %2322 = vmatmul.msk.f32.vlgmr.msrb.gmra.mxu2 %vm360_vm5, %v1084_v37  ;;  %2324 = vmatmul.msk.f32.vlgmr.msrb.gmra.mxu3 %vm360_vm5, %v1084_v37 }
 0xabe   :  { %1091 = vst.msk [vmem:[#allocation2 + $0x10] sm:$0xff] %vm460_vm6, %v1084_v37 }
 0xadc   :  { %v1086_v53 = vpop.permute.xlu0 %1085 }
 0xadd   :  { %1090 = vst.msk [vmem:[#allocation2 + $0x68] sm:$0xff] %vm456_vm4, %v1086_v53  ;;  %2323 = vmatmul.msk.f32.gmra.mxu2 %vm360_vm5, %v1086_v53  ;;  %2325 = vmatmul.msk.f32.gmra.mxu3 %vm360_vm5, %v1086_v53 }
 0xade   :  { %1092 = vst.msk [vmem:[#allocation2 + $0x18] sm:$0xff] %vm460_vm6, %v1086_v53 }
 0xb40   :  { %v1118_v54 = vpop.f32.mrf.mxu2  ;;  %v1141_v57 = vpop.f32.mrf.mxu3 }
 0xb41   :  { %v1147_v5 = vadd.f32 %v1118_v54, %v4368_v55  ;;  %v1148_v12 = vadd.f32 %v1141_v57, %v4371_v58  ;;  %v1199_v58 = vld [vmem:[#allocation2 + $0x10] sm:$0xff] }
 0xb43   :  { %v1151_v13 = vmul.f32 0.5, %v1147_v5  ;;  %v1152_v15 = vmul.f32 %v1148_v12, %v3089_v50  ;;  %v1200_v12 = vld [vmem:[#allocation2 + $0x18] sm:$0xff] }
 0xb45   :  { %2492 = vtanh.f32 %v1151_v13  ;;  %v1201_v13 = vld [vmem:[#allocation2 + $0x20] sm:$0xff] }
 0xb46   :  { %2494 = vtanh.f32 %v1152_v15  ;;  %v1202_v15 = vld [vmem:[#allocation2 + $0x28] sm:$0xff] }
 0xb4b   :  { %v2493_v16 = vpop.eup %2492 }
 0xb4c   :  { %v2495_v17 = vpop.eup %2494  ;;  %v1159_v18 = vmul.f32 0.5, %v2493_v16  ;;  %v1203_v16 = vld [vmem:[#allocation2 + $0x30] sm:$0xff] }
 0xb4d   :  { %v1160_v19 = vmul.f32 %v2495_v17, %v3089_v50  ;;  %v1204_v17 = vld [vmem:[#allocation2 + $0x38] sm:$0xff] }
 0xb4e   :  { %v1163_v20 = vadd.f32 0.5, %v1159_v18  ;;  %v3537_v18 = vld [vmem:[#allocation8 + $0x70] sm:$0xff] }
 0xb4f   :  { %v1164_v33 = vadd.f32 %v1160_v19, %v3141_v38  ;;  %v3539_v19 = vld [vmem:[#allocation8 + $0x78] sm:$0xff]  ;;  %1441 = vmatpush.msra.mxu2 %v3537_v18 }
 0xb50   :  { %v1167_v6 = vmul.f32 %v1163_v20, %v3469_v52  ;;  %1464 = vmatpush.msra.mxu3 %v3539_v19 }
 0xb51   :  { %v1169_v10 = vmul.f32 %v1164_v33, %v1163_v20  ;;  %v3541_v20 = vld [vmem:[#allocation8 + $0x60] sm:$0xff] }
 0xb52   :  { %1442 = vmatpush.msra.mxu2 %v3541_v20 }
 0xb53   :  { %1173 = vrot.lane.b32.xlu1 %v1169_v10, %s2731_s2  ;;  %v1205_v10 = vld [vmem:[#allocation2 + $0x40] sm:$0xff] }
 0xb60   :  { %v1121_v45 = vpop.f32.mrf.mxu2  ;;  %v1144_v21 = vpop.f32.mrf.mxu3 }
 0xb61   :  { %v1149_v26 = vadd.f32 %v1121_v45, %v4374_v25  ;;  %v1150_v1 = vadd.f32 %v1144_v21, %v4377_v29  ;;  %v3551_v45 = vld [vmem:[#allocation8 + $0x50] sm:$0xff]  ;;  %v3553_v21 = vld [vmem:[#allocation8 + $0x58] sm:$0xff]  ;;  %v1206_v29 = vld [vmem:[#allocation2 + $0x48] sm:$0xff] }
 0xb62   :  { %1443 = vmatpush.msra.mxu2 %v3551_v45  ;;  %v3561_v25 = vld [vmem:[#allocation8 + $0x30] sm:$0xff] }
 0xb63   :  { %v1153_v3 = vmul.f32 0.5, %v1149_v26  ;;  %v1154_v48 = vmul.f32 %v1150_v1, %v3089_v50  ;;  %v3563_v26 = vld [vmem:[#allocation8 + $0x38] sm:$0xff]  ;;  %v3577_v1 = vld [vmem:[#allocation8 + $0x10] sm:$0xff] }
 0xb64   :  { %1444 = vmatpush.msra.mxu2 %v3555_v22 }
 0xb65   :  { %2496 = vtanh.f32 %v1153_v3  ;;  %v3579_v3 = vld [vmem:[#allocation8 + $0x18] sm:$0xff] }
 0xb66   :  { %2498 = vtanh.f32 %v1154_v48  ;;  %1445 = vmatpush.msra.mxu2 %v3561_v25  ;;  %v3581_v48 = vld [vmem:[#allocation8] sm:$0xff] }
 0xb68   :  { %1446 = vmatpush.msra.mxu2 %v3567_v27 }
 0xb6a   :  { %1447 = vmatpush.msra.mxu2 %v3577_v1 }
 0xb6b   :  { %v2497_v8 = vpop.eup %2496 }
 0xb6c   :  { %v2499_v7 = vpop.eup %2498  ;;  %v1161_v32 = vmul.f32 0.5, %v2497_v8  ;;  %v3585_v8 = vld [vmem:[#allocation8 + $0x8] sm:$0xff]  ;;  %1448 = vmatpush.msra.mxu2 %v3581_v48 }
 0xb6d   :  { %v1162_v2 = vmul.f32 %v2499_v7, %v3089_v50  ;;  %v4378_v7 = vmov 0.0  }
 0xb6e   :  { %v1165_v4 = vadd.f32 0.5, %v1161_v32  ;;  %1449 = vmatmul.f32.vlgmr.msra.gmra.mxu2 %v4378_v7  ;;  %v1207_v32 = vld [vmem:[#allocation2 + $0x50] sm:$0xff] }
 0xb6f   :  { %v1166_v30 = vadd.f32 %v1162_v2, %v3141_v38  ;;  %1539 = vmatpush.msrb.mxu2 %v3537_v18  ;;  %v1208_v2 = vld [vmem:[#allocation2 + $0x58] sm:$0xff] }
 0xb70   :  { %v1168_v37 = vmul.f32 %v1165_v4, %v3472_v47 }
 0xb71   :  { %v1170_v43 = vmul.f32 %v1166_v30, %v1165_v4  ;;  %1540 = vmatpush.msrb.mxu2 %v3541_v20  ;;  %v1209_v4 = vld [vmem:[#allocation2 + $0x60] sm:$0xff] }
 0xb73   :  { %1175 = vrot.lane.b32.xlu2 %v1170_v43, %s2731_s2  ;;  %1541 = vmatpush.msrb.mxu2 %v3551_v45 }
 0xb75   :  { %1542 = vmatpush.msrb.mxu2 %v3555_v22 }
 0xb76   :  { %1452 = vmatmul.f32.gmra.mxu2 %v4378_v7 }
 0xb77   :  { %1543 = vmatpush.msrb.mxu2 %v3561_v25 }
 0xb79   :  { %1544 = vmatpush.msrb.mxu2 %v3567_v27 }
 0xb7b   :  { %1545 = vmatpush.msrb.mxu2 %v3577_v1 }
 0xb7d   :  { %1546 = vmatpush.msrb.mxu2 %v3581_v48 }
 0xb7f   :  { %1637 = vmatpush.msra.mxu2 %v3537_v18 }
 0xb81   :  { %1638 = vmatpush.msra.mxu2 %v3541_v20 }
 0xb83   :  { %1639 = vmatpush.msra.mxu2 %v3551_v45 }
 0xb85   :  { %1640 = vmatpush.msra.mxu2 %v3555_v22 }
 0xb87   :  { %1641 = vmatpush.msra.mxu2 %v3561_v25 }
 0xb89   :  { %1642 = vmatpush.msra.mxu2 %v3567_v27 }
 0xb8b   :  { %1643 = vmatpush.msra.mxu2 %v3577_v1 }
 0xb8d   :  { %1644 = vmatpush.msra.mxu2 %v3581_v48 }
 0xbc5   :  { %v1174_v46 = vpop.permute.xlu1 %1173 }
 0xbc6   :  { %v1179_v56 = vadd.f32 %v1174_v46, %v1167_v6  ;;  %v1229_v46 = vld [vmem:[%s4310_s5] sm:$0x3] }
 0xbc8   :  { %2500 = vtanh.f32 %v1179_v56  ;;  %v3652_v56 = vperm.slane %v1229_v46, 0 }
 0xbcd   :  { %v1176_v53 = vpop.permute.xlu2 %1175 }
 0xbce   :  { %v2501_v54 = vpop.eup %2500  ;;  %v1180_v57 = vadd.f32 %v1176_v53, %v1168_v37  ;;  %v3654_v37 = vperm.slane %v1229_v46, 1 }
 0xbcf   :  { %v1183_v40 = vmul.f32 %v2501_v54, %v1164_v33  ;;  %v3545_v33 = vld [vmem:[#allocation8 + $0x68] sm:$0xff] }
 0xbd0   :  { %2502 = vtanh.f32 %v1180_v57  ;;  %1465 = vmatpush.msra.mxu3 %v3545_v33 }
 0xbd1   :  { %1187 = vrot.lane.b32.xlu0 %v1183_v40, %s2731_s2 }
 0xbd2   :  { %1466 = vmatpush.msra.mxu3 %v3553_v21 }
 0xbd4   :  { %1467 = vmatpush.msra.mxu3 %v3559_v24 }
 0xbd6   :  { %v2503_v55 = vpop.eup %2502  ;;  %1468 = vmatpush.msra.mxu3 %v3563_v26 }
 0xbd7   :  { %v1184_v5 = vmul.f32 %v2503_v55, %v1166_v30  ;;  %v1210_v30 = vld [vmem:[#allocation2 + $0x68] sm:$0xff] }
 0xbd8   :  { %1469 = vmatpush.msra.mxu3 %v3569_v28 }
 0xbd9   :  { %1189 = vrot.lane.b32.xlu1 %v1184_v5, %s2731_s2 }
 0xbda   :  { %1470 = vmatpush.msra.mxu3 %v3579_v3 }
 0xbdc   :  { %1471 = vmatpush.msra.mxu3 %v3585_v8 }
 0xbdd   :  { %1472 = vmatmul.f32.vlgmr.msra.gmra.mxu3 %v4378_v7 }
 0xbde   :  { %1562 = vmatpush.msrb.mxu3 %v3539_v19 }
 0xbe0   :  { %1563 = vmatpush.msrb.mxu3 %v3545_v33 }
 0xbe2   :  { %1564 = vmatpush.msrb.mxu3 %v3553_v21 }
 0xbe4   :  { %1565 = vmatpush.msrb.mxu3 %v3559_v24 }
 0xbe5   :  { %1475 = vmatmul.f32.gmra.mxu3 %v4378_v7 }
 0xbe6   :  { %1566 = vmatpush.msrb.mxu3 %v3563_v26 }
 0xbe8   :  { %1567 = vmatpush.msrb.mxu3 %v3569_v28 }
 0xbea   :  { %1568 = vmatpush.msrb.mxu3 %v3579_v3 }
 0xbec   :  { %1569 = vmatpush.msrb.mxu3 %v3585_v8 }
 0xbee   :  { %1660 = vmatpush.msra.mxu3 %v3539_v19 }
 0xbf0   :  { %1661 = vmatpush.msra.mxu3 %v3545_v33 }
 0xbf2   :  { %1662 = vmatpush.msra.mxu3 %v3553_v21 }
 0xbf4   :  { %1663 = vmatpush.msra.mxu3 %v3559_v24 }
 0xbf6   :  { %1664 = vmatpush.msra.mxu3 %v3563_v26 }
 0xbf8   :  { %1665 = vmatpush.msra.mxu3 %v3569_v28 }
 0xbfa   :  { %1666 = vmatpush.msra.mxu3 %v3579_v3 }
 0xbfc   :  { %1667 = vmatpush.msra.mxu3 %v3585_v8 }
 0xc43   :  { %v1188_v52 = vpop.permute.xlu0 %1187 }
 0xc44   :  { %1193 = vst.msk [vmem:[#allocation2 + $0x70] sm:$0xff] %vm456_vm4, %v1188_v52 }
 0xc45   :  { %1195 = vst.msk [vmem:[#allocation2] sm:$0xff] %vm460_vm6, %v1188_v52 }
 0xc4b   :  { %v1190_v51 = vpop.permute.xlu1 %1189  ;;  %v1211_v43 = vld [vmem:[#allocation2 + $0x70] sm:$0xff] }
 0xc4c   :  { %1194 = vst.msk [vmem:[#allocation2 + $0x78] sm:$0xff] %vm456_vm4, %v1190_v51  ;;  %v1197_v47 = vld [vmem:[#allocation2] sm:$0xff] }
 0xc4d   :  { %1196 = vst.msk [vmem:[#allocation2 + $0x8] sm:$0xff] %vm460_vm6, %v1190_v51  ;;  %2326 = vmatmul.msk.f32.vlgmr.msrb.gmra.mxu0 %vm360_vm5, %v1197_v47  ;;  %2342 = vmatmul.msk.f32.vlgmr.msrb.gmra.mxu1 %vm360_vm5, %v1197_v47 }
 0xc53   :  { %v1212_v41 = vld [vmem:[#allocation2 + $0x78] sm:$0xff] }
 0xc54   :  { %v1198_v44 = vld [vmem:[#allocation2 + $0x8] sm:$0xff] }
 0xc55   :  { %2327 = vmatmul.msk.f32.gmra.mxu0 %vm360_vm5, %v1198_v44  ;;  %2343 = vmatmul.msk.f32.gmra.mxu1 %vm360_vm5, %v1198_v44 }
 0xc5d   :  { %2328 = vmatmul.msk.f32.gmra.mxu0 %vm360_vm5, %v1199_v58  ;;  %2344 = vmatmul.msk.f32.gmra.mxu1 %vm360_vm5, %v1199_v58 }
 0xc65   :  { %2329 = vmatmul.msk.f32.gmra.mxu0 %vm360_vm5, %v1200_v12  ;;  %2345 = vmatmul.msk.f32.gmra.mxu1 %vm360_vm5, %v1200_v12 }
 0xc6d   :  { %2330 = vmatmul.msk.f32.gmra.mxu0 %vm360_vm5, %v1201_v13  ;;  %2346 = vmatmul.msk.f32.gmra.mxu1 %vm360_vm5, %v1201_v13 }
 0xc75   :  { %2331 = vmatmul.msk.f32.gmra.mxu0 %vm360_vm5, %v1202_v15  ;;  %2347 = vmatmul.msk.f32.gmra.mxu1 %vm360_vm5, %v1202_v15 }
 0xc7d   :  { %2332 = vmatmul.msk.f32.gmra.mxu0 %vm360_vm5, %v1203_v16  ;;  %2348 = vmatmul.msk.f32.gmra.mxu1 %vm360_vm5, %v1203_v16 }
 0xc85   :  { %2333 = vmatmul.msk.f32.gmra.mxu0 %vm360_vm5, %v1204_v17  ;;  %2349 = vmatmul.msk.f32.gmra.mxu1 %vm360_vm5, %v1204_v17 }
 0xc8d   :  { %2334 = vmatmul.msk.f32.gmra.mxu0 %vm360_vm5, %v1205_v10  ;;  %2350 = vmatmul.msk.f32.gmra.mxu1 %vm360_vm5, %v1205_v10  ;;  %v1473_v10 = vpop.f32.mrf.mxu3 }
 0xc95   :  { %2335 = vmatmul.msk.f32.gmra.mxu0 %vm360_vm5, %v1206_v29  ;;  %2351 = vmatmul.msk.f32.gmra.mxu1 %vm360_vm5, %v1206_v29 }
 0xc9d   :  { %2336 = vmatmul.msk.f32.gmra.mxu0 %vm360_vm5, %v1207_v32  ;;  %2352 = vmatmul.msk.f32.gmra.mxu1 %vm360_vm5, %v1207_v32 }
 0xca5   :  { %2337 = vmatmul.msk.f32.gmra.mxu0 %vm360_vm5, %v1208_v2  ;;  %2353 = vmatmul.msk.f32.gmra.mxu1 %vm360_vm5, %v1208_v2 }
 0xcad   :  { %2338 = vmatmul.msk.f32.gmra.mxu0 %vm360_vm5, %v1209_v4  ;;  %2354 = vmatmul.msk.f32.gmra.mxu1 %vm360_vm5, %v1209_v4 }
 0xcb5   :  { %2339 = vmatmul.msk.f32.gmra.mxu0 %vm360_vm5, %v1210_v30  ;;  %2355 = vmatmul.msk.f32.gmra.mxu1 %vm360_vm5, %v1210_v30 }
 0xcbd   :  { %2340 = vmatmul.msk.f32.gmra.mxu0 %vm360_vm5, %v1211_v43  ;;  %2356 = vmatmul.msk.f32.gmra.mxu1 %vm360_vm5, %v1211_v43 }
 0xcc5   :  { %2341 = vmatmul.msk.f32.gmra.mxu0 %vm360_vm5, %v1212_v41  ;;  %2357 = vmatmul.msk.f32.gmra.mxu1 %vm360_vm5, %v1212_v41 }
 0xcca   :  { %v3637_v59 = vpop.f32.mrf.mxu0  ;;  %v3639_v42 = vpop.f32.mrf.mxu1 }
 0xcd2   :  { %v3641_v62 = vpop.f32.mrf.mxu0  ;;  %v3643_v60 = vpop.f32.mrf.mxu1 }
 0xcda   :  { %v1306_v14 = vpop.f32.mrf.mxu0  ;;  %v1371_v31 = vpop.f32.mrf.mxu1 }
 0xce2   :  { %v3645_v61 = vpop.f32.mrf.mxu0  ;;  %v3647_v23 = vpop.f32.mrf.mxu1 }
 0xce3   :  { %v3798_v44 = vadd.f32 %v3645_v61, %v3652_v56  ;;  %v3802_v47 = vadd.f32 %v3647_v23, %v3654_v37 }
 0xcea   :  { %v1312_v34 = vpop.f32.mrf.mxu0  ;;  %v1377_v36 = vpop.f32.mrf.mxu1 }
 0xceb   :  { %v3713_v30 = vadd.f32 %v1312_v34, %v3652_v56  ;;  %v3716_v43 = vadd.f32 %v1377_v36, %v3654_v37  ;;  %v3772_v36 = vadd.f32 %v1371_v31, %v3654_v37 }
 0xcf2   :  { %v1315_v35 = vpop.f32.mrf.mxu0  ;;  %v1380_v49 = vpop.f32.mrf.mxu1 }
 0xcfa   :  { %v1318_v39 = vpop.f32.mrf.mxu0  ;;  %v1383_v9 = vpop.f32.mrf.mxu1 }
 0xcfb   :  { %v3657_v57 = vadd.f32 %v1318_v39, %v3652_v56  ;;  %v3660_v40 = vadd.f32 %v1383_v9, %v3654_v37 }
 0xd02   :  { %v1321_v11 = vpop.f32.mrf.mxu0  ;;  %v1386_v6 = vpop.f32.mrf.mxu1 }
 0xd03   :  { %v3685_v13 = vadd.f32 %v1321_v11, %v3652_v56  ;;  %v3688_v15 = vadd.f32 %v1386_v6, %v3654_v37  ;;  %v3769_v11 = vadd.f32 %v1306_v14, %v3652_v56  ;;  %v3859_v14 = vadd.f32 %v3641_v62, %v3652_v56 }
 0xd05   :  { %4382 = vst [vmem:[#allocation18_spill] sm:$0xff] %v3859_v14 }
 0xd0a   :  { %v1324_v53 = vpop.f32.mrf.mxu0  ;;  %v1389_v54 = vpop.f32.mrf.mxu1 }
 0xd0b   :  { %v3663_v55 = vadd.f32 %v1324_v53, %v3652_v56  ;;  %v3666_v5 = vadd.f32 %v1389_v54, %v3654_v37  ;;  %v3741_v53 = vadd.f32 %v1315_v35, %v3652_v56  ;;  %v3744_v54 = vadd.f32 %v1380_v49, %v3654_v37 }
 0xd0c   :  { %v3828_v35 = vadd.f32 %v3637_v59, %v3652_v56 }
 0xd0e   :  { %4380 = vst [vmem:[#allocation14_spill] sm:$0xff] %v3828_v35 }
 0xd12   :  { %v1327_v58 = vpop.f32.mrf.mxu0  ;;  %v1392_v12 = vpop.f32.mrf.mxu1 }
 0xd13   :  { %v3691_v16 = vadd.f32 %v1327_v58, %v3652_v56  ;;  %v3694_v17 = vadd.f32 %v1392_v12, %v3654_v37 }
 0xd15   :  { %4379 = vst [vmem:[#allocation15_spill] sm:$0xff] %v3694_v17 }
 0xd1a   :  { %v1330_v2 = vpop.f32.mrf.mxu0  ;;  %v1395_v4 = vpop.f32.mrf.mxu1 }
 0xd1b   :  { %v3719_v41 = vadd.f32 %v1330_v2, %v3652_v56  ;;  %v3722_v39 = vadd.f32 %v1395_v4, %v3654_v37  ;;  %v3832_v2 = vadd.f32 %v3639_v42, %v3654_v37  ;;  %v3863_v42 = vadd.f32 %v3643_v60, %v3654_v37 }
 0xd1d   :  { %4381 = vst [vmem:[#allocation16_spill] sm:$0xff] %v3832_v2 }
 0xd1e   :  { %4383 = vst [vmem:[#allocation17_spill] sm:$0xff] %v3863_v42 }
 0xd22   :  { %v1333_v6 = vpop.f32.mrf.mxu0  ;;  %v1398_v46 = vpop.f32.mrf.mxu1 }
 0xd23   :  { %v3747_v58 = vadd.f32 %v1333_v6, %v3652_v56  ;;  %v3750_v12 = vadd.f32 %v1398_v46, %v3654_v37 }
 0xd2a   :  { %v1336_v6 = vpop.f32.mrf.mxu0  ;;  %v1401_v46 = vpop.f32.mrf.mxu1 }
 0xd2b   :  { %v3775_v32 = vadd.f32 %v1336_v6, %v3652_v56  ;;  %v3778_v7 = vadd.f32 %v1401_v46, %v3654_v37 }
 0xd32   :  { %v1339_v46 = vpop.f32.mrf.mxu0  ;;  %v1404_v4 = vpop.f32.mrf.mxu1 }
 0xd33   :  { %v3805_v29 = vadd.f32 %v1339_v46, %v3652_v56  ;;  %v3808_v31 = vadd.f32 %v1404_v4, %v3654_v37  ;;  %v1450_v46 = vpop.f32.mrf.mxu2 }
 0xd3a   :  { %v1342_v51 = vpop.f32.mrf.mxu0  ;;  %v1407_v52 = vpop.f32.mrf.mxu1 }
 0xd3b   :  { %v3835_v34 = vadd.f32 %v1342_v51, %v3652_v56  ;;  %v3838_v23 = vadd.f32 %v1407_v52, %v3654_v37 }
 0xd3d   :  { %v1429_v4 = vsel %vm2944_vm1, %v3828_v35, %v3835_v34  ;;  %v1430_v59 = vsel %vm2948_vm2, %v3832_v2, %v3838_v23 }
 0xd3e   :  { %v1479_v51 = vadd.f32 %v1450_v46, %v1429_v4  ;;  %v1480_v9 = vadd.f32 %v1473_v10, %v1430_v59  ;;  %v1453_v4 = vpop.f32.mrf.mxu2 }
 0xd40   :  { %v1483_v61 = vmul.f32 0.5, %v1479_v51  ;;  %v1484_v6 = vmul.f32 %v1480_v9, %v3089_v50  ;;  %v1476_v9 = vpop.f32.mrf.mxu3 }
 0xd42   :  { %2504 = vtanh.f32 %v1483_v61  ;;  %v1345_v49 = vpop.f32.mrf.mxu0  ;;  %v1410_v17 = vpop.f32.mrf.mxu1 }
 0xd43   :  { %2506 = vtanh.f32 %v1484_v6  ;;  %v3866_v35 = vadd.f32 %v1345_v49, %v3652_v56  ;;  %v3869_v10 = vadd.f32 %v1410_v17, %v3654_v37 }
 0xd45   :  { %4384 = vst [vmem:[#allocation21_spill] sm:$0xff] %v3866_v35  ;;  %v1431_v62 = vsel %vm2944_vm1, %v3859_v14, %v3866_v35  ;;  %v1432_v60 = vsel %vm2948_vm2, %v3863_v42, %v3869_v10 }
 0xd46   :  { %4385 = vst [vmem:[#allocation19_spill] sm:$0xff] %v3869_v10  ;;  %v1481_v17 = vadd.f32 %v1453_v4, %v1431_v62  ;;  %v1482_v49 = vadd.f32 %v1476_v9, %v1432_v60 }
 0xd48   :  { %v2505_v6 = vpop.eup %2504  ;;  %v1485_v61 = vmul.f32 0.5, %v1481_v17  ;;  %v1486_v46 = vmul.f32 %v1482_v49, %v3089_v50 }
 0xd49   :  { %v2507_v59 = vpop.eup %2506  ;;  %v1491_v51 = vmul.f32 0.5, %v2505_v6 }
 0xd4a   :  { %2508 = vtanh.f32 %v1485_v61  ;;  %v1492_v52 = vmul.f32 %v2507_v59, %v3089_v50 }
 0xd4b   :  { %v1495_v2 = vadd.f32 0.5, %v1491_v51  ;;  %2510 = vtanh.f32 %v1486_v46 }
 0xd4c   :  { %v1496_v56 = vadd.f32 %v1492_v52, %v3141_v38 }
 0xd4d   :  { %v1499_v49 = vmul.f32 0.0, %v1495_v2 }
 0xd4e   :  { %v1501_v14 = vmul.f32 %v1496_v56, %v1495_v2 }
 0xd50   :  { %v2509_v35 = vpop.eup %2508  ;;  %1505 = vrot.lane.b32.xlu2 %v1501_v14, %s2731_s2 }
 0xd51   :  { %v2511_v37 = vpop.eup %2510  ;;  %v1493_v4 = vmul.f32 0.5, %v2509_v35 }
 0xd52   :  { %v1494_v9 = vmul.f32 %v2511_v37, %v3089_v50 }
 0xd53   :  { %v1497_v62 = vadd.f32 0.5, %v1493_v4 }
 0xd54   :  { %v1498_v60 = vadd.f32 %v1494_v9, %v3141_v38 }
 0xd55   :  { %v1500_v14 = vmul.f32 0.0, %v1497_v62 }
 0xd56   :  { %v1502_v17 = vmul.f32 %v1498_v60, %v1497_v62  ;;  %v4388_v62 = vsel %vm2944_vm1, %v3769_v11, %v3775_v32 }
 0xd58   :  { %1507 = vrot.lane.b32.xlu0 %v1502_v17, %s2731_s2  ;;  %v4389_v17 = vsel %vm2948_vm2, %v3772_v36, %v3778_v7 }
 0xdaa   :  { %v1506_v6 = vpop.permute.xlu2 %1505 }
 0xdab   :  { %v3894_v61 = vadd.f32 %v1506_v6, %v1499_v49 }
 0xdad   :  { %2512 = vtanh.f32 %v3894_v61 }
 0xdb3   :  { %v2513_v52 = vpop.eup %2512 }
 0xdb4   :  { %v1515_v46 = vmul.f32 %v2513_v52, %v1496_v56 }
 0xdb6   :  { %1523 = vrot.lane.b32.xlu1 %v1515_v46, %s2731_s2 }
 0xdca   :  { %v1508_v35 = vpop.permute.xlu0 %1507 }
 0xdcb   :  { %v3898_v59 = vadd.f32 %v1508_v35, %v1500_v14  ;;  %v4390_v35 = vsel %vm2944_vm1, %v3798_v44, %v3805_v29 }
 0xdcd   :  { %2514 = vtanh.f32 %v3898_v59 }
 0xdd3   :  { %v2515_v37 = vpop.eup %2514 }
 0xdd4   :  { %v1516_v51 = vmul.f32 %v2515_v37, %v1498_v60 }
 0xdd6   :  { %1525 = vrot.lane.b32.xlu2 %v1516_v51, %s2731_s2  ;;  %v4391_v51 = vsel %vm2948_vm2, %v3802_v47, %v3808_v31 }
 0xe28   :  { %v3902_v2 = vpop.permute.xlu1 %1523 }
 0xe29   :  { %4386 = vst [vmem:[#allocation22_spill] sm:$0xff] %v3902_v2  ;;  %2358 = vmatmul.msk.f32.vlgmr.msrb.gmra.mxu2 %vm360_vm5, %v3902_v2  ;;  %2360 = vmatmul.msk.f32.vlgmr.msrb.gmra.mxu3 %vm360_vm5, %v3902_v2 }
 0xe2a   :  { %1735 = vmatpush.msrb.mxu2 %v3537_v18  ;;  %1758 = vmatpush.msrb.mxu3 %v3539_v19 }
 0xe2c   :  { %1736 = vmatpush.msrb.mxu2 %v3541_v20  ;;  %1759 = vmatpush.msrb.mxu3 %v3545_v33 }
 0xe2e   :  { %1737 = vmatpush.msrb.mxu2 %v3551_v45  ;;  %1760 = vmatpush.msrb.mxu3 %v3553_v21 }
 0xe30   :  { %v3914_v56 = vpop.permute.xlu2 %1525  ;;  %1738 = vmatpush.msrb.mxu2 %v3555_v22  ;;  %1761 = vmatpush.msrb.mxu3 %v3559_v24 }
 0xe31   :  { %4387 = vst [vmem:[#allocation20_spill] sm:$0xff] %v3914_v56  ;;  %2359 = vmatmul.msk.f32.gmra.mxu2 %vm360_vm5, %v3914_v56  ;;  %2361 = vmatmul.msk.f32.gmra.mxu3 %vm360_vm5, %v3914_v56 }
 0xe32   :  { %1739 = vmatpush.msrb.mxu2 %v3561_v25  ;;  %1762 = vmatpush.msrb.mxu3 %v3563_v26 }
 0xe34   :  { %1740 = vmatpush.msrb.mxu2 %v3567_v27  ;;  %1763 = vmatpush.msrb.mxu3 %v3569_v28 }
 0xe36   :  { %1741 = vmatpush.msrb.mxu2 %v3577_v1  ;;  %1764 = vmatpush.msrb.mxu3 %v3579_v3 }
 0xe38   :  { %1742 = vmatpush.msrb.mxu2 %v3581_v48  ;;  %1765 = vmatpush.msrb.mxu3 %v3585_v8 }
 0xeac   :  { %v1548_v4 = vpop.f32.mrf.mxu2  ;;  %v1571_v9 = vpop.f32.mrf.mxu3 }
 0xead   :  { %v1577_v60 = vadd.f32 %v1548_v4, %v4388_v62  ;;  %v1578_v49 = vadd.f32 %v1571_v9, %v4389_v17 }
 0xeaf   :  { %v1581_v6 = vmul.f32 0.5, %v1577_v60  ;;  %v1582_v52 = vmul.f32 %v1578_v49, %v3089_v50 }
 0xeb1   :  { %2516 = vtanh.f32 %v1581_v6 }
 0xeb2   :  { %2518 = vtanh.f32 %v1582_v52 }
 0xeb4   :  { %v1551_v46 = vpop.f32.mrf.mxu2  ;;  %v1574_v14 = vpop.f32.mrf.mxu3 }
 0xeb5   :  { %v1579_v37 = vadd.f32 %v1551_v46, %v4390_v35  ;;  %v1580_v4 = vadd.f32 %v1574_v14, %v4391_v51 }
 0xeb7   :  { %v2517_v9 = vpop.eup %2516  ;;  %v1583_v62 = vmul.f32 0.5, %v1579_v37  ;;  %v1584_v60 = vmul.f32 %v1580_v4, %v3089_v50 }
 0xeb8   :  { %v2519_v17 = vpop.eup %2518  ;;  %v1589_v49 = vmul.f32 0.5, %v2517_v9 }
 0xeb9   :  { %2520 = vtanh.f32 %v1583_v62  ;;  %v1590_v6 = vmul.f32 %v2519_v17, %v3089_v50 }
 0xeba   :  { %v1593_v52 = vadd.f32 0.5, %v1589_v49  ;;  %2522 = vtanh.f32 %v1584_v60 }
 0xebb   :  { %v1594_v56 = vadd.f32 %v1590_v6, %v3141_v38 }
 0xebc   :  { %v1597_v9 = vmul.f32 %v1593_v52, %v3894_v61 }
 0xebd   :  { %v1599_v46 = vmul.f32 %v1594_v56, %v1593_v52 }
 0xebf   :  { %v2521_v35 = vpop.eup %2520  ;;  %1603 = vrot.lane.b32.xlu0 %v1599_v46, %s2731_s2 }
 0xec0   :  { %v2523_v2 = vpop.eup %2522  ;;  %v1591_v42 = vmul.f32 0.5, %v2521_v35 }
 0xec1   :  { %v1592_v14 = vmul.f32 %v2523_v2, %v3089_v50 }
 0xec2   :  { %v1595_v37 = vadd.f32 0.5, %v1591_v42 }
 0xec3   :  { %v1596_v51 = vadd.f32 %v1592_v14, %v3141_v38  ;;  %v4392_v14 = vsel %vm2944_vm1, %v3713_v30, %v3719_v41 }
 0xec4   :  { %v1598_v17 = vmul.f32 %v1595_v37, %v3898_v59 }
 0xec5   :  { %v1600_v4 = vmul.f32 %v1596_v51, %v1595_v37 }
 0xec7   :  { %1605 = vrot.lane.b32.xlu1 %v1600_v4, %s2731_s2 }
 0xf31   :  { %v1604_v62 = vpop.permute.xlu0 %1603 }
 0xf32   :  { %v3959_v60 = vadd.f32 %v1604_v62, %v1597_v9 }
 0xf34   :  { %2524 = vtanh.f32 %v3959_v60 }
 0xf39   :  { %v1606_v49 = vpop.permute.xlu1 %1605 }
 0xf3a   :  { %v2525_v6 = vpop.eup %2524  ;;  %v3963_v46 = vadd.f32 %v1606_v49, %v1598_v17 }
 0xf3b   :  { %v1613_v2 = vmul.f32 %v2525_v6, %v1594_v56 }
 0xf3c   :  { %2526 = vtanh.f32 %v3963_v46 }
 0xf3d   :  { %1621 = vrot.lane.b32.xlu2 %v1613_v2, %s2731_s2 }
 0xf42   :  { %v2527_v42 = vpop.eup %2526 }
 0xf43   :  { %v1614_v35 = vmul.f32 %v2527_v42, %v1596_v51  ;;  %v4393_v51 = vsel %vm2948_vm2, %v3716_v43, %v3722_v39 }
 0xf45   :  { %1623 = vrot.lane.b32.xlu0 %v1614_v35, %s2731_s2 }
 0xf97   :  { %v1622_v61 = vpop.permute.xlu2 %1621 }
 0xf98   :  { %2362 = vmatmul.msk.f32.vlgmr.msra.gmra.mxu2 %vm360_vm5, %v1622_v61  ;;  %2364 = vmatmul.msk.f32.vlgmr.msra.gmra.mxu3 %vm360_vm5, %v1622_v61 }
 0xf99   :  { %1833 = vmatpush.msra.mxu2 %v3537_v18  ;;  %1856 = vmatpush.msra.mxu3 %v3539_v19 }
 0xf9b   :  { %1834 = vmatpush.msra.mxu2 %v3541_v20  ;;  %1857 = vmatpush.msra.mxu3 %v3545_v33 }
 0xf9d   :  { %1835 = vmatpush.msra.mxu2 %v3551_v45  ;;  %1858 = vmatpush.msra.mxu3 %v3553_v21 }
 0xf9f   :  { %1836 = vmatpush.msra.mxu2 %v3555_v22  ;;  %1859 = vmatpush.msra.mxu3 %v3559_v24 }
 0xfa1   :  { %1837 = vmatpush.msra.mxu2 %v3561_v25  ;;  %1860 = vmatpush.msra.mxu3 %v3563_v26 }
 0xfa3   :  { %1838 = vmatpush.msra.mxu2 %v3567_v27  ;;  %1861 = vmatpush.msra.mxu3 %v3569_v28 }
 0xfa5   :  { %1839 = vmatpush.msra.mxu2 %v3577_v1  ;;  %1862 = vmatpush.msra.mxu3 %v3579_v3 }
 0xfa7   :  { %1840 = vmatpush.msra.mxu2 %v3581_v48  ;;  %1863 = vmatpush.msra.mxu3 %v3585_v8 }
 0xfb7   :  { %v1624_v59 = vpop.permute.xlu0 %1623 }
 0xfb8   :  { %2363 = vmatmul.msk.f32.gmra.mxu2 %vm360_vm5, %v1624_v59  ;;  %2365 = vmatmul.msk.f32.gmra.mxu3 %vm360_vm5, %v1624_v59 }
0x101b   :  { %v1646_v56 = vpop.f32.mrf.mxu2  ;;  %v1669_v52 = vpop.f32.mrf.mxu3 }
0x101c   :  { %v1675_v37 = vadd.f32 %v1646_v56, %v4392_v14  ;;  %v1676_v4 = vadd.f32 %v1669_v52, %v4393_v51  ;;  %v4394_v52 = vsel %vm2944_vm1, %v3741_v53, %v3747_v58 }
0x101e   :  { %v1679_v9 = vmul.f32 0.5, %v1675_v37  ;;  %v1680_v62 = vmul.f32 %v1676_v4, %v3089_v50  ;;  %v4395_v37 = vsel %vm2948_vm2, %v3744_v54, %v3750_v12 }
0x1020   :  { %2528 = vtanh.f32 %v1679_v9 }
0x1021   :  { %2530 = vtanh.f32 %v1680_v62 }
0x1026   :  { %v2529_v17 = vpop.eup %2528 }
0x1027   :  { %v2531_v49 = vpop.eup %2530  ;;  %v1687_v6 = vmul.f32 0.5, %v2529_v17 }
0x1028   :  { %v1688_v2 = vmul.f32 %v2531_v49, %v3089_v50 }
0x1029   :  { %v1691_v42 = vadd.f32 0.5, %v1687_v6 }
0x102a   :  { %v1692_v35 = vadd.f32 %v1688_v2, %v3141_v38 }
0x102c   :  { %v1697_v61 = vmul.f32 %v1692_v35, %v1691_v42 }
0x102e   :  { %1701 = vrot.lane.b32.xlu1 %v1697_v61, %s2731_s2 }
0x103b   :  { %v1649_v59 = vpop.f32.mrf.mxu2  ;;  %v1672_v56 = vpop.f32.mrf.mxu3 }
0x103c   :  { %v1677_v14 = vadd.f32 %v1649_v59, %v4394_v52  ;;  %v1678_v51 = vadd.f32 %v1672_v56, %v4395_v37  ;;  %v1695_v52 = vmul.f32 %v1691_v42, %v3959_v60 }
0x103e   :  { %v1681_v4 = vmul.f32 0.5, %v1677_v14  ;;  %v1682_v9 = vmul.f32 %v1678_v51, %v3089_v50 }
0x1040   :  { %2532 = vtanh.f32 %v1681_v4 }
0x1041   :  { %2534 = vtanh.f32 %v1682_v9 }
0x1046   :  { %v2533_v62 = vpop.eup %2532 }
0x1047   :  { %v2535_v17 = vpop.eup %2534  ;;  %v1689_v49 = vmul.f32 0.5, %v2533_v62 }
0x1048   :  { %v1690_v6 = vmul.f32 %v2535_v17, %v3089_v50 }
0x1049   :  { %v1693_v2 = vadd.f32 0.5, %v1689_v49 }
0x104a   :  { %v1694_v61 = vadd.f32 %v1690_v6, %v3141_v38  ;;  %v4397_v6 = vsel %vm2948_vm2, %v3660_v40, %v3666_v5 }
0x104b   :  { %v1696_v14 = vmul.f32 %v1693_v2, %v3963_v46 }
0x104c   :  { %v1698_v59 = vmul.f32 %v1694_v61, %v1693_v2 }
0x104e   :  { %1703 = vrot.lane.b32.xlu2 %v1698_v59, %s2731_s2 }
0x10a0   :  { %v1702_v10 = vpop.permute.xlu1 %1701 }
0x10a1   :  { %v4017_v56 = vadd.f32 %v1702_v10, %v1695_v52 }
0x10a3   :  { %2536 = vtanh.f32 %v4017_v56 }
0x10a8   :  { %v1704_v37 = vpop.permute.xlu2 %1703 }
0x10a9   :  { %v2537_v51 = vpop.eup %2536  ;;  %v4021_v4 = vadd.f32 %v1704_v37, %v1696_v14  ;;  %v4398_v37 = vsel %vm2944_vm1, %v3685_v13, %v3691_v16 }
0x10aa   :  { %v1711_v9 = vmul.f32 %v2537_v51, %v1692_v35  ;;  %v4396_v35 = vsel %vm2944_vm1, %v3657_v57, %v3663_v55 }
0x10ab   :  { %2538 = vtanh.f32 %v4021_v4 }
0x10ac   :  { %1719 = vrot.lane.b32.xlu0 %v1711_v9, %s2731_s2  ;;  %v4399_v9 = vld [vmem:[#allocation15_spill] sm:$0xff] }
0x10b1   :  { %v2539_v62 = vpop.eup %2538 }
0x10b2   :  { %v1712_v17 = vmul.f32 %v2539_v62, %v1694_v61  ;;  %v4400_v62 = vsel %vm2948_vm2, %v3688_v15, %v4399_v9 }
0x10b4   :  { %1721 = vrot.lane.b32.xlu1 %v1712_v17, %s2731_s2 }
0x111e   :  { %v1720_v60 = vpop.permute.xlu0 %1719 }
0x111f   :  { %2366 = vmatmul.msk.f32.vlgmr.msrb.gmra.mxu2 %vm360_vm5, %v1720_v60  ;;  %2368 = vmatmul.msk.f32.vlgmr.msrb.gmra.mxu3 %vm360_vm5, %v1720_v60 }
0x1120   :  { %1931 = vmatpush.msrb.mxu2 %v3537_v18  ;;  %1954 = vmatpush.msrb.mxu3 %v3539_v19 }
0x1122   :  { %1932 = vmatpush.msrb.mxu2 %v3541_v20  ;;  %1955 = vmatpush.msrb.mxu3 %v3545_v33 }
0x1124   :  { %1933 = vmatpush.msrb.mxu2 %v3551_v45  ;;  %1956 = vmatpush.msrb.mxu3 %v3553_v21 }
0x1126   :  { %v1722_v10 = vpop.permute.xlu1 %1721  ;;  %1934 = vmatpush.msrb.mxu2 %v3555_v22  ;;  %1957 = vmatpush.msrb.mxu3 %v3559_v24 }
0x1127   :  { %2367 = vmatmul.msk.f32.gmra.mxu2 %vm360_vm5, %v1722_v10  ;;  %2369 = vmatmul.msk.f32.gmra.mxu3 %vm360_vm5, %v1722_v10 }
0x1128   :  { %1935 = vmatpush.msrb.mxu2 %v3561_v25  ;;  %1958 = vmatpush.msrb.mxu3 %v3563_v26 }
0x112a   :  { %1936 = vmatpush.msrb.mxu2 %v3567_v27  ;;  %1959 = vmatpush.msrb.mxu3 %v3569_v28 }
0x112c   :  { %1937 = vmatpush.msrb.mxu2 %v3577_v1  ;;  %1960 = vmatpush.msrb.mxu3 %v3579_v3 }
0x112e   :  { %1938 = vmatpush.msrb.mxu2 %v3581_v48  ;;  %1961 = vmatpush.msrb.mxu3 %v3585_v8 }
0x11a2   :  { %v1744_v46 = vpop.f32.mrf.mxu2  ;;  %v1767_v42 = vpop.f32.mrf.mxu3 }
0x11a3   :  { %v1773_v49 = vadd.f32 %v1744_v46, %v4396_v35  ;;  %v1774_v2 = vadd.f32 %v1767_v42, %v4397_v6 }
0x11a5   :  { %v1777_v61 = vmul.f32 0.5, %v1773_v49  ;;  %v1778_v59 = vmul.f32 %v1774_v2, %v3089_v50 }
0x11a7   :  { %2540 = vtanh.f32 %v1777_v61 }
0x11a8   :  { %2542 = vtanh.f32 %v1778_v59 }
0x11aa   :  { %v1747_v52 = vpop.f32.mrf.mxu2  ;;  %v1770_v14 = vpop.f32.mrf.mxu3 }
0x11ab   :  { %v1775_v51 = vadd.f32 %v1747_v52, %v4398_v37  ;;  %v1776_v17 = vadd.f32 %v1770_v14, %v4400_v62 }
0x11ad   :  { %v2541_v60 = vpop.eup %2540  ;;  %v1779_v10 = vmul.f32 0.5, %v1775_v51  ;;  %v1780_v46 = vmul.f32 %v1776_v17, %v3089_v50 }
0x11ae   :  { %v2543_v42 = vpop.eup %2542  ;;  %v1785_v35 = vmul.f32 0.5, %v2541_v60 }
0x11af   :  { %2544 = vtanh.f32 %v1779_v10  ;;  %v1786_v49 = vmul.f32 %v2543_v42, %v3089_v50 }
0x11b0   :  { %v1789_v6 = vadd.f32 0.5, %v1785_v35  ;;  %2546 = vtanh.f32 %v1780_v46 }
0x11b1   :  { %v1790_v2 = vadd.f32 %v1786_v49, %v3141_v38 }
0x11b2   :  { %v1793_v60 = vmul.f32 %v1789_v6, %v4017_v56 }
0x11b3   :  { %v1795_v61 = vmul.f32 %v1790_v2, %v1789_v6 }
0x11b5   :  { %v2545_v59 = vpop.eup %2544  ;;  %1799 = vrot.lane.b32.xlu2 %v1795_v61, %s2731_s2 }
0x11b6   :  { %v2547_v52 = vpop.eup %2546  ;;  %v1787_v37 = vmul.f32 0.5, %v2545_v59 }
0x11b7   :  { %v1788_v14 = vmul.f32 %v2547_v52, %v3089_v50 }
0x11b8   :  { %v1791_v51 = vadd.f32 0.5, %v1787_v37 }
0x11b9   :  { %v1792_v62 = vadd.f32 %v1788_v14, %v3141_v38 }
0x11ba   :  { %v1794_v49 = vmul.f32 %v1791_v51, %v4021_v4 }
0x11bb   :  { %v1796_v17 = vmul.f32 %v1792_v62, %v1791_v51 }
0x11bd   :  { %1801 = vrot.lane.b32.xlu0 %v1796_v17, %s2731_s2 }
0x120f   :  { %v1800_v10 = vpop.permute.xlu2 %1799 }
0x1210   :  { %v4075_v46 = vadd.f32 %v1800_v10, %v1793_v60  ;;  %v4403_v10 = vsel %vm2944_vm1, %v3691_v16, %v3685_v13 }
0x1212   :  { %2548 = vtanh.f32 %v4075_v46 }
0x1218   :  { %v2549_v42 = vpop.eup %2548 }
0x1219   :  { %v1809_v35 = vmul.f32 %v2549_v42, %v1790_v2  ;;  %v4402_v2 = vsel %vm2948_vm2, %v3666_v5, %v3660_v40 }
0x121b   :  { %1817 = vrot.lane.b32.xlu1 %v1809_v35, %s2731_s2 }
0x122f   :  { %v1802_v61 = vpop.permute.xlu0 %1801 }
0x1230   :  { %v4080_v59 = vadd.f32 %v1802_v61, %v1794_v49 }
0x1232   :  { %2550 = vtanh.f32 %v4080_v59 }
0x1238   :  { %v2551_v52 = vpop.eup %2550 }
0x1239   :  { %v1810_v37 = vmul.f32 %v2551_v52, %v1792_v62 }
0x123b   :  { %1819 = vrot.lane.b32.xlu2 %v1810_v37, %s2731_s2 }
0x128d   :  { %v1818_v56 = vpop.permute.xlu1 %1817 }
0x128e   :  { %2370 = vmatmul.msk.f32.vlgmr.msra.gmra.mxu2 %vm360_vm5, %v1818_v56  ;;  %2372 = vmatmul.msk.f32.vlgmr.msra.gmra.mxu3 %vm360_vm5, %v1818_v56 }
0x128f   :  { %2029 = vmatpush.msra.mxu2 %v3537_v18  ;;  %2052 = vmatpush.msra.mxu3 %v3539_v19 }
0x1291   :  { %2030 = vmatpush.msra.mxu2 %v3541_v20  ;;  %2053 = vmatpush.msra.mxu3 %v3545_v33  ;;  %v4401_v20 = vsel %vm2944_vm1, %v3663_v55, %v3657_v57  ;;  %v4404_v55 = vsel %vm2948_vm2, %v4399_v9, %v3688_v15 }
0x1293   :  { %2031 = vmatpush.msra.mxu2 %v3551_v45  ;;  %2054 = vmatpush.msra.mxu3 %v3553_v21 }
0x1295   :  { %v1820_v4 = vpop.permute.xlu2 %1819  ;;  %2032 = vmatpush.msra.mxu2 %v3555_v22  ;;  %2055 = vmatpush.msra.mxu3 %v3559_v24 }
0x1296   :  { %2371 = vmatmul.msk.f32.gmra.mxu2 %vm360_vm5, %v1820_v4  ;;  %2373 = vmatmul.msk.f32.gmra.mxu3 %vm360_vm5, %v1820_v4 }
0x1297   :  { %2033 = vmatpush.msra.mxu2 %v3561_v25  ;;  %2056 = vmatpush.msra.mxu3 %v3563_v26 }
0x1299   :  { %2034 = vmatpush.msra.mxu2 %v3567_v27  ;;  %2057 = vmatpush.msra.mxu3 %v3569_v28 }
0x129b   :  { %2035 = vmatpush.msra.mxu2 %v3577_v1  ;;  %2058 = vmatpush.msra.mxu3 %v3579_v3 }
0x129d   :  { %2036 = vmatpush.msra.mxu2 %v3581_v48  ;;  %2059 = vmatpush.msra.mxu3 %v3585_v8 }
0x1311   :  { %v1842_v18 = vpop.f32.mrf.mxu2  ;;  %v1865_v19 = vpop.f32.mrf.mxu3 }
0x1312   :  { %v1871_v6 = vadd.f32 %v1842_v18, %v4401_v20  ;;  %v1872_v14 = vadd.f32 %v1865_v19, %v4402_v2 }
0x1314   :  { %v1875_v51 = vmul.f32 0.5, %v1871_v6  ;;  %v1876_v62 = vmul.f32 %v1872_v14, %v3089_v50 }
0x1316   :  { %2552 = vtanh.f32 %v1875_v51 }
0x1317   :  { %2554 = vtanh.f32 %v1876_v62 }
0x1319   :  { %v1845_v17 = vpop.f32.mrf.mxu2  ;;  %v1868_v60 = vpop.f32.mrf.mxu3 }
0x131a   :  { %v1873_v57 = vadd.f32 %v1845_v17, %v4403_v10  ;;  %v1874_v40 = vadd.f32 %v1868_v60, %v4404_v55 }
0x131c   :  { %v2553_v5 = vpop.eup %2552  ;;  %v1877_v42 = vmul.f32 0.5, %v1873_v57  ;;  %v1878_v35 = vmul.f32 %v1874_v40, %v3089_v50  ;;  %v2616_v40 = vld [vmem:[#allocation8 + $0x70] sm:$0xff] }
0x131d   :  { %v2555_v49 = vpop.eup %2554  ;;  %v1883_v61 = vmul.f32 0.5, %v2553_v5  ;;  %v2618_v5 = vld [vmem:[#allocation8 + $0x60] sm:$0xff] }
0x131e   :  { %2556 = vtanh.f32 %v1877_v42  ;;  %v1884_v52 = vmul.f32 %v2555_v49, %v3089_v50 }
0x131f   :  { %v1887_v37 = vadd.f32 0.5, %v1883_v61  ;;  %2558 = vtanh.f32 %v1878_v35  ;;  %v4408_v61 = vsel %vm2948_vm2, %v3750_v12, %v3744_v54 }
0x1320   :  { %v1888_v13 = vadd.f32 %v1884_v52, %v3141_v38 }
0x1321   :  { %v1891_v6 = vmul.f32 %v1887_v37, %v4075_v46 }
0x1322   :  { %v1893_v16 = vmul.f32 %v1888_v13, %v1887_v37 }
0x1324   :  { %v2557_v56 = vpop.eup %2556  ;;  %1897 = vrot.lane.b32.xlu0 %v1893_v16, %s2731_s2 }
0x1325   :  { %v2559_v4 = vpop.eup %2558  ;;  %v1885_v15 = vmul.f32 0.5, %v2557_v56 }
0x1326   :  { %v1886_v9 = vmul.f32 %v2559_v4, %v3089_v50 }
0x1327   :  { %v1889_v18 = vadd.f32 0.5, %v1885_v15 }
0x1328   :  { %v1890_v19 = vadd.f32 %v1886_v9, %v3141_v38 }
0x1329   :  { %v1892_v51 = vmul.f32 %v1889_v18, %v4080_v59  ;;  %v2617_v59 = vld [vmem:[#allocation8 + $0x78] sm:$0xff] }
0x132a   :  { %v1894_v20 = vmul.f32 %v1890_v19, %v1889_v18 }
0x132c   :  { %1899 = vrot.lane.b32.xlu1 %v1894_v20, %s2731_s2 }
0x1396   :  { %v1898_v2 = vpop.permute.xlu0 %1897 }
0x1397   :  { %v4133_v14 = vadd.f32 %v1898_v2, %v1891_v6 }
0x1399   :  { %2560 = vtanh.f32 %v4133_v14 }
0x139e   :  { %v1900_v62 = vpop.permute.xlu1 %1899 }
0x139f   :  { %v2561_v17 = vpop.eup %2560  ;;  %v4137_v60 = vadd.f32 %v1900_v62, %v1892_v51 }
0x13a0   :  { %v1907_v10 = vmul.f32 %v2561_v17, %v1888_v13 }
0x13a1   :  { %2562 = vtanh.f32 %v4137_v60 }
0x13a2   :  { %1915 = vrot.lane.b32.xlu2 %v1907_v10, %s2731_s2 }
0x13a7   :  { %v2563_v57 = vpop.eup %2562 }
0x13a8   :  { %v1908_v55 = vmul.f32 %v2563_v57, %v1890_v19 }
0x13aa   :  { %1917 = vrot.lane.b32.xlu0 %v1908_v55, %s2731_s2  ;;  %v4409_v55 = vsel %vm2944_vm1, %v3775_v32, %v3769_v11  ;;  %v4412_v11 = vsel %vm2948_vm2, %v3808_v31, %v3802_v47 }
0x13fc   :  { %v1916_v46 = vpop.permute.xlu2 %1915 }
0x13fd   :  { %2374 = vmatmul.msk.f32.vlgmr.msrb.gmra.mxu2 %vm360_vm5, %v1916_v46  ;;  %2376 = vmatmul.msk.f32.vlgmr.msrb.gmra.mxu3 %vm360_vm5, %v1916_v46 }
0x13fe   :  { %2127 = vmatpush.msrb.mxu2 %v2616_v40  ;;  %2150 = vmatpush.msrb.mxu3 %v2617_v59  ;;  %v4410_v40 = vsel %vm2948_vm2, %v3778_v7, %v3772_v36 }
0x1400   :  { %2128 = vmatpush.msrb.mxu2 %v2618_v5  ;;  %2151 = vmatpush.msrb.mxu3 %v3545_v33 }
0x1402   :  { %2129 = vmatpush.msrb.mxu2 %v3551_v45  ;;  %2152 = vmatpush.msrb.mxu3 %v3553_v21 }
0x1404   :  { %2130 = vmatpush.msrb.mxu2 %v3555_v22  ;;  %2153 = vmatpush.msrb.mxu3 %v3559_v24  ;;  %v4405_v22 = vsel %vm2944_vm1, %v3719_v41, %v3713_v30 }
0x1406   :  { %2131 = vmatpush.msrb.mxu2 %v3561_v25  ;;  %2154 = vmatpush.msrb.mxu3 %v3563_v26  ;;  %v4406_v25 = vsel %vm2948_vm2, %v3722_v39, %v3716_v43  ;;  %v4407_v43 = vsel %vm2944_vm1, %v3747_v58, %v3741_v53 }
0x1408   :  { %2132 = vmatpush.msrb.mxu2 %v3567_v27  ;;  %2155 = vmatpush.msrb.mxu3 %v3569_v28 }
0x140a   :  { %2133 = vmatpush.msrb.mxu2 %v3577_v1  ;;  %2156 = vmatpush.msrb.mxu3 %v3579_v3 }
0x140c   :  { %2134 = vmatpush.msrb.mxu2 %v3581_v48  ;;  %2157 = vmatpush.msrb.mxu3 %v3585_v8 }
0x141c   :  { %v1918_v33 = vpop.permute.xlu0 %1917 }
0x141d   :  { %2375 = vmatmul.msk.f32.gmra.mxu2 %vm360_vm5, %v1918_v33  ;;  %2377 = vmatmul.msk.f32.gmra.mxu3 %vm360_vm5, %v1918_v33 }
0x1480   :  { %v1940_v45 = vpop.f32.mrf.mxu2  ;;  %v1963_v21 = vpop.f32.mrf.mxu3 }
0x1481   :  { %v1969_v24 = vadd.f32 %v1940_v45, %v4405_v22  ;;  %v1970_v26 = vadd.f32 %v1963_v21, %v4406_v25  ;;  %v4411_v22 = vsel %vm2944_vm1, %v3805_v29, %v3798_v44 }
0x1483   :  { %v1973_v27 = vmul.f32 0.5, %v1969_v24  ;;  %v1974_v28 = vmul.f32 %v1970_v26, %v3089_v50 }
0x1485   :  { %2564 = vtanh.f32 %v1973_v27 }
0x1486   :  { %2566 = vtanh.f32 %v1974_v28 }
0x148b   :  { %v2565_v1 = vpop.eup %2564 }
0x148c   :  { %v2567_v3 = vpop.eup %2566  ;;  %v1981_v48 = vmul.f32 0.5, %v2565_v1 }
0x148d   :  { %v1982_v8 = vmul.f32 %v2567_v3, %v3089_v50 }
0x148e   :  { %v1985_v42 = vadd.f32 0.5, %v1981_v48 }
0x148f   :  { %v1986_v30 = vadd.f32 %v1982_v8, %v3141_v38 }
0x1490   :  { %v1989_v18 = vmul.f32 %v1985_v42, %v4133_v14 }
0x1491   :  { %v1991_v41 = vmul.f32 %v1986_v30, %v1985_v42 }
0x1493   :  { %1995 = vrot.lane.b32.xlu1 %v1991_v41, %s2731_s2 }
0x14a0   :  { %v1943_v35 = vpop.f32.mrf.mxu2  ;;  %v1966_v49 = vpop.f32.mrf.mxu3 }
0x14a1   :  { %v1971_v39 = vadd.f32 %v1943_v35, %v4407_v43  ;;  %v1972_v52 = vadd.f32 %v1966_v49, %v4408_v61 }
0x14a3   :  { %v1975_v37 = vmul.f32 0.5, %v1971_v39  ;;  %v1976_v13 = vmul.f32 %v1972_v52, %v3089_v50 }
0x14a5   :  { %2568 = vtanh.f32 %v1975_v37 }
0x14a6   :  { %2570 = vtanh.f32 %v1976_v13 }
0x14ab   :  { %v2569_v16 = vpop.eup %2568 }
0x14ac   :  { %v2571_v56 = vpop.eup %2570  ;;  %v1983_v4 = vmul.f32 0.5, %v2569_v16 }
0x14ad   :  { %v1984_v15 = vmul.f32 %v2571_v56, %v3089_v50 }
0x14ae   :  { %v1987_v9 = vadd.f32 0.5, %v1983_v4 }
0x14af   :  { %v1988_v53 = vadd.f32 %v1984_v15, %v3141_v38 }
0x14b0   :  { %v1990_v19 = vmul.f32 %v1987_v9, %v4137_v60 }
0x14b1   :  { %v1992_v58 = vmul.f32 %v1988_v53, %v1987_v9 }
0x14b3   :  { %1997 = vrot.lane.b32.xlu2 %v1992_v58, %s2731_s2 }
0x1505   :  { %v1996_v54 = vpop.permute.xlu1 %1995 }
0x1506   :  { %v2001_v12 = vadd.f32 %v1996_v54, %v1989_v18  ;;  %v4415_v54 = vld [vmem:[#allocation16_spill] sm:$0xff] }
0x1508   :  { %2572 = vtanh.f32 %v2001_v12 }
0x150d   :  { %v1998_v20 = vpop.permute.xlu2 %1997 }
0x150e   :  { %v2573_v6 = vpop.eup %2572  ;;  %v2002_v2 = vadd.f32 %v1998_v20, %v1990_v19 }
0x150f   :  { %v2005_v51 = vmul.f32 %v2573_v6, %v1986_v30 }
0x1510   :  { %2574 = vtanh.f32 %v2002_v2 }
0x1511   :  { %2013 = vrot.lane.b32.xlu0 %v2005_v51, %s2731_s2 }
0x1516   :  { %v2575_v62 = vpop.eup %2574 }
0x1517   :  { %v2006_v17 = vmul.f32 %v2575_v62, %v1988_v53  ;;  %v4413_v53 = vld [vmem:[#allocation14_spill] sm:$0xff]  ;;  %v4417_v62 = vld [vmem:[#allocation21_spill] sm:$0xff] }
0x1518   :  { %v4414_v58 = vsel %vm2944_vm1, %v3835_v34, %v4413_v53 }
0x1519   :  { %2015 = vrot.lane.b32.xlu1 %v2006_v17, %s2731_s2  ;;  %v4418_v17 = vld [vmem:[#allocation18_spill] sm:$0xff] }
0x1583   :  { %v2014_v10 = vpop.permute.xlu0 %2013 }
0x1584   :  { %2378 = vmatmul.msk.f32.vlgmr.msra.gmra.mxu2 %vm360_vm5, %v2014_v10  ;;  %2380 = vmatmul.msk.f32.vlgmr.msra.gmra.mxu3 %vm360_vm5, %v2014_v10  ;;  %v4419_v10 = vsel %vm2944_vm1, %v4417_v62, %v4418_v17 }
0x158b   :  { %v2016_v14 = vpop.permute.xlu1 %2015 }
0x158c   :  { %2379 = vmatmul.msk.f32.gmra.mxu2 %vm360_vm5, %v2016_v14  ;;  %2381 = vmatmul.msk.f32.gmra.mxu3 %vm360_vm5, %v2016_v14  ;;  %v4420_v14 = vld [vmem:[#allocation19_spill] sm:$0xff] }
0x1607   :  { %v2038_v60 = vpop.f32.mrf.mxu2  ;;  %v2061_v57 = vpop.f32.mrf.mxu3 }
0x1608   :  { %v2067_v46 = vadd.f32 %v2038_v60, %v4409_v55  ;;  %v2068_v59 = vadd.f32 %v2061_v57, %v4410_v40  ;;  %v4421_v60 = vld [vmem:[#allocation17_spill] sm:$0xff] }
0x1609   :  { %v4422_v57 = vsel %vm2948_vm2, %v4420_v14, %v4421_v60 }
0x160a   :  { %v2071_v5 = vmul.f32 0.5, %v2067_v46  ;;  %v2072_v33 = vmul.f32 %v2068_v59, %v3089_v50 }
0x160c   :  { %2576 = vtanh.f32 %v2071_v5 }
0x160d   :  { %2578 = vtanh.f32 %v2072_v33 }
0x160f   :  { %v2041_v45 = vpop.f32.mrf.mxu2  ;;  %v2064_v21 = vpop.f32.mrf.mxu3 }
0x1610   :  { %v2069_v32 = vadd.f32 %v2041_v45, %v4411_v22  ;;  %v2070_v7 = vadd.f32 %v2064_v21, %v4412_v11 }
0x1612   :  { %v2577_v36 = vpop.eup %2576  ;;  %v2073_v24 = vmul.f32 0.5, %v2069_v32  ;;  %v2074_v25 = vmul.f32 %v2070_v7, %v3089_v50 }
0x1613   :  { %v2579_v26 = vpop.eup %2578  ;;  %v2079_v27 = vmul.f32 0.5, %v2577_v36 }
0x1614   :  { %2580 = vtanh.f32 %v2073_v24  ;;  %v2080_v28 = vmul.f32 %v2579_v26, %v3089_v50  ;;  %v2221_v26 = vld [vmem:[%s4312_s7 + $0x30] sm:$0xff] }
0x1615   :  { %v2083_v1 = vadd.f32 0.5, %v2079_v27  ;;  %2582 = vtanh.f32 %v2074_v25  ;;  %v2222_v25 = vld [vmem:[%s4312_s7 + $0x38] sm:$0xff] }
0x1616   :  { %v2084_v44 = vadd.f32 %v2080_v28, %v3141_v38  ;;  %2241 = vmatpush.msra.mxu0 %v2222_v25  ;;  %2388 = vmatpush.msra.mxu1 %v2222_v25  ;;  %v2218_v27 = vld [vmem:[%s4312_s7 + $0x18] sm:$0xff]  ;;  %v2217_v28 = vld [vmem:[%s4312_s7 + $0x10] sm:$0xff] }
0x1617   :  { %v2087_v41 = vmul.f32 %v2083_v1, %v2001_v12  ;;  %v4416_v12 = vsel %vm2948_vm2, %v3838_v23, %v4415_v54 }
0x1618   :  { %v2089_v29 = vmul.f32 %v2084_v44, %v2083_v1  ;;  %2242 = vmatpush.msra.mxu0 %v2221_v26  ;;  %2389 = vmatpush.msra.mxu1 %v2221_v26  ;;  %v2216_v1 = vld [vmem:[%s4312_s7 + $0x8] sm:$0xff] }
0x161a   :  { %v2581_v3 = vpop.eup %2580  ;;  %2093 = vrot.lane.b32.xlu2 %v2089_v29, %s2731_s2 }
0x161b   :  { %v2583_v48 = vpop.eup %2582  ;;  %v2081_v47 = vmul.f32 0.5, %v2581_v3 }
0x161c   :  { %v2082_v31 = vmul.f32 %v2583_v48, %v3089_v50 }
0x161d   :  { %v2085_v8 = vadd.f32 0.5, %v2081_v47 }
0x161e   :  { %v2086_v42 = vadd.f32 %v2082_v31, %v3141_v38 }
0x161f   :  { %v2088_v61 = vmul.f32 %v2085_v8, %v2002_v2 }
0x1620   :  { %v2090_v30 = vmul.f32 %v2086_v42, %v2085_v8 }
0x1622   :  { %2095 = vrot.lane.b32.xlu0 %v2090_v30, %s2731_s2 }
0x1674   :  { %v2094_v35 = vpop.permute.xlu2 %2093 }
0x1675   :  { %v4223_v49 = vadd.f32 %v2094_v35, %v2087_v41  ;;  %v2215_v35 = vld [vmem:[%s4312_s7] sm:$0xff] }
0x1677   :  { %2584 = vtanh.f32 %v4223_v49 }
0x167d   :  { %v2585_v43 = vpop.eup %2584 }
0x167e   :  { %v2103_v39 = vmul.f32 %v2585_v43, %v2084_v44 }
0x1680   :  { %2111 = vrot.lane.b32.xlu1 %v2103_v39, %s2731_s2  ;;  %v4424_v39 = vld [vmem:[#allocation22_spill] sm:$0xff] }
0x1694   :  { %v2096_v52 = vpop.permute.xlu0 %2095 }
0x1695   :  { %v4227_v37 = vadd.f32 %v2096_v52, %v2088_v61 }
0x1697   :  { %2586 = vtanh.f32 %v4227_v37 }
0x169d   :  { %v2587_v13 = vpop.eup %2586 }
0x169e   :  { %v2104_v16 = vmul.f32 %v2587_v13, %v2086_v42 }
0x16a0   :  { %2113 = vrot.lane.b32.xlu2 %v2104_v16, %s2731_s2  ;;  %v2407_v16 = vld [vmem:[%s4313_s8] ss:$0 sm:$0xff] }
0x16f2   :  { %v2112_v56 = vpop.permute.xlu1 %2111 }
0x16f3   :  { %2382 = vmatmul.msk.f32.vlgmr.msrb.gmra.mxu2 %vm360_vm5, %v2112_v56  ;;  %2384 = vmatmul.msk.f32.vlgmr.msrb.gmra.mxu3 %vm360_vm5, %v2112_v56 }
0x16fa   :  { %v2114_v4 = vpop.permute.xlu2 %2113 }
0x16fb   :  { %2383 = vmatmul.msk.f32.gmra.mxu2 %vm360_vm5, %v2114_v4  ;;  %2385 = vmatmul.msk.f32.gmra.mxu3 %vm360_vm5, %v2114_v4 }
0x1776   :  { %v2136_v15 = vpop.f32.mrf.mxu2  ;;  %v2159_v9 = vpop.f32.mrf.mxu3 }
0x1777   :  { %v2165_v18 = vadd.f32 %v2136_v15, %v4414_v58  ;;  %v2166_v19 = vadd.f32 %v2159_v9, %v4416_v12 }
0x1779   :  { %v2169_v20 = vmul.f32 0.5, %v2165_v18  ;;  %v2170_v6 = vmul.f32 %v2166_v19, %v3089_v50 }
0x177b   :  { %2588 = vtanh.f32 %v2169_v20 }
0x177c   :  { %2590 = vtanh.f32 %v2170_v6 }
0x177e   :  { %v2139_v2 = vpop.f32.mrf.mxu2  ;;  %v2162_v51 = vpop.f32.mrf.mxu3 }
0x177f   :  { %v2167_v34 = vadd.f32 %v2139_v2, %v4419_v10  ;;  %v2168_v23 = vadd.f32 %v2162_v51, %v4422_v57 }
0x1781   :  { %v2589_v55 = vpop.eup %2588  ;;  %v2171_v46 = vmul.f32 0.5, %v2167_v34  ;;  %v2172_v40 = vmul.f32 %v2168_v23, %v3089_v50 }
0x1782   :  { %v2591_v59 = vpop.eup %2590  ;;  %v2177_v5 = vmul.f32 0.5, %v2589_v55 }
0x1783   :  { %2592 = vtanh.f32 %v2171_v46  ;;  %v2178_v33 = vmul.f32 %v2591_v59, %v3089_v50 }
0x1784   :  { %v2181_v63 = vadd.f32 0.5, %v2177_v5  ;;  %2594 = vtanh.f32 %v2172_v40 }
0x1785   :  { %v2182_v45 = vadd.f32 %v2178_v33, %v3141_v38 }
0x1786   :  { %v2185_v44 = vmul.f32 %v2181_v63, %v4223_v49  ;;  %v4423_v49 = vld [vmem:[#allocation13_spill] sm:$0xff] }
0x1787   :  { %v2187_v21 = vmul.f32 %v2182_v45, %v2181_v63  ;;  %vm134_vm7 = vcmp.lt.s32.totalorder %v4423_v49, 32 }
0x1789   :  { %v2593_v22 = vpop.eup %2592  ;;  %2191 = vrot.lane.b32.xlu0 %v2187_v21, %s2731_s2 }
0x178a   :  { %v2595_v0 = vpop.eup %2594  ;;  %v2179_v32 = vmul.f32 0.5, %v2593_v22 }
0x178b   :  { %v2180_v11 = vmul.f32 %v2595_v0, %v3089_v50  ;;  %v2220_v50 = vld [vmem:[%s4312_s7 + $0x28] sm:$0xff] }
0x178c   :  { %v2183_v7 = vadd.f32 0.5, %v2179_v32  ;;  %2243 = vmatpush.msra.mxu0 %v2220_v50  ;;  %2390 = vmatpush.msra.mxu1 %v2220_v50 }
0x178d   :  { %v2184_v36 = vadd.f32 %v2180_v11, %v3141_v38  ;;  %v2219_v38 = vld [vmem:[%s4312_s7 + $0x20] sm:$0xff] }
0x178e   :  { %2244 = vmatpush.msra.mxu0 %v2219_v38  ;;  %2391 = vmatpush.msra.mxu1 %v2219_v38  ;;  %v2186_v48 = vmul.f32 %v2183_v7, %v4227_v37  ;;  %v4425_v37 = vld [vmem:[#allocation20_spill] sm:$0xff] }
0x178f   :  { %v2188_v24 = vmul.f32 %v2184_v36, %v2183_v7 }
0x1790   :  { %2245 = vmatpush.msra.mxu0 %v2218_v27  ;;  %2392 = vmatpush.msra.mxu1 %v2218_v27 }
0x1791   :  { %2193 = vrot.lane.b32.xlu1 %v2188_v24, %s2731_s2 }
0x1792   :  { %2246 = vmatpush.msra.mxu0 %v2217_v28  ;;  %2393 = vmatpush.msra.mxu1 %v2217_v28 }
0x1794   :  { %2247 = vmatpush.msra.mxu0 %v2216_v1  ;;  %2394 = vmatpush.msra.mxu1 %v2216_v1 }
0x1796   :  { %2248 = vmatpush.msra.mxu0 %v2215_v35  ;;  %2395 = vmatpush.msra.mxu1 %v2215_v35 }
0x17fb   :  { %v2192_v29 = vpop.permute.xlu0 %2191 }
0x17fc   :  { %v2197_v3 = vadd.f32 %v2192_v29, %v2185_v44 }
0x17fe   :  { %2596 = vtanh.f32 %v2197_v3 }
0x1803   :  { %v2194_v47 = vpop.permute.xlu1 %2193 }
0x1804   :  { %v2597_v31 = vpop.eup %2596  ;;  %v2198_v8 = vadd.f32 %v2194_v47, %v2186_v48 }
0x1805   :  { %v2201_v42 = vmul.f32 %v2597_v31, %v2182_v45 }
0x1806   :  { %2598 = vtanh.f32 %v2198_v8 }
0x1807   :  { %2205 = vrot.lane.b32.xlu2 %v2201_v42, %s2731_s2 }
0x180c   :  { %v2599_v30 = vpop.eup %2598 }
0x180d   :  { %v2202_v41 = vmul.f32 %v2599_v30, %v2184_v36 }
0x180f   :  { %2207 = vrot.lane.b32.xlu0 %v2202_v41, %s2731_s2 }
0x1861   :  { %v2206_v43 = vpop.permute.xlu2 %2205 }
0x1862   :  { %v2213_v61 = vsel %vm134_vm7, %v2206_v43, %v4424_v39 }
0x1863   :  { %2386 = vmatmul.msk.f32.vlgmr.msra.gmra.mxu0 %vm360_vm5, %v2213_v61 }
0x1881   :  { %v2208_v52 = vpop.permute.xlu0 %2207 }
0x1882   :  { %v2214_v13 = vsel %vm134_vm7, %v2208_v52, %v4425_v37 }
0x1883   :  { %2387 = vmatmul.msk.f32.vlgmr.msra.gmra.mxu1 %vm360_vm5, %v2214_v13 }
0x18e0   :  { %v2250_v56 = vpop.f32.mrf.mxu0 }
0x18e1   :  { %v2251_v4 = vadd.f32 %v2407_v16, %v2250_v56 }
0x18e3   :  { %2257 = vst.msk [vmem:[%s4314_s9] sm:$0xff] %vm2256_vm8, %v2251_v4 }
0x1900   :  { %v2253_v15 = vpop.f32.mrf.mxu1 }
0x1901   :  { %v2254_v9 = vadd.f32 %v2407_v16, %v2253_v15 }
0x1903   :  { %2258 = vst.msk [vmem:[%s4314_s9 + $0x8] sm:$0xff] %vm2256_vm8, %v2254_v9 }
0x1904   :  { %2263 = vsyncpa [#allocation4], 1 }
0x1905   :  { %2264 = vsyncpa [#allocation6], 1 }
0x1906   :  { %2265 = vsyncpa [#allocation9], 1 }

</bundles_post_ra>
